<compile_context>
chip_gen: v5e
topology: v5e:2x2
jax: 0.10.0
libtpu: 0.0.40
codegen_flags: <defaults>
</compile_context>

<pallas_src>
import functools
import math

import jax
import jax.numpy as jnp
from jax import lax
from jax.experimental import pallas as pl
from jax.experimental.pallas import tpu as pltpu

_LANE = 128
_SUBLANE = 8


def _round_up(x, m):
    return (x + m - 1) // m * m


def _unroll_for(T):
    # full unroll for short loops, partial unroll for long ones (vreg pressure)
    return True if T <= 16 else 8


def _nbytes(x):
    return int(math.prod(x.shape)) * jnp.dtype(x.dtype).itemsize


def _vmem_limit(total_io_bytes):
    est = 2 * int(total_io_bytes) + (4 << 20)
    return int(min(max(est, 16 << 20), 64 << 20))


def _pad2(x, rows, cols):
    return jnp.pad(x, ((0, rows - x.shape[0]), (0, cols - x.shape[1])))


# ----------------------------------------------------------------------------
# Encoder kernel: single-layer tanh RNN; grid axis = source index ("parallel").
# ----------------------------------------------------------------------------
def _rnn_encoder_kernel(emb_ref, len_ref, w_ih_ref, w_hh_ref, b_ref,
                        mem_ref, hfin_ref, xw_ref):
    # emb_ref : (1, T*B, E) bf16   len_ref : (1, B, 1) int32
    # w_ih    : (1, E, H)  bf16    w_hh    : (1, H, H) bf16   b: (1, 1, H) f32
    # mem_ref : (1, T, B, H) bf16  hfin_ref: (1, B, H) f32
    # xw_ref  : (T*B, H) f32 scratch (hoisted input projection)
    T = mem_ref.shape[1]
    B = mem_ref.shape[2]
    H = mem_ref.shape[3]

    # One big MXU matmul instead of T small ones on the serial chain.
    xw_ref[...] = jnp.dot(emb_ref[0], w_ih_ref[0],
                          preferred_element_type=jnp.float32)

    w_hh = w_hh_ref[0]                     # (H, H) bf16
    b = b_ref[0]                           # (1, H) f32
    lens = len_ref[0]                      # (B, 1) int32

    def body(t, h):
        row = pl.multiple_of(t * B, _SUBLANE)
        xw_t = xw_ref[pl.ds(row, B), :]    # (B, H) f32
        h_new = jnp.tanh(
            xw_t
            + jnp.dot(h.astype(jnp.bfloat16), w_hh,
                      preferred_element_type=jnp.float32)
            + b)
        # packed-RNN semantics: freeze rows past their true length so the
        # final state equals the hidden at each row's length.
        h_next = jnp.where(t < lens, h_new, h)
        mem_ref[0, t] = h_next.astype(mem_ref.dtype)
        return h_next

    h0 = jnp.zeros((B, H), jnp.float32)
    h_fin = lax.fori_loop(0, T, body, h0, unroll=_unroll_for(T))
    hfin_ref[0] = h_fin


def run_encoders(emb_all, len_all, w_ih_all, w_hh_all, b_all, T):
    n_src, TB, E = emb_all.shape
    B = TB // T
    H = w_hh_all.shape[-1]

    out_shape = (jax.ShapeDtypeStruct((n_src, T, B, H), jnp.bfloat16),
                 jax.ShapeDtypeStruct((n_src, B, H), jnp.float32))

    in_specs = [
        pl.BlockSpec((1, TB, E), lambda s: (s, 0, 0)),
        pl.BlockSpec((1, B, 1), lambda s: (s, 0, 0)),
        pl.BlockSpec((1, E, H), lambda s: (s, 0, 0)),
        pl.BlockSpec((1, H, H), lambda s: (s, 0, 0)),
        pl.BlockSpec((1, 1, H), lambda s: (s, 0, 0)),
    ]
    out_specs = (
        pl.BlockSpec((1, T, B, H), lambda s: (s, 0, 0, 0)),
        pl.BlockSpec((1, B, H), lambda s: (s, 0, 0)),
    )

    io_bytes = (sum(_nbytes(x) for x in
                    (emb_all, len_all, w_ih_all, w_hh_all, b_all))
                + sum(_nbytes(s) for s in out_shape)
                + TB * H * 4)

    return pl.pallas_call(
        _rnn_encoder_kernel,
        out_shape=out_shape,
        grid=(n_src,),
        in_specs=in_specs,
        out_specs=out_specs,
        scratch_shapes=[pltpu.VMEM((TB, H), jnp.float32)],
        compiler_params=pltpu.CompilerParams(
            dimension_semantics=("parallel",),
            vmem_limit_bytes=_vmem_limit(io_bytes)),
    )(emb_all, len_all, w_ih_all, w_hh_all, b_all)


# ----------------------------------------------------------------------------
# Decoder kernel: tanh RNN + Luong-general attention over two memory banks.
# Keys (mem @ Wa^T) are precomputed; only the recurrence stays serial.
# ----------------------------------------------------------------------------
def _decoder_kernel(tgt_emb_ref, h0_ref, mem0_ref, key0_ref, mem1_ref, key1_ref,
                    len0_ref, len1_ref,
                    w_ih_ref, w_hh_ref, b_dec_ref, w_out_ref, b_out_ref,
                    dec_out_ref, attn0_ref, attn1_ref,
                    xw_ref, hc_ref):
    # tgt_emb : (T*B, E) bf16     h0    : (B, H) f32
    # mem*/key*: (S, B, H) bf16   len*  : (1, B) int32
    # w_ih (E,H) bf16, w_hh (H,H) bf16, b_dec (1,H) f32
    # w_out (3H,H) bf16, b_out (1,H) f32
    # dec_out (T,B,H) f32, attn* (T,S,B) f32
    # xw (T*B,H) f32 scratch, hc (B,3H) bf16 scratch
    T, B, H = dec_out_ref.shape
    S0 = mem0_ref.shape[0]
    S1 = mem1_ref.shape[0]

    # Hoisted one-time MXU work (off the serial recurrence).
    xw_ref[...] = jnp.dot(tgt_emb_ref[...], w_ih_ref[...],
                          preferred_element_type=jnp.float32)

    w_hh = w_hh_ref[...]
    b_dec = b_dec_ref[...]
    w_out = w_out_ref[...]
    b_out = b_out_ref[...]
    mem0 = mem0_ref[...]
    mem1 = mem1_ref[...]
    key0 = key0_ref[...]
    key1 = key1_ref[...]

    mask0 = lax.broadcasted_iota(jnp.int32, (S0, B), 0) < len0_ref[...]
    mask1 = lax.broadcasted_iota(jnp.int32, (S1, B), 0) < len1_ref[...]
    neg = jnp.float32(-1e30)
    eps = jnp.float32(1e-20)

    def attend(h, keys, mem, mask):
        # score(h, m) = h @ Wa @ m^T  with keys = m @ Wa^T precomputed.
        scores = jnp.sum(h[None, :, :] * keys, axis=-1)        # (S, B) f32
        scores = jnp.where(mask, scores, neg)
        m = jnp.max(scores, axis=0, keepdims=True)             # (1, B)
        e = jnp.where(mask, jnp.exp(scores - m), 0.0)          # (S, B)
        denom = jnp.sum(e, axis=0, keepdims=True)              # (1, B)
        alpha = e * pl.reciprocal(denom + eps, approx=True)    # (S, B)
        ctx = jnp.sum(alpha[:, :, None] * mem, axis=0)         # (B, H) f32
        return alpha, ctx

    def body(t, h):
        row = pl.multiple_of(t * B, _SUBLANE)
        xw_t = xw_ref[pl.ds(row, B), :]                        # (B, H) f32
        h_new = jnp.tanh(
            xw_t
            + jnp.dot(h.astype(jnp.bfloat16), w_hh,
                      preferred_element_type=jnp.float32)
            + b_dec)
        a0, c0 = attend(h_new, key0, mem0, mask0)
        a1, c1 = attend(h_new, key1, mem1, mask1)
        # Fused output projection: [h; c0; c1] @ W_out as ONE K=3H MXU matmul.
        hc_ref[:, 0:H] = h_new.astype(jnp.bfloat16)
        hc_ref[:, H:2 * H] = c0.astype(jnp.bfloat16)
        hc_ref[:, 2 * H:3 * H] = c1.astype(jnp.bfloat16)
        out = jnp.tanh(jnp.dot(hc_ref[...], w_out,
                               preferred_element_type=jnp.float32) + b_out)
        dec_out_ref[t] = out
        attn0_ref[t] = a0
        attn1_ref[t] = a1
        return h_new

    lax.fori_loop(0, T, body, h0_ref[...], unroll=_unroll_for(T))


def run_decoder(tgt_emb_flat, h0, mem0, key0, mem1, key1, len0, len1,
                w_ih, w_hh, b_dec, w_out, b_out, T):
    TB, E = tgt_emb_flat.shape
    B = TB // T
    H = w_hh.shape[-1]
    S0 = mem0.shape[0]
    S1 = mem1.shape[0]

    vmem = pl.BlockSpec(memory_space=pltpu.MemorySpace.VMEM)
    inputs = (tgt_emb_flat, h0, mem0, key0, mem1, key1, len0, len1,
              w_ih, w_hh, b_dec, w_out, b_out)
    out_shape = (jax.ShapeDtypeStruct((T, B, H), jnp.float32),
                 jax.ShapeDtypeStruct((T, S0, B), jnp.float32),
                 jax.ShapeDtypeStruct((T, S1, B), jnp.float32))
    scratch_bytes = TB * H * 4 + B * 3 * H * 2
    io_bytes = (sum(_nbytes(x) for x in inputs)
                + sum(_nbytes(s) for s in out_shape) + scratch_bytes)

    return pl.pallas_call(
        _decoder_kernel,
        out_shape=out_shape,
        in_specs=[vmem] * len(inputs),
        out_specs=(vmem, vmem, vmem),
        scratch_shapes=[pltpu.VMEM((TB, H), jnp.float32),
                        pltpu.VMEM((B, 3 * H), jnp.bfloat16)],
        compiler_params=pltpu.CompilerParams(
            vmem_limit_bytes=_vmem_limit(io_bytes)),
    )(*inputs)


# ----------------------------------------------------------------------------
# MultiSourceNMTModel.forward equivalent (glue / padding in plain JAX)
# ----------------------------------------------------------------------------
@jax.jit
def multi_source_nmt_forward(params, src_list, tgt, lengths_list):
    n_src = len(params["encoders"])
    assert n_src == 2, "decoder kernel is specialised for two sources"

    B = tgt.shape[1]
    Bp = _round_up(max(B, 1), _SUBLANE)
    H = params["decoder"]["w_hh"].shape[0]
    Hp = _round_up(H, _LANE)
    E = params["decoder"]["embedding"].shape[1]
    Ep = _round_up(E, _LANE)
    S_list = [int(s.shape[0]) for s in src_list]
    S_enc = _round_up(max(S_list), _SUBLANE)

    # ---- encoders: one gridded pallas_call over sources ----
    emb_srcs, len_srcs, wih_srcs, whh_srcs, b_srcs = [], [], [], [], []
    for i in range(n_src):
        p = params["encoders"][i]
        emb = jnp.take(p["embedding"], src_list[i], axis=0)      # (S_i, B, E)
        emb = jnp.pad(emb, ((0, S_enc - S_list[i]), (0, Bp - B), (0, Ep - E)))
        emb_srcs.append(emb.astype(jnp.bfloat16).reshape(S_enc * Bp, Ep))
        ln = jnp.pad(lengths_list[i].astype(jnp.int32), (0, Bp - B))
        len_srcs.append(ln.reshape(Bp, 1))
        wih_srcs.append(_pad2(p["w_ih"], Ep, Hp).astype(jnp.bfloat16))
        whh_srcs.append(_pad2(p["w_hh"], Hp, Hp).astype(jnp.bfloat16))
        b_srcs.append(_pad2(p["b"], 1, Hp).astype(jnp.float32))

    mem_all, hfin_all = run_encoders(
        jnp.stack(emb_srcs), jnp.stack(len_srcs), jnp.stack(wih_srcs),
        jnp.stack(whh_srcs), jnp.stack(b_srcs), S_enc)
    # mem_all: (n_src, S_enc, Bp, Hp) bf16 ; hfin_all: (n_src, Bp, Hp) f32

    # decoder.init_state(src, memory_banks, enc_states):
    # TODO(synk): assumes the "sum" combination policy for the multi-source
    # decoder initial hidden; adjust if the reference combines differently.
    h0 = jnp.sum(hfin_all, axis=0)

    d = params["decoder"]
    tgt_in = tgt[:-1]                                            # tgt = tgt[:-1]
    T_dec = tgt_in.shape[0]
    tgt_emb = jnp.take(d["embedding"], tgt_in, axis=0)           # (T, B, E)
    tgt_emb = jnp.pad(tgt_emb, ((0, 0), (0, Bp - B), (0, Ep - E)))
    tgt_emb_flat = tgt_emb.astype(jnp.bfloat16).reshape(T_dec * Bp, Ep)

    # Hoist the attention key projection out of the decoder's serial loop:
    # score(h, m) = h . (m @ Wa^T)
    wa = [d["wa0"], d["wa1"]]
    mems, keys, lens_dec = [], [], []
    for i in range(n_src):
        mem_i = mem_all[i]                                       # (S_enc, Bp, Hp) bf16
        wa_p = _pad2(wa[i], Hp, Hp).astype(jnp.bfloat16)
        key_i = jnp.einsum("sbj,ij->sbi", mem_i, wa_p,
                           preferred_element_type=jnp.float32).astype(jnp.bfloat16)
        mems.append(mem_i)
        keys.append(key_i)
        lens_dec.append(jnp.pad(lengths_list[i].astype(jnp.int32),
                                (0, Bp - B)).reshape(1, Bp))

    w_ih_d = _pad2(d["w_ih"], Ep, Hp).astype(jnp.bfloat16)
    w_hh_d = _pad2(d["w_hh"], Hp, Hp).astype(jnp.bfloat16)
    b_d = _pad2(d["b"], 1, Hp).astype(jnp.float32)
    w_out = jnp.concatenate([_pad2(d["wo_h"], Hp, Hp),
                             _pad2(d["wo_c0"], Hp, Hp),
                             _pad2(d["wo_c1"], Hp, Hp)],
                            axis=0).astype(jnp.bfloat16)
    b_out = _pad2(d["b_out"], 1, Hp).astype(jnp.float32)

    dec_out_p, attn0_p, attn1_p = run_decoder(
        tgt_emb_flat, h0, mems[0], keys[0], mems[1], keys[1],
        lens_dec[0], lens_dec[1], w_ih_d, w_hh_d, b_d, w_out, b_out, T_dec)

    dec_out = dec_out_p[:, :B, :H]
    attns = {
        "std_0": jnp.transpose(attn0_p, (0, 2, 1))[:, :B, :S_list[0]],
        "std_1": jnp.transpose(attn1_p, (0, 2, 1))[:, :B, :S_list[1]],
    }
    return dec_out, attns


# ----------------------------------------------------------------------------
# Deterministic parameter construction
# ----------------------------------------------------------------------------
def make_params(key, vocab, emb_dim, hidden, n_sources=2):
    def nrm(k, shape, scale=0.1):
        return (scale * jax.random.normal(k, shape)).astype(jnp.float32)

    keys = jax.random.split(key, 32)
    ki = iter(keys)
    encoders = []
    for _ in range(n_sources):
        encoders.append(dict(
            embedding=nrm(next(ki), (vocab, emb_dim)),
            w_ih=nrm(next(ki), (emb_dim, hidden)),
            w_hh=nrm(next(ki), (hidden, hidden)),
            b=nrm(next(ki), (1, hidden)),
        ))
    decoder = dict(
        embedding=nrm(next(ki), (vocab, emb_dim)),
        w_ih=nrm(next(ki), (emb_dim, hidden)),
        w_hh=nrm(next(ki), (hidden, hidden)),
        b=nrm(next(ki), (1, hidden)),
        wa0=nrm(next(ki), (hidden, hidden)),
        wa1=nrm(next(ki), (hidden, hidden)),
        wo_h=nrm(next(ki), (hidden, hidden)),
        wo_c0=nrm(next(ki), (hidden, hidden)),
        wo_c1=nrm(next(ki), (hidden, hidden)),
        b_out=nrm(next(ki), (1, hidden)),
    )
    return dict(encoders=encoders, decoder=decoder)


if __name__ == "__main__":
    VOCAB, EMB, HID = 20, 32, 32
    SRC_LEN, TGT_LEN, BATCH = 8, 8, 2

    key = jax.random.PRNGKey(0)
    kp, ks0, ks1, kt = jax.random.split(key, 4)

    params = make_params(kp, VOCAB, EMB, HID)

    src_list = [
        jax.random.randint(ks0, (SRC_LEN, BATCH), 0, VOCAB, dtype=jnp.int32),
        jax.random.randint(ks1, (SRC_LEN, BATCH), 0, VOCAB, dtype=jnp.int32),
    ]
    tgt = jax.random.randint(kt, (TGT_LEN, BATCH), 0, VOCAB, dtype=jnp.int32)
    lengths_list = [
        jnp.array([SRC_LEN, SRC_LEN - 2], dtype=jnp.int32),
        jnp.array([SRC_LEN, SRC_LEN - 1], dtype=jnp.int32),
    ]

    dec_out, attns = multi_source_nmt_forward(params, src_list, tgt, lengths_list)
    jax.block_until_ready(dec_out)
    jax.block_until_ready(attns["std_0"])
    jax.block_until_ready(attns["std_1"])

    assert dec_out.shape == (TGT_LEN - 1, BATCH, HID)
    assert attns["std_0"].shape == (TGT_LEN - 1, BATCH, SRC_LEN)
    assert attns["std_1"].shape == (TGT_LEN - 1, BATCH, SRC_LEN)
    assert bool(jnp.all(jnp.isfinite(dec_out)))
    # attention rows must sum to 1 over valid source positions
    # (tolerance covers bf16 banks + approximate-reciprocal normalisation)
    assert jnp.allclose(jnp.sum(attns["std_0"], axis=-1), 1.0, atol=3e-3)
    assert jnp.allclose(jnp.sum(attns["std_1"], axis=-1), 1.0, atol=3e-3)

    print("KERNEL_OK")
</pallas_src>

<mosaic_0001>
module attributes {stable_mosaic.version = 11 : i64} {
  func.func @_rnn_encoder_kernel(%arg0: i32, %arg1: memref<1x64x128xbf16, #tpu.memory_space<vmem>>, %arg2: memref<1x8x1xi32, #tpu.memory_space<vmem>>, %arg3: memref<1x128x128xbf16, #tpu.memory_space<vmem>>, %arg4: memref<1x128x128xbf16, #tpu.memory_space<vmem>>, %arg5: memref<1x1x128xf32, #tpu.memory_space<vmem>>, %arg6: memref<1x8x8x128xbf16, #tpu.memory_space<vmem>>, %arg7: memref<1x8x128xf32, #tpu.memory_space<vmem>>, %arg8: memref<64x128xf32, #tpu.memory_space<vmem>>) attributes {dimension_semantics = [#tpu.dimension_semantics<parallel>], iteration_bounds = array<i64: 2>, scalar_prefetch = 0 : i64, scratch_operands = 1 : i64, tpu.core_type = #tpu.core_type<tc>, window_params = [{transform_indices = @transform_0, window_bounds = array<i64: 1, 64, 128>}, {transform_indices = @transform_1, window_bounds = array<i64: 1, 8, 1>}, {transform_indices = @transform_2, window_bounds = array<i64: 1, 128, 128>}, {transform_indices = @transform_3, window_bounds = array<i64: 1, 128, 128>}, {transform_indices = @transform_4, window_bounds = array<i64: 1, 1, 128>}, {transform_indices = @transform_5, window_bounds = array<i64: 1, 8, 8, 128>}, {transform_indices = @transform_6, window_bounds = array<i64: 1, 8, 128>}]} {
    %c0 = arith.constant 0 : index
    %c0_0 = arith.constant 0 : index
    %c0_1 = arith.constant 0 : index
    %0 = vector.load %arg1[%c0, %c0_0, %c0_1] : memref<1x64x128xbf16, #tpu.memory_space<vmem>>, vector<1x64x128xbf16>
    %1 = vector.shape_cast %0 : vector<1x64x128xbf16> to vector<64x128xbf16>
    %c0_2 = arith.constant 0 : index
    %c0_3 = arith.constant 0 : index
    %c0_4 = arith.constant 0 : index
    %2 = vector.load %arg3[%c0_2, %c0_3, %c0_4] : memref<1x128x128xbf16, #tpu.memory_space<vmem>>, vector<1x128x128xbf16>
    %3 = vector.shape_cast %2 : vector<1x128x128xbf16> to vector<128x128xbf16>
    %cst = arith.constant dense<0.000000e+00> : vector<64x128xf32>
    %4 = tpu.matmul %1, %3, %cst {dimension_numbers = #tpu.dot_dimension_numbers<[1], [0], [0], [1], [0, 0, 1, 1], [], []>} : vector<64x128xbf16>, vector<128x128xbf16>, vector<64x128xf32> -> vector<64x128xf32>
    %c0_5 = arith.constant 0 : index
    %c0_6 = arith.constant 0 : index
    %5 = vector.load %arg8[%c0_5, %c0_6] : memref<64x128xf32, #tpu.memory_space<vmem>>, vector<64x128xf32>
    tpu.vector_store %arg8[%c0_5, %c0_6], %4 {strides = array<i32>} : memref<64x128xf32, #tpu.memory_space<vmem>>, vector<64x128xf32>,
    %c0_7 = arith.constant 0 : index
    %c0_8 = arith.constant 0 : index
    %c0_9 = arith.constant 0 : index
    %6 = vector.load %arg4[%c0_7, %c0_8, %c0_9] : memref<1x128x128xbf16, #tpu.memory_space<vmem>>, vector<1x128x128xbf16>
    %7 = vector.shape_cast %6 : vector<1x128x128xbf16> to vector<128x128xbf16>
    %c0_10 = arith.constant 0 : index
    %c0_11 = arith.constant 0 : index
    %c0_12 = arith.constant 0 : index
    %8 = vector.load %arg5[%c0_10, %c0_11, %c0_12] : memref<1x1x128xf32, #tpu.memory_space<vmem>>, vector<1x1x128xf32>
    %9 = vector.shape_cast %8 : vector<1x1x128xf32> to vector<1x128xf32>
    %c0_13 = arith.constant 0 : index
    %c0_14 = arith.constant 0 : index
    %c0_15 = arith.constant 0 : index
    %10 = vector.load %arg2[%c0_13, %c0_14, %c0_15] : memref<1x8x1xi32, #tpu.memory_space<vmem>>, vector<1x8x1xi32>
    %11 = vector.shape_cast %10 : vector<1x8x1xi32> to vector<8x1xi32>
    %cst_16 = arith.constant 0.000000e+00 : f32
    %12 = vector.broadcast %cst_16 : f32 to vector<8x128xf32>
    %c0_i32 = arith.constant 0 : i32
    %c8_i32 = arith.constant 8 : i32
    %13 = arith.muli %c0_i32, %c8_i32 : i32
    %14 = tpu.assume_multiple %13, 8 : i32
    %15 = arith.index_cast %14 : i32 to index
    %c0_17 = arith.constant 0 : index
    %16 = vector.load %arg8[%15, %c0_17] : memref<64x128xf32, #tpu.memory_space<vmem>>, vector<8x128xf32>
    %17 = arith.truncf %12 : vector<8x128xf32> to vector<8x128xbf16>
    %cst_18 = arith.constant dense<0.000000e+00> : vector<8x128xf32>
    %18 = tpu.matmul %17, %7, %cst_18 {dimension_numbers = #tpu.dot_dimension_numbers<[1], [0], [0], [1], [0, 0, 1, 1], [], []>} : vector<8x128xbf16>, vector<128x128xbf16>, vector<8x128xf32> -> vector<8x128xf32>
    %19 = arith.addf %16, %18 : vector<8x128xf32>
    %20 = vector.broadcast %9 : vector<1x128xf32> to vector<8x128xf32>
    %21 = arith.addf %19, %20 : vector<8x128xf32>
    %22 = math.tanh %21 : vector<8x128xf32>
    %23 = vector.broadcast %c0_i32 : i32 to vector<8x1xi32>
    %24 = arith.cmpi slt, %23, %11 : vector<8x1xi32>
    %25 = vector.shape_cast %24 : vector<8x1xi1> to vector<8x1xi1>
    %26 = vector.broadcast %25 : vector<8x1xi1> to vector<8x128xi1>
    %27 = arith.select %26, %22, %12 : vector<8x128xi1>, vector<8x128xf32>
    %28 = arith.truncf %27 : vector<8x128xf32> to vector<8x128xbf16>
    %c0_19 = arith.constant 0 : index
    %29 = arith.index_cast %c0_i32 : i32 to index
    %c0_20 = arith.constant 0 : index
    %c0_21 = arith.constant 0 : index
    %30 = vector.load %arg6[%c0_19, %29, %c0_20, %c0_21] : memref<1x8x8x128xbf16, #tpu.memory_space<vmem>>, vector<1x1x8x128xbf16>
    %31 = vector.shape_cast %30 : vector<1x1x8x128xbf16> to vector<8x128xbf16>
    %32 = vector.shape_cast %28 : vector<8x128xbf16> to vector<1x1x8x128xbf16>
    tpu.vector_store %arg6[%c0_19, %29, %c0_20, %c0_21], %32 {strides = array<i32>} : memref<1x8x8x128xbf16, #tpu.memory_space<vmem>>, vector<1x1x8x128xbf16>,
    %c1_i32 = arith.constant 1 : i32
    %c8_i32_22 = arith.constant 8 : i32
    %33 = arith.muli %c1_i32, %c8_i32_22 : i32
    %34 = tpu.assume_multiple %33, 8 : i32
    %35 = arith.index_cast %34 : i32 to index
    %c0_23 = arith.constant 0 : index
    %36 = vector.load %arg8[%35, %c0_23] : memref<64x128xf32, #tpu.memory_space<vmem>>, vector<8x128xf32>
    %37 = arith.truncf %27 : vector<8x128xf32> to vector<8x128xbf16>
    %cst_24 = arith.constant dense<0.000000e+00> : vector<8x128xf32>
    %38 = tpu.matmul %37, %7, %cst_24 {dimension_numbers = #tpu.dot_dimension_numbers<[1], [0], [0], [1], [0, 0, 1, 1], [], []>} : vector<8x128xbf16>, vector<128x128xbf16>, vector<8x128xf32> -> vector<8x128xf32>
    %39 = arith.addf %36, %38 : vector<8x128xf32>
    %40 = vector.broadcast %9 : vector<1x128xf32> to vector<8x128xf32>
    %41 = arith.addf %39, %40 : vector<8x128xf32>
    %42 = math.tanh %41 : vector<8x128xf32>
    %43 = vector.broadcast %c1_i32 : i32 to vector<8x1xi32>
    %44 = arith.cmpi slt, %43, %11 : vector<8x1xi32>
    %45 = vector.shape_cast %44 : vector<8x1xi1> to vector<8x1xi1>
    %46 = vector.broadcast %45 : vector<8x1xi1> to vector<8x128xi1>
    %47 = arith.select %46, %42, %27 : vector<8x128xi1>, vector<8x128xf32>
    %48 = arith.truncf %47 : vector<8x128xf32> to vector<8x128xbf16>
    %c0_25 = arith.constant 0 : index
    %49 = arith.index_cast %c1_i32 : i32 to index
    %c0_26 = arith.constant 0 : index
    %c0_27 = arith.constant 0 : index
    %50 = vector.load %arg6[%c0_25, %49, %c0_26, %c0_27] : memref<1x8x8x128xbf16, #tpu.memory_space<vmem>>, vector<1x1x8x128xbf16>
    %51 = vector.shape_cast %50 : vector<1x1x8x128xbf16> to vector<8x128xbf16>
    %52 = vector.shape_cast %48 : vector<8x128xbf16> to vector<1x1x8x128xbf16>
    tpu.vector_store %arg6[%c0_25, %49, %c0_26, %c0_27], %52 {strides = array<i32>} : memref<1x8x8x128xbf16, #tpu.memory_space<vmem>>, vector<1x1x8x128xbf16>,
    %c2_i32 = arith.constant 2 : i32
    %c8_i32_28 = arith.constant 8 : i32
    %53 = arith.muli %c2_i32, %c8_i32_28 : i32
    %54 = tpu.assume_multiple %53, 8 : i32
    %55 = arith.index_cast %54 : i32 to index
    %c0_29 = arith.constant 0 : index
    %56 = vector.load %arg8[%55, %c0_29] : memref<64x128xf32, #tpu.memory_space<vmem>>, vector<8x128xf32>
    %57 = arith.truncf %47 : vector<8x128xf32> to vector<8x128xbf16>
    %cst_30 = arith.constant dense<0.000000e+00> : vector<8x128xf32>
    %58 = tpu.matmul %57, %7, %cst_30 {dimension_numbers = #tpu.dot_dimension_numbers<[1], [0], [0], [1], [0, 0, 1, 1], [], []>} : vector<8x128xbf16>, vector<128x128xbf16>, vector<8x128xf32> -> vector<8x128xf32>
    %59 = arith.addf %56, %58 : vector<8x128xf32>
    %60 = vector.broadcast %9 : vector<1x128xf32> to vector<8x128xf32>
    %61 = arith.addf %59, %60 : vector<8x128xf32>
    %62 = math.tanh %61 : vector<8x128xf32>
    %63 = vector.broadcast %c2_i32 : i32 to vector<8x1xi32>
    %64 = arith.cmpi slt, %63, %11 : vector<8x1xi32>
    %65 = vector.shape_cast %64 : vector<8x1xi1> to vector<8x1xi1>
    %66 = vector.broadcast %65 : vector<8x1xi1> to vector<8x128xi1>
    %67 = arith.select %66, %62, %47 : vector<8x128xi1>, vector<8x128xf32>
    %68 = arith.truncf %67 : vector<8x128xf32> to vector<8x128xbf16>
    %c0_31 = arith.constant 0 : index
    %69 = arith.index_cast %c2_i32 : i32 to index
    %c0_32 = arith.constant 0 : index
    %c0_33 = arith.constant 0 : index
    %70 = vector.load %arg6[%c0_31, %69, %c0_32, %c0_33] : memref<1x8x8x128xbf16, #tpu.memory_space<vmem>>, vector<1x1x8x128xbf16>
    %71 = vector.shape_cast %70 : vector<1x1x8x128xbf16> to vector<8x128xbf16>
    %72 = vector.shape_cast %68 : vector<8x128xbf16> to vector<1x1x8x128xbf16>
    tpu.vector_store %arg6[%c0_31, %69, %c0_32, %c0_33], %72 {strides = array<i32>} : memref<1x8x8x128xbf16, #tpu.memory_space<vmem>>, vector<1x1x8x128xbf16>,
    %c3_i32 = arith.constant 3 : i32
    %c8_i32_34 = arith.constant 8 : i32
    %73 = arith.muli %c3_i32, %c8_i32_34 : i32
    %74 = tpu.assume_multiple %73, 8 : i32
    %75 = arith.index_cast %74 : i32 to index
    %c0_35 = arith.constant 0 : index
    %76 = vector.load %arg8[%75, %c0_35] : memref<64x128xf32, #tpu.memory_space<vmem>>, vector<8x128xf32>
    %77 = arith.truncf %67 : vector<8x128xf32> to vector<8x128xbf16>
    %cst_36 = arith.constant dense<0.000000e+00> : vector<8x128xf32>
    %78 = tpu.matmul %77, %7, %cst_36 {dimension_numbers = #tpu.dot_dimension_numbers<[1], [0], [0], [1], [0, 0, 1, 1], [], []>} : vector<8x128xbf16>, vector<128x128xbf16>, vector<8x128xf32> -> vector<8x128xf32>
    %79 = arith.addf %76, %78 : vector<8x128xf32>
    %80 = vector.broadcast %9 : vector<1x128xf32> to vector<8x128xf32>
    %81 = arith.addf %79, %80 : vector<8x128xf32>
    %82 = math.tanh %81 : vector<8x128xf32>
    %83 = vector.broadcast %c3_i32 : i32 to vector<8x1xi32>
    %84 = arith.cmpi slt, %83, %11 : vector<8x1xi32>
    %85 = vector.shape_cast %84 : vector<8x1xi1> to vector<8x1xi1>
    %86 = vector.broadcast %85 : vector<8x1xi1> to vector<8x128xi1>
    %87 = arith.select %86, %82, %67 : vector<8x128xi1>, vector<8x128xf32>
    %88 = arith.truncf %87 : vector<8x128xf32> to vector<8x128xbf16>
    %c0_37 = arith.constant 0 : index
    %89 = arith.index_cast %c3_i32 : i32 to index
    %c0_38 = arith.constant 0 : index
    %c0_39 = arith.constant 0 : index
    %90 = vector.load %arg6[%c0_37, %89, %c0_38, %c0_39] : memref<1x8x8x128xbf16, #tpu.memory_space<vmem>>, vector<1x1x8x128xbf16>
    %91 = vector.shape_cast %90 : vector<1x1x8x128xbf16> to vector<8x128xbf16>
    %92 = vector.shape_cast %88 : vector<8x128xbf16> to vector<1x1x8x128xbf16>
    tpu.vector_store %arg6[%c0_37, %89, %c0_38, %c0_39], %92 {strides = array<i32>} : memref<1x8x8x128xbf16, #tpu.memory_space<vmem>>, vector<1x1x8x128xbf16>,
    %c4_i32 = arith.constant 4 : i32
    %c8_i32_40 = arith.constant 8 : i32
    %93 = arith.muli %c4_i32, %c8_i32_40 : i32
    %94 = tpu.assume_multiple %93, 8 : i32
    %95 = arith.index_cast %94 : i32 to index
    %c0_41 = arith.constant 0 : index
    %96 = vector.load %arg8[%95, %c0_41] : memref<64x128xf32, #tpu.memory_space<vmem>>, vector<8x128xf32>
    %97 = arith.truncf %87 : vector<8x128xf32> to vector<8x128xbf16>
    %cst_42 = arith.constant dense<0.000000e+00> : vector<8x128xf32>
    %98 = tpu.matmul %97, %7, %cst_42 {dimension_numbers = #tpu.dot_dimension_numbers<[1], [0], [0], [1], [0, 0, 1, 1], [], []>} : vector<8x128xbf16>, vector<128x128xbf16>, vector<8x128xf32> -> vector<8x128xf32>
    %99 = arith.addf %96, %98 : vector<8x128xf32>
    %100 = vector.broadcast %9 : vector<1x128xf32> to vector<8x128xf32>
    %101 = arith.addf %99, %100 : vector<8x128xf32>
    %102 = math.tanh %101 : vector<8x128xf32>
    %103 = vector.broadcast %c4_i32 : i32 to vector<8x1xi32>
    %104 = arith.cmpi slt, %103, %11 : vector<8x1xi32>
    %105 = vector.shape_cast %104 : vector<8x1xi1> to vector<8x1xi1>
    %106 = vector.broadcast %105 : vector<8x1xi1> to vector<8x128xi1>
    %107 = arith.select %106, %102, %87 : vector<8x128xi1>, vector<8x128xf32>
    %108 = arith.truncf %107 : vector<8x128xf32> to vector<8x128xbf16>
    %c0_43 = arith.constant 0 : index
    %109 = arith.index_cast %c4_i32 : i32 to index
    %c0_44 = arith.constant 0 : index
    %c0_45 = arith.constant 0 : index
    %110 = vector.load %arg6[%c0_43, %109, %c0_44, %c0_45] : memref<1x8x8x128xbf16, #tpu.memory_space<vmem>>, vector<1x1x8x128xbf16>
    %111 = vector.shape_cast %110 : vector<1x1x8x128xbf16> to vector<8x128xbf16>
    %112 = vector.shape_cast %108 : vector<8x128xbf16> to vector<1x1x8x128xbf16>
    tpu.vector_store %arg6[%c0_43, %109, %c0_44, %c0_45], %112 {strides = array<i32>} : memref<1x8x8x128xbf16, #tpu.memory_space<vmem>>, vector<1x1x8x128xbf16>,
    %c5_i32 = arith.constant 5 : i32
    %c8_i32_46 = arith.constant 8 : i32
    %113 = arith.muli %c5_i32, %c8_i32_46 : i32
    %114 = tpu.assume_multiple %113, 8 : i32
    %115 = arith.index_cast %114 : i32 to index
    %c0_47 = arith.constant 0 : index
    %116 = vector.load %arg8[%115, %c0_47] : memref<64x128xf32, #tpu.memory_space<vmem>>, vector<8x128xf32>
    %117 = arith.truncf %107 : vector<8x128xf32> to vector<8x128xbf16>
    %cst_48 = arith.constant dense<0.000000e+00> : vector<8x128xf32>
    %118 = tpu.matmul %117, %7, %cst_48 {dimension_numbers = #tpu.dot_dimension_numbers<[1], [0], [0], [1], [0, 0, 1, 1], [], []>} : vector<8x128xbf16>, vector<128x128xbf16>, vector<8x128xf32> -> vector<8x128xf32>
    %119 = arith.addf %116, %118 : vector<8x128xf32>
    %120 = vector.broadcast %9 : vector<1x128xf32> to vector<8x128xf32>
    %121 = arith.addf %119, %120 : vector<8x128xf32>
    %122 = math.tanh %121 : vector<8x128xf32>
    %123 = vector.broadcast %c5_i32 : i32 to vector<8x1xi32>
    %124 = arith.cmpi slt, %123, %11 : vector<8x1xi32>
    %125 = vector.shape_cast %124 : vector<8x1xi1> to vector<8x1xi1>
    %126 = vector.broadcast %125 : vector<8x1xi1> to vector<8x128xi1>
    %127 = arith.select %126, %122, %107 : vector<8x128xi1>, vector<8x128xf32>
    %128 = arith.truncf %127 : vector<8x128xf32> to vector<8x128xbf16>
    %c0_49 = arith.constant 0 : index
    %129 = arith.index_cast %c5_i32 : i32 to index
    %c0_50 = arith.constant 0 : index
    %c0_51 = arith.constant 0 : index
    %130 = vector.load %arg6[%c0_49, %129, %c0_50, %c0_51] : memref<1x8x8x128xbf16, #tpu.memory_space<vmem>>, vector<1x1x8x128xbf16>
    %131 = vector.shape_cast %130 : vector<1x1x8x128xbf16> to vector<8x128xbf16>
    %132 = vector.shape_cast %128 : vector<8x128xbf16> to vector<1x1x8x128xbf16>
    tpu.vector_store %arg6[%c0_49, %129, %c0_50, %c0_51], %132 {strides = array<i32>} : memref<1x8x8x128xbf16, #tpu.memory_space<vmem>>, vector<1x1x8x128xbf16>,
    %c6_i32 = arith.constant 6 : i32
    %c8_i32_52 = arith.constant 8 : i32
    %133 = arith.muli %c6_i32, %c8_i32_52 : i32
    %134 = tpu.assume_multiple %133, 8 : i32
    %135 = arith.index_cast %134 : i32 to index
    %c0_53 = arith.constant 0 : index
    %136 = vector.load %arg8[%135, %c0_53] : memref<64x128xf32, #tpu.memory_space<vmem>>, vector<8x128xf32>
    %137 = arith.truncf %127 : vector<8x128xf32> to vector<8x128xbf16>
    %cst_54 = arith.constant dense<0.000000e+00> : vector<8x128xf32>
    %138 = tpu.matmul %137, %7, %cst_54 {dimension_numbers = #tpu.dot_dimension_numbers<[1], [0], [0], [1], [0, 0, 1, 1], [], []>} : vector<8x128xbf16>, vector<128x128xbf16>, vector<8x128xf32> -> vector<8x128xf32>
    %139 = arith.addf %136, %138 : vector<8x128xf32>
    %140 = vector.broadcast %9 : vector<1x128xf32> to vector<8x128xf32>
    %141 = arith.addf %139, %140 : vector<8x128xf32>
    %142 = math.tanh %141 : vector<8x128xf32>
    %143 = vector.broadcast %c6_i32 : i32 to vector<8x1xi32>
    %144 = arith.cmpi slt, %143, %11 : vector<8x1xi32>
    %145 = vector.shape_cast %144 : vector<8x1xi1> to vector<8x1xi1>
    %146 = vector.broadcast %145 : vector<8x1xi1> to vector<8x128xi1>
    %147 = arith.select %146, %142, %127 : vector<8x128xi1>, vector<8x128xf32>
    %148 = arith.truncf %147 : vector<8x128xf32> to vector<8x128xbf16>
    %c0_55 = arith.constant 0 : index
    %149 = arith.index_cast %c6_i32 : i32 to index
    %c0_56 = arith.constant 0 : index
    %c0_57 = arith.constant 0 : index
    %150 = vector.load %arg6[%c0_55, %149, %c0_56, %c0_57] : memref<1x8x8x128xbf16, #tpu.memory_space<vmem>>, vector<1x1x8x128xbf16>
    %151 = vector.shape_cast %150 : vector<1x1x8x128xbf16> to vector<8x128xbf16>
    %152 = vector.shape_cast %148 : vector<8x128xbf16> to vector<1x1x8x128xbf16>
    tpu.vector_store %arg6[%c0_55, %149, %c0_56, %c0_57], %152 {strides = array<i32>} : memref<1x8x8x128xbf16, #tpu.memory_space<vmem>>, vector<1x1x8x128xbf16>,
    %c7_i32 = arith.constant 7 : i32
    %c8_i32_58 = arith.constant 8 : i32
    %153 = arith.muli %c7_i32, %c8_i32_58 : i32
    %154 = tpu.assume_multiple %153, 8 : i32
    %155 = arith.index_cast %154 : i32 to index
    %c0_59 = arith.constant 0 : index
    %156 = vector.load %arg8[%155, %c0_59] : memref<64x128xf32, #tpu.memory_space<vmem>>, vector<8x128xf32>
    %157 = arith.truncf %147 : vector<8x128xf32> to vector<8x128xbf16>
    %cst_60 = arith.constant dense<0.000000e+00> : vector<8x128xf32>
    %158 = tpu.matmul %157, %7, %cst_60 {dimension_numbers = #tpu.dot_dimension_numbers<[1], [0], [0], [1], [0, 0, 1, 1], [], []>} : vector<8x128xbf16>, vector<128x128xbf16>, vector<8x128xf32> -> vector<8x128xf32>
    %159 = arith.addf %156, %158 : vector<8x128xf32>
    %160 = vector.broadcast %9 : vector<1x128xf32> to vector<8x128xf32>
    %161 = arith.addf %159, %160 : vector<8x128xf32>
    %162 = math.tanh %161 : vector<8x128xf32>
    %163 = vector.broadcast %c7_i32 : i32 to vector<8x1xi32>
    %164 = arith.cmpi slt, %163, %11 : vector<8x1xi32>
    %165 = vector.shape_cast %164 : vector<8x1xi1> to vector<8x1xi1>
    %166 = vector.broadcast %165 : vector<8x1xi1> to vector<8x128xi1>
    %167 = arith.select %166, %162, %147 : vector<8x128xi1>, vector<8x128xf32>
    %168 = arith.truncf %167 : vector<8x128xf32> to vector<8x128xbf16>
    %c0_61 = arith.constant 0 : index
    %169 = arith.index_cast %c7_i32 : i32 to index
    %c0_62 = arith.constant 0 : index
    %c0_63 = arith.constant 0 : index
    %170 = vector.load %arg6[%c0_61, %169, %c0_62, %c0_63] : memref<1x8x8x128xbf16, #tpu.memory_space<vmem>>, vector<1x1x8x128xbf16>
    %171 = vector.shape_cast %170 : vector<1x1x8x128xbf16> to vector<8x128xbf16>
    %172 = vector.shape_cast %168 : vector<8x128xbf16> to vector<1x1x8x128xbf16>
    tpu.vector_store %arg6[%c0_61, %169, %c0_62, %c0_63], %172 {strides = array<i32>} : memref<1x8x8x128xbf16, #tpu.memory_space<vmem>>, vector<1x1x8x128xbf16>,
    %c8_i32_64 = arith.constant 8 : i32
    %c0_65 = arith.constant 0 : index
    %c0_66 = arith.constant 0 : index
    %c0_67 = arith.constant 0 : index
    %173 = vector.load %arg7[%c0_65, %c0_66, %c0_67] : memref<1x8x128xf32, #tpu.memory_space<vmem>>, vector<1x8x128xf32>
    %174 = vector.shape_cast %173 : vector<1x8x128xf32> to vector<8x128xf32>
    %175 = vector.shape_cast %167 : vector<8x128xf32> to vector<1x8x128xf32>
    tpu.vector_store %arg7[%c0_65, %c0_66, %c0_67], %175 {strides = array<i32>} : memref<1x8x128xf32, #tpu.memory_space<vmem>>, vector<1x8x128xf32>,
    return
  }
  func.func @transform_0(%arg0: i32) -> (i32, i32, i32) {
    %c0_i32 = arith.constant 0 : i32
    %c0_i32_0 = arith.constant 0 : i32
    %c0_i32_1 = arith.constant 0 : i32
    return %arg0, %c0_i32, %c0_i32_0 : i32, i32, i32
  }
  func.func @transform_1(%arg0: i32) -> (i32, i32, i32) {
    %c0_i32 = arith.constant 0 : i32
    %c0_i32_0 = arith.constant 0 : i32
    %c0_i32_1 = arith.constant 0 : i32
    return %arg0, %c0_i32, %c0_i32_0 : i32, i32, i32
  }
  func.func @transform_2(%arg0: i32) -> (i32, i32, i32) {
    %c0_i32 = arith.constant 0 : i32
    %c0_i32_0 = arith.constant 0 : i32
    %c0_i32_1 = arith.constant 0 : i32
    return %arg0, %c0_i32, %c0_i32_0 : i32, i32, i32
  }
  func.func @transform_3(%arg0: i32) -> (i32, i32, i32) {
    %c0_i32 = arith.constant 0 : i32
    %c0_i32_0 = arith.constant 0 : i32
    %c0_i32_1 = arith.constant 0 : i32
    return %arg0, %c0_i32, %c0_i32_0 : i32, i32, i32
  }
  func.func @transform_4(%arg0: i32) -> (i32, i32, i32) {
    %c0_i32 = arith.constant 0 : i32
    %c0_i32_0 = arith.constant 0 : i32
    %c0_i32_1 = arith.constant 0 : i32
    return %arg0, %c0_i32, %c0_i32_0 : i32, i32, i32
  }
  func.func @transform_5(%arg0: i32) -> (i32, i32, i32, i32) {
    %c0_i32 = arith.constant 0 : i32
    %c0_i32_0 = arith.constant 0 : i32
    %c0_i32_1 = arith.constant 0 : i32
    %c0_i32_2 = arith.constant 0 : i32
    return %arg0, %c0_i32, %c0_i32_0, %c0_i32_1 : i32, i32, i32, i32
  }
  func.func @transform_6(%arg0: i32) -> (i32, i32, i32) {
    %c0_i32 = arith.constant 0 : i32
    %c0_i32_0 = arith.constant 0 : i32
    %c0_i32_1 = arith.constant 0 : i32
    return %arg0, %c0_i32, %c0_i32_0 : i32, i32, i32
  }
}

module attributes {stable_mosaic.version = 11 : i64} {
  func.func @_decoder_kernel(%arg0: memref<56x128xbf16, #tpu.memory_space<vmem>>, %arg1: memref<8x128xf32, #tpu.memory_space<vmem>>, %arg2: memref<8x8x128xbf16, #tpu.memory_space<vmem>>, %arg3: memref<8x8x128xbf16, #tpu.memory_space<vmem>>, %arg4: memref<8x8x128xbf16, #tpu.memory_space<vmem>>, %arg5: memref<8x8x128xbf16, #tpu.memory_space<vmem>>, %arg6: memref<1x8xi32, #tpu.memory_space<vmem>>, %arg7: memref<1x8xi32, #tpu.memory_space<vmem>>, %arg8: memref<128x128xbf16, #tpu.memory_space<vmem>>, %arg9: memref<128x128xbf16, #tpu.memory_space<vmem>>, %arg10: memref<1x128xf32, #tpu.memory_space<vmem>>, %arg11: memref<384x128xbf16, #tpu.memory_space<vmem>>, %arg12: memref<1x128xf32, #tpu.memory_space<vmem>>, %arg13: memref<7x8x128xf32, #tpu.memory_space<vmem>>, %arg14: memref<7x8x8xf32, #tpu.memory_space<vmem>>, %arg15: memref<7x8x8xf32, #tpu.memory_space<vmem>>, %arg16: memref<56x128xf32, #tpu.memory_space<vmem>>, %arg17: memref<8x384xbf16, #tpu.memory_space<vmem>>) attributes {dimension_semantics = [], scalar_prefetch = 0 : i64, scratch_operands = 2 : i64, tpu.core_type = #tpu.core_type<tc>} {
    %c0 = arith.constant 0 : index
    %c0_0 = arith.constant 0 : index
    %0 = vector.load %arg0[%c0, %c0_0] : memref<56x128xbf16, #tpu.memory_space<vmem>>, vector<56x128xbf16>
    %c0_1 = arith.constant 0 : index
    %c0_2 = arith.constant 0 : index
    %1 = vector.load %arg8[%c0_1, %c0_2] : memref<128x128xbf16, #tpu.memory_space<vmem>>, vector<128x128xbf16>
    %cst = arith.constant dense<0.000000e+00> : vector<56x128xf32>
    %2 = tpu.matmul %0, %1, %cst {dimension_numbers = #tpu.dot_dimension_numbers<[1], [0], [0], [1], [0, 0, 1, 1], [], []>} : vector<56x128xbf16>, vector<128x128xbf16>, vector<56x128xf32> -> vector<56x128xf32>
    %c0_3 = arith.constant 0 : index
    %c0_4 = arith.constant 0 : index
    %3 = vector.load %arg16[%c0_3, %c0_4] : memref<56x128xf32, #tpu.memory_space<vmem>>, vector<56x128xf32>
    tpu.vector_store %arg16[%c0_3, %c0_4], %2 {strides = array<i32>} : memref<56x128xf32, #tpu.memory_space<vmem>>, vector<56x128xf32>,
    %c0_5 = arith.constant 0 : index
    %c0_6 = arith.constant 0 : index
    %4 = vector.load %arg9[%c0_5, %c0_6] : memref<128x128xbf16, #tpu.memory_space<vmem>>, vector<128x128xbf16>
    %c0_7 = arith.constant 0 : index
    %c0_8 = arith.constant 0 : index
    %5 = vector.load %arg10[%c0_7, %c0_8] : memref<1x128xf32, #tpu.memory_space<vmem>>, vector<1x128xf32>
    %c0_9 = arith.constant 0 : index
    %c0_10 = arith.constant 0 : index
    %6 = vector.load %arg11[%c0_9, %c0_10] : memref<384x128xbf16, #tpu.memory_space<vmem>>, vector<384x128xbf16>
    %c0_11 = arith.constant 0 : index
    %c0_12 = arith.constant 0 : index
    %7 = vector.load %arg12[%c0_11, %c0_12] : memref<1x128xf32, #tpu.memory_space<vmem>>, vector<1x128xf32>
    %c0_13 = arith.constant 0 : index
    %c0_14 = arith.constant 0 : index
    %c0_15 = arith.constant 0 : index
    %8 = vector.load %arg2[%c0_13, %c0_14, %c0_15] : memref<8x8x128xbf16, #tpu.memory_space<vmem>>, vector<8x8x128xbf16>
    %c0_16 = arith.constant 0 : index
    %c0_17 = arith.constant 0 : index
    %c0_18 = arith.constant 0 : index
    %9 = vector.load %arg4[%c0_16, %c0_17, %c0_18] : memref<8x8x128xbf16, #tpu.memory_space<vmem>>, vector<8x8x128xbf16>
    %c0_19 = arith.constant 0 : index
    %c0_20 = arith.constant 0 : index
    %c0_21 = arith.constant 0 : index
    %10 = vector.load %arg3[%c0_19, %c0_20, %c0_21] : memref<8x8x128xbf16, #tpu.memory_space<vmem>>, vector<8x8x128xbf16>
    %c0_22 = arith.constant 0 : index
    %c0_23 = arith.constant 0 : index
    %c0_24 = arith.constant 0 : index
    %11 = vector.load %arg5[%c0_22, %c0_23, %c0_24] : memref<8x8x128xbf16, #tpu.memory_space<vmem>>, vector<8x8x128xbf16>
    %12 = tpu.iota {dimensions = array<i32: 0>} : vector<8x8xi32>
    %c0_25 = arith.constant 0 : index
    %c0_26 = arith.constant 0 : index
    %13 = vector.load %arg6[%c0_25, %c0_26] : memref<1x8xi32, #tpu.memory_space<vmem>>, vector<1x8xi32>
    %14 = vector.broadcast %13 : vector<1x8xi32> to vector<8x8xi32>
    %15 = arith.cmpi slt, %12, %14 : vector<8x8xi32>
    %16 = tpu.iota {dimensions = array<i32: 0>} : vector<8x8xi32>
    %c0_27 = arith.constant 0 : index
    %c0_28 = arith.constant 0 : index
    %17 = vector.load %arg7[%c0_27, %c0_28] : memref<1x8xi32, #tpu.memory_space<vmem>>, vector<1x8xi32>
    %18 = vector.broadcast %17 : vector<1x8xi32> to vector<8x8xi32>
    %19 = arith.cmpi slt, %16, %18 : vector<8x8xi32>
    %c0_29 = arith.constant 0 : index
    %c0_30 = arith.constant 0 : index
    %20 = vector.load %arg1[%c0_29, %c0_30] : memref<8x128xf32, #tpu.memory_space<vmem>>, vector<8x128xf32>
    %cst_31 = arith.constant -1.000000e+30 : f32
    %cst_32 = arith.constant 9.99999968E-21 : f32
    %c0_i32 = arith.constant 0 : i32
    %c8_i32 = arith.constant 8 : i32
    %21 = arith.muli %c0_i32, %c8_i32 : i32
    %22 = tpu.assume_multiple %21, 8 : i32
    %23 = arith.index_cast %22 : i32 to index
    %c0_33 = arith.constant 0 : index
    %24 = vector.load %arg16[%23, %c0_33] : memref<56x128xf32, #tpu.memory_space<vmem>>, vector<8x128xf32>
    %25 = arith.truncf %20 : vector<8x128xf32> to vector<8x128xbf16>
    %cst_34 = arith.constant dense<0.000000e+00> : vector<8x128xf32>
    %26 = tpu.matmul %25, %4, %cst_34 {dimension_numbers = #tpu.dot_dimension_numbers<[1], [0], [0], [1], [0, 0, 1, 1], [], []>} : vector<8x128xbf16>, vector<128x128xbf16>, vector<8x128xf32> -> vector<8x128xf32>
    %27 = arith.addf %24, %26 : vector<8x128xf32>
    %28 = vector.broadcast %5 : vector<1x128xf32> to vector<8x128xf32>
    %29 = arith.addf %27, %28 : vector<8x128xf32>
    %30 = math.tanh %29 : vector<8x128xf32>
    %31 = vector.shape_cast %30 : vector<8x128xf32> to vector<1x8x128xf32>
    %32 = arith.extf %10 : vector<8x8x128xbf16> to vector<8x8x128xf32>
    %33 = vector.broadcast %31 : vector<1x8x128xf32> to vector<8x8x128xf32>
    %34 = arith.mulf %33, %32 : vector<8x8x128xf32>
    %cst_35 = arith.constant dense<0.000000e+00> : vector<8x8xf32>
    %35 = vector.multi_reduction <add>, %34, %cst_35 [2] : vector<8x8x128xf32> to vector<8x8xf32>
    %36 = vector.broadcast %cst_31 : f32 to vector<8x8xf32>
    %37 = arith.select %15, %35, %36 : vector<8x8xi1>, vector<8x8xf32>
    %cst_36 = arith.constant dense<0xFF800000> : vector<8xf32>
    %38 = vector.multi_reduction <maximumf>, %37, %cst_36 [0] : vector<8x8xf32> to vector<8xf32>
    %39 = vector.shape_cast %38 : vector<8xf32> to vector<1x8xf32>
    %40 = vector.broadcast %39 : vector<1x8xf32> to vector<8x8xf32>
    %41 = arith.subf %37, %40 : vector<8x8xf32>
    %42 = math.exp %41 : vector<8x8xf32>
    %cst_37 = arith.constant 0.000000e+00 : f32
    %43 = vector.broadcast %cst_37 : f32 to vector<8x8xf32>
    %44 = arith.select %15, %42, %43 : vector<8x8xi1>, vector<8x8xf32>
    %cst_38 = arith.constant dense<0.000000e+00> : vector<8xf32>
    %45 = vector.multi_reduction <add>, %44, %cst_38 [0] : vector<8x8xf32> to vector<8xf32>
    %46 = vector.shape_cast %45 : vector<8xf32> to vector<1x8xf32>
    %47 = vector.broadcast %cst_32 : f32 to vector<1x8xf32>
    %48 = arith.addf %46, %47 : vector<1x8xf32>
    %49 = tpu.reciprocal %48 {approx = true} : vector<1x8xf32> -> vector<1x8xf32>
    %50 = vector.broadcast %49 : vector<1x8xf32> to vector<8x8xf32>
    %51 = arith.mulf %44, %50 : vector<8x8xf32>
    %52 = vector.shape_cast %51 : vector<8x8xf32> to vector<8x8x1xf32>
    %53 = arith.extf %8 : vector<8x8x128xbf16> to vector<8x8x128xf32>
    %54 = vector.broadcast %52 : vector<8x8x1xf32> to vector<8x8x128xf32>
    %55 = arith.mulf %54, %53 : vector<8x8x128xf32>
    %cst_39 = arith.constant dense<0.000000e+00> : vector<8x128xf32>
    %56 = vector.multi_reduction <add>, %55, %cst_39 [0] : vector<8x8x128xf32> to vector<8x128xf32>
    %57 = vector.shape_cast %30 : vector<8x128xf32> to vector<1x8x128xf32>
    %58 = arith.extf %11 : vector<8x8x128xbf16> to vector<8x8x128xf32>
    %59 = vector.broadcast %57 : vector<1x8x128xf32> to vector<8x8x128xf32>
    %60 = arith.mulf %59, %58 : vector<8x8x128xf32>
    %cst_40 = arith.constant dense<0.000000e+00> : vector<8x8xf32>
    %61 = vector.multi_reduction <add>, %60, %cst_40 [2] : vector<8x8x128xf32> to vector<8x8xf32>
    %62 = vector.broadcast %cst_31 : f32 to vector<8x8xf32>
    %63 = arith.select %19, %61, %62 : vector<8x8xi1>, vector<8x8xf32>
    %cst_41 = arith.constant dense<0xFF800000> : vector<8xf32>
    %64 = vector.multi_reduction <maximumf>, %63, %cst_41 [0] : vector<8x8xf32> to vector<8xf32>
    %65 = vector.shape_cast %64 : vector<8xf32> to vector<1x8xf32>
    %66 = vector.broadcast %65 : vector<1x8xf32> to vector<8x8xf32>
    %67 = arith.subf %63, %66 : vector<8x8xf32>
    %68 = math.exp %67 : vector<8x8xf32>
    %cst_42 = arith.constant 0.000000e+00 : f32
    %69 = vector.broadcast %cst_42 : f32 to vector<8x8xf32>
    %70 = arith.select %19, %68, %69 : vector<8x8xi1>, vector<8x8xf32>
    %cst_43 = arith.constant dense<0.000000e+00> : vector<8xf32>
    %71 = vector.multi_reduction <add>, %70, %cst_43 [0] : vector<8x8xf32> to vector<8xf32>
    %72 = vector.shape_cast %71 : vector<8xf32> to vector<1x8xf32>
    %73 = vector.broadcast %cst_32 : f32 to vector<1x8xf32>
    %74 = arith.addf %72, %73 : vector<1x8xf32>
    %75 = tpu.reciprocal %74 {approx = true} : vector<1x8xf32> -> vector<1x8xf32>
    %76 = vector.broadcast %75 : vector<1x8xf32> to vector<8x8xf32>
    %77 = arith.mulf %70, %76 : vector<8x8xf32>
    %78 = vector.shape_cast %77 : vector<8x8xf32> to vector<8x8x1xf32>
    %79 = arith.extf %9 : vector<8x8x128xbf16> to vector<8x8x128xf32>
    %80 = vector.broadcast %78 : vector<8x8x1xf32> to vector<8x8x128xf32>
    %81 = arith.mulf %80, %79 : vector<8x8x128xf32>
    %cst_44 = arith.constant dense<0.000000e+00> : vector<8x128xf32>
    %82 = vector.multi_reduction <add>, %81, %cst_44 [0] : vector<8x8x128xf32> to vector<8x128xf32>
    %83 = arith.truncf %30 : vector<8x128xf32> to vector<8x128xbf16>
    %c0_45 = arith.constant 0 : index
    %c0_46 = arith.constant 0 : index
    %84 = vector.load %arg17[%c0_45, %c0_46] : memref<8x384xbf16, #tpu.memory_space<vmem>>, vector<8x128xbf16>
    tpu.vector_store %arg17[%c0_45, %c0_46], %83 {strides = array<i32>} : memref<8x384xbf16, #tpu.memory_space<vmem>>, vector<8x128xbf16>,
    %85 = arith.truncf %56 : vector<8x128xf32> to vector<8x128xbf16>
    %c0_47 = arith.constant 0 : index
    %c128 = arith.constant 128 : index
    %86 = vector.load %arg17[%c0_47, %c128] : memref<8x384xbf16, #tpu.memory_space<vmem>>, vector<8x128xbf16>
    tpu.vector_store %arg17[%c0_47, %c128], %85 {strides = array<i32>} : memref<8x384xbf16, #tpu.memory_space<vmem>>, vector<8x128xbf16>,
    %87 = arith.truncf %82 : vector<8x128xf32> to vector<8x128xbf16>
    %c0_48 = arith.constant 0 : index
    %c256 = arith.constant 256 : index
    %88 = vector.load %arg17[%c0_48, %c256] : memref<8x384xbf16, #tpu.memory_space<vmem>>, vector<8x128xbf16>
    tpu.vector_store %arg17[%c0_48, %c256], %87 {strides = array<i32>} : memref<8x384xbf16, #tpu.memory_space<vmem>>, vector<8x128xbf16>,
    %c0_49 = arith.constant 0 : index
    %c0_50 = arith.constant 0 : index
    %89 = vector.load %arg17[%c0_49, %c0_50] : memref<8x384xbf16, #tpu.memory_space<vmem>>, vector<8x384xbf16>
    %cst_51 = arith.constant dense<0.000000e+00> : vector<8x128xf32>
    %90 = tpu.matmul %89, %6, %cst_51 {dimension_numbers = #tpu.dot_dimension_numbers<[1], [0], [0], [1], [0, 0, 1, 1], [], []>} : vector<8x384xbf16>, vector<384x128xbf16>, vector<8x128xf32> -> vector<8x128xf32>
    %91 = vector.broadcast %7 : vector<1x128xf32> to vector<8x128xf32>
    %92 = arith.addf %90, %91 : vector<8x128xf32>
    %93 = math.tanh %92 : vector<8x128xf32>
    %94 = arith.index_cast %c0_i32 : i32 to index
    %c0_52 = arith.constant 0 : index
    %c0_53 = arith.constant 0 : index
    %95 = vector.load %arg13[%94, %c0_52, %c0_53] : memref<7x8x128xf32, #tpu.memory_space<vmem>>, vector<1x8x128xf32>
    %96 = vector.shape_cast %95 : vector<1x8x128xf32> to vector<8x128xf32>
    %97 = vector.shape_cast %93 : vector<8x128xf32> to vector<1x8x128xf32>
    tpu.vector_store %arg13[%94, %c0_52, %c0_53], %97 {strides = array<i32>} : memref<7x8x128xf32, #tpu.memory_space<vmem>>, vector<1x8x128xf32>,
    %98 = arith.index_cast %c0_i32 : i32 to index
    %c0_54 = arith.constant 0 : index
    %c0_55 = arith.constant 0 : index
    %99 = vector.load %arg14[%98, %c0_54, %c0_55] : memref<7x8x8xf32, #tpu.memory_space<vmem>>, vector<1x8x8xf32>
    %100 = vector.shape_cast %99 : vector<1x8x8xf32> to vector<8x8xf32>
    %101 = vector.shape_cast %51 : vector<8x8xf32> to vector<1x8x8xf32>
    tpu.vector_store %arg14[%98, %c0_54, %c0_55], %101 {strides = array<i32>} : memref<7x8x8xf32, #tpu.memory_space<vmem>>, vector<1x8x8xf32>,
    %102 = arith.index_cast %c0_i32 : i32 to index
    %c0_56 = arith.constant 0 : index
    %c0_57 = arith.constant 0 : index
    %103 = vector.load %arg15[%102, %c0_56, %c0_57] : memref<7x8x8xf32, #tpu.memory_space<vmem>>, vector<1x8x8xf32>
    %104 = vector.shape_cast %103 : vector<1x8x8xf32> to vector<8x8xf32>
    %105 = vector.shape_cast %77 : vector<8x8xf32> to vector<1x8x8xf32>
    tpu.vector_store %arg15[%102, %c0_56, %c0_57], %105 {strides = array<i32>} : memref<7x8x8xf32, #tpu.memory_space<vmem>>, vector<1x8x8xf32>,
    %c1_i32 = arith.constant 1 : i32
    %c8_i32_58 = arith.constant 8 : i32
    %106 = arith.muli %c1_i32, %c8_i32_58 : i32
    %107 = tpu.assume_multiple %106, 8 : i32
    %108 = arith.index_cast %107 : i32 to index
    %c0_59 = arith.constant 0 : index
    %109 = vector.load %arg16[%108, %c0_59] : memref<56x128xf32, #tpu.memory_space<vmem>>, vector<8x128xf32>
    %110 = arith.truncf %30 : vector<8x128xf32> to vector<8x128xbf16>
    %cst_60 = arith.constant dense<0.000000e+00> : vector<8x128xf32>
    %111 = tpu.matmul %110, %4, %cst_60 {dimension_numbers = #tpu.dot_dimension_numbers<[1], [0], [0], [1], [0, 0, 1, 1], [], []>} : vector<8x128xbf16>, vector<128x128xbf16>, vector<8x128xf32> -> vector<8x128xf32>
    %112 = arith.addf %109, %111 : vector<8x128xf32>
    %113 = vector.broadcast %5 : vector<1x128xf32> to vector<8x128xf32>
    %114 = arith.addf %112, %113 : vector<8x128xf32>
    %115 = math.tanh %114 : vector<8x128xf32>
    %116 = vector.shape_cast %115 : vector<8x128xf32> to vector<1x8x128xf32>
    %117 = arith.extf %10 : vector<8x8x128xbf16> to vector<8x8x128xf32>
    %118 = vector.broadcast %116 : vector<1x8x128xf32> to vector<8x8x128xf32>
    %119 = arith.mulf %118, %117 : vector<8x8x128xf32>
    %cst_61 = arith.constant dense<0.000000e+00> : vector<8x8xf32>
    %120 = vector.multi_reduction <add>, %119, %cst_61 [2] : vector<8x8x128xf32> to vector<8x8xf32>
    %121 = vector.broadcast %cst_31 : f32 to vector<8x8xf32>
    %122 = arith.select %15, %120, %121 : vector<8x8xi1>, vector<8x8xf32>
    %cst_62 = arith.constant dense<0xFF800000> : vector<8xf32>
    %123 = vector.multi_reduction <maximumf>, %122, %cst_62 [0] : vector<8x8xf32> to vector<8xf32>
    %124 = vector.shape_cast %123 : vector<8xf32> to vector<1x8xf32>
    %125 = vector.broadcast %124 : vector<1x8xf32> to vector<8x8xf32>
    %126 = arith.subf %122, %125 : vector<8x8xf32>
    %127 = math.exp %126 : vector<8x8xf32>
    %cst_63 = arith.constant 0.000000e+00 : f32
    %128 = vector.broadcast %cst_63 : f32 to vector<8x8xf32>
    %129 = arith.select %15, %127, %128 : vector<8x8xi1>, vector<8x8xf32>
    %cst_64 = arith.constant dense<0.000000e+00> : vector<8xf32>
    %130 = vector.multi_reduction <add>, %129, %cst_64 [0] : vector<8x8xf32> to vector<8xf32>
    %131 = vector.shape_cast %130 : vector<8xf32> to vector<1x8xf32>
    %132 = vector.broadcast %cst_32 : f32 to vector<1x8xf32>
    %133 = arith.addf %131, %132 : vector<1x8xf32>
    %134 = tpu.reciprocal %133 {approx = true} : vector<1x8xf32> -> vector<1x8xf32>
    %135 = vector.broadcast %134 : vector<1x8xf32> to vector<8x8xf32>
    %136 = arith.mulf %129, %135 : vector<8x8xf32>
    %137 = vector.shape_cast %136 : vector<8x8xf32> to vector<8x8x1xf32>
    %138 = arith.extf %8 : vector<8x8x128xbf16> to vector<8x8x128xf32>
    %139 = vector.broadcast %137 : vector<8x8x1xf32> to vector<8x8x128xf32>
    %140 = arith.mulf %139, %138 : vector<8x8x128xf32>
    %cst_65 = arith.constant dense<0.000000e+00> : vector<8x128xf32>
    %141 = vector.multi_reduction <add>, %140, %cst_65 [0] : vector<8x8x128xf32> to vector<8x128xf32>
    %142 = vector.shape_cast %115 : vector<8x128xf32> to vector<1x8x128xf32>
    %143 = arith.extf %11 : vector<8x8x128xbf16> to vector<8x8x128xf32>
    %144 = vector.broadcast %142 : vector<1x8x128xf32> to vector<8x8x128xf32>
    %145 = arith.mulf %144, %143 : vector<8x8x128xf32>
    %cst_66 = arith.constant dense<0.000000e+00> : vector<8x8xf32>
    %146 = vector.multi_reduction <add>, %145, %cst_66 [2] : vector<8x8x128xf32> to vector<8x8xf32>
    %147 = vector.broadcast %cst_31 : f32 to vector<8x8xf32>
    %148 = arith.select %19, %146, %147 : vector<8x8xi1>, vector<8x8xf32>
    %cst_67 = arith.constant dense<0xFF800000> : vector<8xf32>
    %149 = vector.multi_reduction <maximumf>, %148, %cst_67 [0] : vector<8x8xf32> to vector<8xf32>
    %150 = vector.shape_cast %149 : vector<8xf32> to vector<1x8xf32>
    %151 = vector.broadcast %150 : vector<1x8xf32> to vector<8x8xf32>
    %152 = arith.subf %148, %151 : vector<8x8xf32>
    %153 = math.exp %152 : vector<8x8xf32>
    %cst_68 = arith.constant 0.000000e+00 : f32
    %154 = vector.broadcast %cst_68 : f32 to vector<8x8xf32>
    %155 = arith.select %19, %153, %154 : vector<8x8xi1>, vector<8x8xf32>
    %cst_69 = arith.constant dense<0.000000e+00> : vector<8xf32>
    %156 = vector.multi_reduction <add>, %155, %cst_69 [0] : vector<8x8xf32> to vector<8xf32>
    %157 = vector.shape_cast %156 : vector<8xf32> to vector<1x8xf32>
    %158 = vector.broadcast %cst_32 : f32 to vector<1x8xf32>
    %159 = arith.addf %157, %158 : vector<1x8xf32>
    %160 = tpu.reciprocal %159 {approx = true} : vector<1x8xf32> -> vector<1x8xf32>
    %161 = vector.broadcast %160 : vector<1x8xf32> to vector<8x8xf32>
    %162 = arith.mulf %155, %161 : vector<8x8xf32>
    %163 = vector.shape_cast %162 : vector<8x8xf32> to vector<8x8x1xf32>
    %164 = arith.extf %9 : vector<8x8x128xbf16> to vector<8x8x128xf32>
    %165 = vector.broadcast %163 : vector<8x8x1xf32> to vector<8x8x128xf32>
    %166 = arith.mulf %165, %164 : vector<8x8x128xf32>
    %cst_70 = arith.constant dense<0.000000e+00> : vector<8x128xf32>
    %167 = vector.multi_reduction <add>, %166, %cst_70 [0] : vector<8x8x128xf32> to vector<8x128xf32>
    %168 = arith.truncf %115 : vector<8x128xf32> to vector<8x128xbf16>
    %c0_71 = arith.constant 0 : index
    %c0_72 = arith.constant 0 : index
    %169 = vector.load %arg17[%c0_71, %c0_72] : memref<8x384xbf16, #tpu.memory_space<vmem>>, vector<8x128xbf16>
    tpu.vector_store %arg17[%c0_71, %c0_72], %168 {strides = array<i32>} : memref<8x384xbf16, #tpu.memory_space<vmem>>, vector<8x128xbf16>,
    %170 = arith.truncf %141 : vector<8x128xf32> to vector<8x128xbf16>
    %c0_73 = arith.constant 0 : index
    %c128_74 = arith.constant 128 : index
    %171 = vector.load %arg17[%c0_73, %c128_74] : memref<8x384xbf16, #tpu.memory_space<vmem>>, vector<8x128xbf16>
    tpu.vector_store %arg17[%c0_73, %c128_74], %170 {strides = array<i32>} : memref<8x384xbf16, #tpu.memory_space<vmem>>, vector<8x128xbf16>,
    %172 = arith.truncf %167 : vector<8x128xf32> to vector<8x128xbf16>
    %c0_75 = arith.constant 0 : index
    %c256_76 = arith.constant 256 : index
    %173 = vector.load %arg17[%c0_75, %c256_76] : memref<8x384xbf16, #tpu.memory_space<vmem>>, vector<8x128xbf16>
    tpu.vector_store %arg17[%c0_75, %c256_76], %172 {strides = array<i32>} : memref<8x384xbf16, #tpu.memory_space<vmem>>, vector<8x128xbf16>,
    %c0_77 = arith.constant 0 : index
    %c0_78 = arith.constant 0 : index
    %174 = vector.load %arg17[%c0_77, %c0_78] : memref<8x384xbf16, #tpu.memory_space<vmem>>, vector<8x384xbf16>
    %cst_79 = arith.constant dense<0.000000e+00> : vector<8x128xf32>
    %175 = tpu.matmul %174, %6, %cst_79 {dimension_numbers = #tpu.dot_dimension_numbers<[1], [0], [0], [1], [0, 0, 1, 1], [], []>} : vector<8x384xbf16>, vector<384x128xbf16>, vector<8x128xf32> -> vector<8x128xf32>
    %176 = vector.broadcast %7 : vector<1x128xf32> to vector<8x128xf32>
    %177 = arith.addf %175, %176 : vector<8x128xf32>
    %178 = math.tanh %177 : vector<8x128xf32>
    %179 = arith.index_cast %c1_i32 : i32 to index
    %c0_80 = arith.constant 0 : index
    %c0_81 = arith.constant 0 : index
    %180 = vector.load %arg13[%179, %c0_80, %c0_81] : memref<7x8x128xf32, #tpu.memory_space<vmem>>, vector<1x8x128xf32>
    %181 = vector.shape_cast %180 : vector<1x8x128xf32> to vector<8x128xf32>
    %182 = vector.shape_cast %178 : vector<8x128xf32> to vector<1x8x128xf32>
    tpu.vector_store %arg13[%179, %c0_80, %c0_81], %182 {strides = array<i32>} : memref<7x8x128xf32, #tpu.memory_space<vmem>>, vector<1x8x128xf32>,
    %183 = arith.index_cast %c1_i32 : i32 to index
    %c0_82 = arith.constant 0 : index
    %c0_83 = arith.constant 0 : index
    %184 = vector.load %arg14[%183, %c0_82, %c0_83] : memref<7x8x8xf32, #tpu.memory_space<vmem>>, vector<1x8x8xf32>
    %185 = vector.shape_cast %184 : vector<1x8x8xf32> to vector<8x8xf32>
    %186 = vector.shape_cast %136 : vector<8x8xf32> to vector<1x8x8xf32>
    tpu.vector_store %arg14[%183, %c0_82, %c0_83], %186 {strides = array<i32>} : memref<7x8x8xf32, #tpu.memory_space<vmem>>, vector<1x8x8xf32>,
    %187 = arith.index_cast %c1_i32 : i32 to index
    %c0_84 = arith.constant 0 : index
    %c0_85 = arith.constant 0 : index
    %188 = vector.load %arg15[%187, %c0_84, %c0_85] : memref<7x8x8xf32, #tpu.memory_space<vmem>>, vector<1x8x8xf32>
    %189 = vector.shape_cast %188 : vector<1x8x8xf32> to vector<8x8xf32>
    %190 = vector.shape_cast %162 : vector<8x8xf32> to vector<1x8x8xf32>
    tpu.vector_store %arg15[%187, %c0_84, %c0_85], %190 {strides = array<i32>} : memref<7x8x8xf32, #tpu.memory_space<vmem>>, vector<1x8x8xf32>,
    %c2_i32 = arith.constant 2 : i32
    %c8_i32_86 = arith.constant 8 : i32
    %191 = arith.muli %c2_i32, %c8_i32_86 : i32
    %192 = tpu.assume_multiple %191, 8 : i32
    %193 = arith.index_cast %192 : i32 to index
    %c0_87 = arith.constant 0 : index
    %194 = vector.load %arg16[%193, %c0_87] : memref<56x128xf32, #tpu.memory_space<vmem>>, vector<8x128xf32>
    %195 = arith.truncf %115 : vector<8x128xf32> to vector<8x128xbf16>
    %cst_88 = arith.constant dense<0.000000e+00> : vector<8x128xf32>
    %196 = tpu.matmul %195, %4, %cst_88 {dimension_numbers = #tpu.dot_dimension_numbers<[1], [0], [0], [1], [0, 0, 1, 1], [], []>} : vector<8x128xbf16>, vector<128x128xbf16>, vector<8x128xf32> -> vector<8x128xf32>
    %197 = arith.addf %194, %196 : vector<8x128xf32>
    %198 = vector.broadcast %5 : vector<1x128xf32> to vector<8x128xf32>
    %199 = arith.addf %197, %198 : vector<8x128xf32>
    %200 = math.tanh %199 : vector<8x128xf32>
    %201 = vector.shape_cast %200 : vector<8x128xf32> to vector<1x8x128xf32>
    %202 = arith.extf %10 : vector<8x8x128xbf16> to vector<8x8x128xf32>
    %203 = vector.broadcast %201 : vector<1x8x128xf32> to vector<8x8x128xf32>
    %204 = arith.mulf %203, %202 : vector<8x8x128xf32>
    %cst_89 = arith.constant dense<0.000000e+00> : vector<8x8xf32>
    %205 = vector.multi_reduction <add>, %204, %cst_89 [2] : vector<8x8x128xf32> to vector<8x8xf32>
    %206 = vector.broadcast %cst_31 : f32 to vector<8x8xf32>
    %207 = arith.select %15, %205, %206 : vector<8x8xi1>, vector<8x8xf32>
    %cst_90 = arith.constant dense<0xFF800000> : vector<8xf32>
    %208 = vector.multi_reduction <maximumf>, %207, %cst_90 [0] : vector<8x8xf32> to vector<8xf32>
    %209 = vector.shape_cast %208 : vector<8xf32> to vector<1x8xf32>
    %210 = vector.broadcast %209 : vector<1x8xf32> to vector<8x8xf32>
    %211 = arith.subf %207, %210 : vector<8x8xf32>
    %212 = math.exp %211 : vector<8x8xf32>
    %cst_91 = arith.constant 0.000000e+00 : f32
    %213 = vector.broadcast %cst_91 : f32 to vector<8x8xf32>
    %214 = arith.select %15, %212, %213 : vector<8x8xi1>, vector<8x8xf32>
    %cst_92 = arith.constant dense<0.000000e+00> : vector<8xf32>
    %215 = vector.multi_reduction <add>, %214, %cst_92 [0] : vector<8x8xf32> to vector<8xf32>
    %216 = vector.shape_cast %215 : vector<8xf32> to vector<1x8xf32>
    %217 = vector.broadcast %cst_32 : f32 to vector<1x8xf32>
    %218 = arith.addf %216, %217 : vector<1x8xf32>
    %219 = tpu.reciprocal %218 {approx = true} : vector<1x8xf32> -> vector<1x8xf32>
    %220 = vector.broadcast %219 : vector<1x8xf32> to vector<8x8xf32>
    %221 = arith.mulf %214, %220 : vector<8x8xf32>
    %222 = vector.shape_cast %221 : vector<8x8xf32> to vector<8x8x1xf32>
    %223 = arith.extf %8 : vector<8x8x128xbf16> to vector<8x8x128xf32>
    %224 = vector.broadcast %222 : vector<8x8x1xf32> to vector<8x8x128xf32>
    %225 = arith.mulf %224, %223 : vector<8x8x128xf32>
    %cst_93 = arith.constant dense<0.000000e+00> : vector<8x128xf32>
    %226 = vector.multi_reduction <add>, %225, %cst_93 [0] : vector<8x8x128xf32> to vector<8x128xf32>
    %227 = vector.shape_cast %200 : vector<8x128xf32> to vector<1x8x128xf32>
    %228 = arith.extf %11 : vector<8x8x128xbf16> to vector<8x8x128xf32>
    %229 = vector.broadcast %227 : vector<1x8x128xf32> to vector<8x8x128xf32>
    %230 = arith.mulf %229, %228 : vector<8x8x128xf32>
    %cst_94 = arith.constant dense<0.000000e+00> : vector<8x8xf32>
    %231 = vector.multi_reduction <add>, %230, %cst_94 [2] : vector<8x8x128xf32> to vector<8x8xf32>
    %232 = vector.broadcast %cst_31 : f32 to vector<8x8xf32>
    %233 = arith.select %19, %231, %232 : vector<8x8xi1>, vector<8x8xf32>
    %cst_95 = arith.constant dense<0xFF800000> : vector<8xf32>
    %234 = vector.multi_reduction <maximumf>, %233, %cst_95 [0] : vector<8x8xf32> to vector<8xf32>
    %235 = vector.shape_cast %234 : vector<8xf32> to vector<1x8xf32>
    %236 = vector.broadcast %235 : vector<1x8xf32> to vector<8x8xf32>
    %237 = arith.subf %233, %236 : vector<8x8xf32>
    %238 = math.exp %237 : vector<8x8xf32>
    %cst_96 = arith.constant 0.000000e+00 : f32
    %239 = vector.broadcast %cst_96 : f32 to vector<8x8xf32>
    %240 = arith.select %19, %238, %239 : vector<8x8xi1>, vector<8x8xf32>
    %cst_97 = arith.constant dense<0.000000e+00> : vector<8xf32>
    %241 = vector.multi_reduction <add>, %240, %cst_97 [0] : vector<8x8xf32> to vector<8xf32>
    %242 = vector.shape_cast %241 : vector<8xf32> to vector<1x8xf32>
    %243 = vector.broadcast %cst_32 : f32 to vector<1x8xf32>
    %244 = arith.addf %242, %243 : vector<1x8xf32>
    %245 = tpu.reciprocal %244 {approx = true} : vector<1x8xf32> -> vector<1x8xf32>
    %246 = vector.broadcast %245 : vector<1x8xf32> to vector<8x8xf32>
    %247 = arith.mulf %240, %246 : vector<8x8xf32>
    %248 = vector.shape_cast %247 : vector<8x8xf32> to vector<8x8x1xf32>
    %249 = arith.extf %9 : vector<8x8x128xbf16> to vector<8x8x128xf32>
    %250 = vector.broadcast %248 : vector<8x8x1xf32> to vector<8x8x128xf32>
    %251 = arith.mulf %250, %249 : vector<8x8x128xf32>
    %cst_98 = arith.constant dense<0.000000e+00> : vector<8x128xf32>
    %252 = vector.multi_reduction <add>, %251, %cst_98 [0] : vector<8x8x128xf32> to vector<8x128xf32>
    %253 = arith.truncf %200 : vector<8x128xf32> to vector<8x128xbf16>
    %c0_99 = arith.constant 0 : index
    %c0_100 = arith.constant 0 : index
    %254 = vector.load %arg17[%c0_99, %c0_100] : memref<8x384xbf16, #tpu.memory_space<vmem>>, vector<8x128xbf16>
    tpu.vector_store %arg17[%c0_99, %c0_100], %253 {strides = array<i32>} : memref<8x384xbf16, #tpu.memory_space<vmem>>, vector<8x128xbf16>,
    %255 = arith.truncf %226 : vector<8x128xf32> to vector<8x128xbf16>
    %c0_101 = arith.constant 0 : index
    %c128_102 = arith.constant 128 : index
    %256 = vector.load %arg17[%c0_101, %c128_102] : memref<8x384xbf16, #tpu.memory_space<vmem>>, vector<8x128xbf16>
    tpu.vector_store %arg17[%c0_101, %c128_102], %255 {strides = array<i32>} : memref<8x384xbf16, #tpu.memory_space<vmem>>, vector<8x128xbf16>,
    %257 = arith.truncf %252 : vector<8x128xf32> to vector<8x128xbf16>
    %c0_103 = arith.constant 0 : index
    %c256_104 = arith.constant 256 : index
    %258 = vector.load %arg17[%c0_103, %c256_104] : memref<8x384xbf16, #tpu.memory_space<vmem>>, vector<8x128xbf16>
    tpu.vector_store %arg17[%c0_103, %c256_104], %257 {strides = array<i32>} : memref<8x384xbf16, #tpu.memory_space<vmem>>, vector<8x128xbf16>,
    %c0_105 = arith.constant 0 : index
    %c0_106 = arith.constant 0 : index
    %259 = vector.load %arg17[%c0_105, %c0_106] : memref<8x384xbf16, #tpu.memory_space<vmem>>, vector<8x384xbf16>
    %cst_107 = arith.constant dense<0.000000e+00> : vector<8x128xf32>
    %260 = tpu.matmul %259, %6, %cst_107 {dimension_numbers = #tpu.dot_dimension_numbers<[1], [0], [0], [1], [0, 0, 1, 1], [], []>} : vector<8x384xbf16>, vector<384x128xbf16>, vector<8x128xf32> -> vector<8x128xf32>
    %261 = vector.broadcast %7 : vector<1x128xf32> to vector<8x128xf32>
    %262 = arith.addf %260, %261 : vector<8x128xf32>
    %263 = math.tanh %262 : vector<8x128xf32>
    %264 = arith.index_cast %c2_i32 : i32 to index
    %c0_108 = arith.constant 0 : index
    %c0_109 = arith.constant 0 : index
    %265 = vector.load %arg13[%264, %c0_108, %c0_109] : memref<7x8x128xf32, #tpu.memory_space<vmem>>, vector<1x8x128xf32>
    %266 = vector.shape_cast %265 : vector<1x8x128xf32> to vector<8x128xf32>
    %267 = vector.shape_cast %263 : vector<8x128xf32> to vector<1x8x128xf32>
    tpu.vector_store %arg13[%264, %c0_108, %c0_109], %267 {strides = array<i32>} : memref<7x8x128xf32, #tpu.memory_space<vmem>>, vector<1x8x128xf32>,
    %268 = arith.index_cast %c2_i32 : i32 to index
    %c0_110 = arith.constant 0 : index
    %c0_111 = arith.constant 0 : index
    %269 = vector.load %arg14[%268, %c0_110, %c0_111] : memref<7x8x8xf32, #tpu.memory_space<vmem>>, vector<1x8x8xf32>
    %270 = vector.shape_cast %269 : vector<1x8x8xf32> to vector<8x8xf32>
    %271 = vector.shape_cast %221 : vector<8x8xf32> to vector<1x8x8xf32>
    tpu.vector_store %arg14[%268, %c0_110, %c0_111], %271 {strides = array<i32>} : memref<7x8x8xf32, #tpu.memory_space<vmem>>, vector<1x8x8xf32>,
    %272 = arith.index_cast %c2_i32 : i32 to index
    %c0_112 = arith.constant 0 : index
    %c0_113 = arith.constant 0 : index
    %273 = vector.load %arg15[%272, %c0_112, %c0_113] : memref<7x8x8xf32, #tpu.memory_space<vmem>>, vector<1x8x8xf32>
    %274 = vector.shape_cast %273 : vector<1x8x8xf32> to vector<8x8xf32>
    %275 = vector.shape_cast %247 : vector<8x8xf32> to vector<1x8x8xf32>
    tpu.vector_store %arg15[%272, %c0_112, %c0_113], %275 {strides = array<i32>} : memref<7x8x8xf32, #tpu.memory_space<vmem>>, vector<1x8x8xf32>,
    %c3_i32 = arith.constant 3 : i32
    %c8_i32_114 = arith.constant 8 : i32
    %276 = arith.muli %c3_i32, %c8_i32_114 : i32
    %277 = tpu.assume_multiple %276, 8 : i32
    %278 = arith.index_cast %277 : i32 to index
    %c0_115 = arith.constant 0 : index
    %279 = vector.load %arg16[%278, %c0_115] : memref<56x128xf32, #tpu.memory_space<vmem>>, vector<8x128xf32>
    %280 = arith.truncf %200 : vector<8x128xf32> to vector<8x128xbf16>
    %cst_116 = arith.constant dense<0.000000e+00> : vector<8x128xf32>
    %281 = tpu.matmul %280, %4, %cst_116 {dimension_numbers = #tpu.dot_dimension_numbers<[1], [0], [0], [1], [0, 0, 1, 1], [], []>} : vector<8x128xbf16>, vector<128x128xbf16>, vector<8x128xf32> -> vector<8x128xf32>
    %282 = arith.addf %279, %281 : vector<8x128xf32>
    %283 = vector.broadcast %5 : vector<1x128xf32> to vector<8x128xf32>
    %284 = arith.addf %282, %283 : vector<8x128xf32>
    %285 = math.tanh %284 : vector<8x128xf32>
    %286 = vector.shape_cast %285 : vector<8x128xf32> to vector<1x8x128xf32>
    %287 = arith.extf %10 : vector<8x8x128xbf16> to vector<8x8x128xf32>
    %288 = vector.broadcast %286 : vector<1x8x128xf32> to vector<8x8x128xf32>
    %289 = arith.mulf %288, %287 : vector<8x8x128xf32>
    %cst_117 = arith.constant dense<0.000000e+00> : vector<8x8xf32>
    %290 = vector.multi_reduction <add>, %289, %cst_117 [2] : vector<8x8x128xf32> to vector<8x8xf32>
    %291 = vector.broadcast %cst_31 : f32 to vector<8x8xf32>
    %292 = arith.select %15, %290, %291 : vector<8x8xi1>, vector<8x8xf32>
    %cst_118 = arith.constant dense<0xFF800000> : vector<8xf32>
    %293 = vector.multi_reduction <maximumf>, %292, %cst_118 [0] : vector<8x8xf32> to vector<8xf32>
    %294 = vector.shape_cast %293 : vector<8xf32> to vector<1x8xf32>
    %295 = vector.broadcast %294 : vector<1x8xf32> to vector<8x8xf32>
    %296 = arith.subf %292, %295 : vector<8x8xf32>
    %297 = math.exp %296 : vector<8x8xf32>
    %cst_119 = arith.constant 0.000000e+00 : f32
    %298 = vector.broadcast %cst_119 : f32 to vector<8x8xf32>
    %299 = arith.select %15, %297, %298 : vector<8x8xi1>, vector<8x8xf32>
    %cst_120 = arith.constant dense<0.000000e+00> : vector<8xf32>
    %300 = vector.multi_reduction <add>, %299, %cst_120 [0] : vector<8x8xf32> to vector<8xf32>
    %301 = vector.shape_cast %300 : vector<8xf32> to vector<1x8xf32>
    %302 = vector.broadcast %cst_32 : f32 to vector<1x8xf32>
    %303 = arith.addf %301, %302 : vector<1x8xf32>
    %304 = tpu.reciprocal %303 {approx = true} : vector<1x8xf32> -> vector<1x8xf32>
    %305 = vector.broadcast %304 : vector<1x8xf32> to vector<8x8xf32>
    %306 = arith.mulf %299, %305 : vector<8x8xf32>
    %307 = vector.shape_cast %306 : vector<8x8xf32> to vector<8x8x1xf32>
    %308 = arith.extf %8 : vector<8x8x128xbf16> to vector<8x8x128xf32>
    %309 = vector.broadcast %307 : vector<8x8x1xf32> to vector<8x8x128xf32>
    %310 = arith.mulf %309, %308 : vector<8x8x128xf32>
    %cst_121 = arith.constant dense<0.000000e+00> : vector<8x128xf32>
    %311 = vector.multi_reduction <add>, %310, %cst_121 [0] : vector<8x8x128xf32> to vector<8x128xf32>
    %312 = vector.shape_cast %285 : vector<8x128xf32> to vector<1x8x128xf32>
    %313 = arith.extf %11 : vector<8x8x128xbf16> to vector<8x8x128xf32>
    %314 = vector.broadcast %312 : vector<1x8x128xf32> to vector<8x8x128xf32>
    %315 = arith.mulf %314, %313 : vector<8x8x128xf32>
    %cst_122 = arith.constant dense<0.000000e+00> : vector<8x8xf32>
    %316 = vector.multi_reduction <add>, %315, %cst_122 [2] : vector<8x8x128xf32> to vector<8x8xf32>
    %317 = vector.broadcast %cst_31 : f32 to vector<8x8xf32>
    %318 = arith.select %19, %316, %317 : vector<8x8xi1>, vector<8x8xf32>
    %cst_123 = arith.constant dense<0xFF800000> : vector<8xf32>
    %319 = vector.multi_reduction <maximumf>, %318, %cst_123 [0] : vector<8x8xf32> to vector<8xf32>
    %320 = vector.shape_cast %319 : vector<8xf32> to vector<1x8xf32>
    %321 = vector.broadcast %320 : vector<1x8xf32> to vector<8x8xf32>
    %322 = arith.subf %318, %321 : vector<8x8xf32>
    %323 = math.exp %322 : vector<8x8xf32>
    %cst_124 = arith.constant 0.000000e+00 : f32
    %324 = vector.broadcast %cst_124 : f32 to vector<8x8xf32>
    %325 = arith.select %19, %323, %324 : vector<8x8xi1>, vector<8x8xf32>
    %cst_125 = arith.constant dense<0.000000e+00> : vector<8xf32>
    %326 = vector.multi_reduction <add>, %325, %cst_125 [0] : vector<8x8xf32> to vector<8xf32>
    %327 = vector.shape_cast %326 : vector<8xf32> to vector<1x8xf32>
    %328 = vector.broadcast %cst_32 : f32 to vector<1x8xf32>
    %329 = arith.addf %327, %328 : vector<1x8xf32>
    %330 = tpu.reciprocal %329 {approx = true} : vector<1x8xf32> -> vector<1x8xf32>
    %331 = vector.broadcast %330 : vector<1x8xf32> to vector<8x8xf32>
    %332 = arith.mulf %325, %331 : vector<8x8xf32>
    %333 = vector.shape_cast %332 : vector<8x8xf32> to vector<8x8x1xf32>
    %334 = arith.extf %9 : vector<8x8x128xbf16> to vector<8x8x128xf32>
    %335 = vector.broadcast %333 : vector<8x8x1xf32> to vector<8x8x128xf32>
    %336 = arith.mulf %335, %334 : vector<8x8x128xf32>
    %cst_126 = arith.constant dense<0.000000e+00> : vector<8x128xf32>
    %337 = vector.multi_reduction <add>, %336, %cst_126 [0] : vector<8x8x128xf32> to vector<8x128xf32>
    %338 = arith.truncf %285 : vector<8x128xf32> to vector<8x128xbf16>
    %c0_127 = arith.constant 0 : index
    %c0_128 = arith.constant 0 : index
    %339 = vector.load %arg17[%c0_127, %c0_128] : memref<8x384xbf16, #tpu.memory_space<vmem>>, vector<8x128xbf16>
    tpu.vector_store %arg17[%c0_127, %c0_128], %338 {strides = array<i32>} : memref<8x384xbf16, #tpu.memory_space<vmem>>, vector<8x128xbf16>,
    %340 = arith.truncf %311 : vector<8x128xf32> to vector<8x128xbf16>
    %c0_129 = arith.constant 0 : index
    %c128_130 = arith.constant 128 : index
    %341 = vector.load %arg17[%c0_129, %c128_130] : memref<8x384xbf16, #tpu.memory_space<vmem>>, vector<8x128xbf16>
    tpu.vector_store %arg17[%c0_129, %c128_130], %340 {strides = array<i32>} : memref<8x384xbf16, #tpu.memory_space<vmem>>, vector<8x128xbf16>,
    %342 = arith.truncf %337 : vector<8x128xf32> to vector<8x128xbf16>
    %c0_131 = arith.constant 0 : index
    %c256_132 = arith.constant 256 : index
    %343 = vector.load %arg17[%c0_131, %c256_132] : memref<8x384xbf16, #tpu.memory_space<vmem>>, vector<8x128xbf16>
    tpu.vector_store %arg17[%c0_131, %c256_132], %342 {strides = array<i32>} : memref<8x384xbf16, #tpu.memory_space<vmem>>, vector<8x128xbf16>,
    %c0_133 = arith.constant 0 : index
    %c0_134 = arith.constant 0 : index
    %344 = vector.load %arg17[%c0_133, %c0_134] : memref<8x384xbf16, #tpu.memory_space<vmem>>, vector<8x384xbf16>
    %cst_135 = arith.constant dense<0.000000e+00> : vector<8x128xf32>
    %345 = tpu.matmul %344, %6, %cst_135 {dimension_numbers = #tpu.dot_dimension_numbers<[1], [0], [0], [1], [0, 0, 1, 1], [], []>} : vector<8x384xbf16>, vector<384x128xbf16>, vector<8x128xf32> -> vector<8x128xf32>
    %346 = vector.broadcast %7 : vector<1x128xf32> to vector<8x128xf32>
    %347 = arith.addf %345, %346 : vector<8x128xf32>
    %348 = math.tanh %347 : vector<8x128xf32>
    %349 = arith.index_cast %c3_i32 : i32 to index
    %c0_136 = arith.constant 0 : index
    %c0_137 = arith.constant 0 : index
    %350 = vector.load %arg13[%349, %c0_136, %c0_137] : memref<7x8x128xf32, #tpu.memory_space<vmem>>, vector<1x8x128xf32>
    %351 = vector.shape_cast %350 : vector<1x8x128xf32> to vector<8x128xf32>
    %352 = vector.shape_cast %348 : vector<8x128xf32> to vector<1x8x128xf32>
    tpu.vector_store %arg13[%349, %c0_136, %c0_137], %352 {strides = array<i32>} : memref<7x8x128xf32, #tpu.memory_space<vmem>>, vector<1x8x128xf32>,
    %353 = arith.index_cast %c3_i32 : i32 to index
    %c0_138 = arith.constant 0 : index
    %c0_139 = arith.constant 0 : index
    %354 = vector.load %arg14[%353, %c0_138, %c0_139] : memref<7x8x8xf32, #tpu.memory_space<vmem>>, vector<1x8x8xf32>
    %355 = vector.shape_cast %354 : vector<1x8x8xf32> to vector<8x8xf32>
    %356 = vector.shape_cast %306 : vector<8x8xf32> to vector<1x8x8xf32>
    tpu.vector_store %arg14[%353, %c0_138, %c0_139], %356 {strides = array<i32>} : memref<7x8x8xf32, #tpu.memory_space<vmem>>, vector<1x8x8xf32>,
    %357 = arith.index_cast %c3_i32 : i32 to index
    %c0_140 = arith.constant 0 : index
    %c0_141 = arith.constant 0 : index
    %358 = vector.load %arg15[%357, %c0_140, %c0_141] : memref<7x8x8xf32, #tpu.memory_space<vmem>>, vector<1x8x8xf32>
    %359 = vector.shape_cast %358 : vector<1x8x8xf32> to vector<8x8xf32>
    %360 = vector.shape_cast %332 : vector<8x8xf32> to vector<1x8x8xf32>
    tpu.vector_store %arg15[%357, %c0_140, %c0_141], %360 {strides = array<i32>} : memref<7x8x8xf32, #tpu.memory_space<vmem>>, vector<1x8x8xf32>,
    %c4_i32 = arith.constant 4 : i32
    %c8_i32_142 = arith.constant 8 : i32
    %361 = arith.muli %c4_i32, %c8_i32_142 : i32
    %362 = tpu.assume_multiple %361, 8 : i32
    %363 = arith.index_cast %362 : i32 to index
    %c0_143 = arith.constant 0 : index
    %364 = vector.load %arg16[%363, %c0_143] : memref<56x128xf32, #tpu.memory_space<vmem>>, vector<8x128xf32>
    %365 = arith.truncf %285 : vector<8x128xf32> to vector<8x128xbf16>
    %cst_144 = arith.constant dense<0.000000e+00> : vector<8x128xf32>
    %366 = tpu.matmul %365, %4, %cst_144 {dimension_numbers = #tpu.dot_dimension_numbers<[1], [0], [0], [1], [0, 0, 1, 1], [], []>} : vector<8x128xbf16>, vector<128x128xbf16>, vector<8x128xf32> -> vector<8x128xf32>
    %367 = arith.addf %364, %366 : vector<8x128xf32>
    %368 = vector.broadcast %5 : vector<1x128xf32> to vector<8x128xf32>
    %369 = arith.addf %367, %368 : vector<8x128xf32>
    %370 = math.tanh %369 : vector<8x128xf32>
    %371 = vector.shape_cast %370 : vector<8x128xf32> to vector<1x8x128xf32>
    %372 = arith.extf %10 : vector<8x8x128xbf16> to vector<8x8x128xf32>
    %373 = vector.broadcast %371 : vector<1x8x128xf32> to vector<8x8x128xf32>
    %374 = arith.mulf %373, %372 : vector<8x8x128xf32>
    %cst_145 = arith.constant dense<0.000000e+00> : vector<8x8xf32>
    %375 = vector.multi_reduction <add>, %374, %cst_145 [2] : vector<8x8x128xf32> to vector<8x8xf32>
    %376 = vector.broadcast %cst_31 : f32 to vector<8x8xf32>
    %377 = arith.select %15, %375, %376 : vector<8x8xi1>, vector<8x8xf32>
    %cst_146 = arith.constant dense<0xFF800000> : vector<8xf32>
    %378 = vector.multi_reduction <maximumf>, %377, %cst_146 [0] : vector<8x8xf32> to vector<8xf32>
    %379 = vector.shape_cast %378 : vector<8xf32> to vector<1x8xf32>
    %380 = vector.broadcast %379 : vector<1x8xf32> to vector<8x8xf32>
    %381 = arith.subf %377, %380 : vector<8x8xf32>
    %382 = math.exp %381 : vector<8x8xf32>
    %cst_147 = arith.constant 0.000000e+00 : f32
    %383 = vector.broadcast %cst_147 : f32 to vector<8x8xf32>
    %384 = arith.select %15, %382, %383 : vector<8x8xi1>, vector<8x8xf32>
    %cst_148 = arith.constant dense<0.000000e+00> : vector<8xf32>
    %385 = vector.multi_reduction <add>, %384, %cst_148 [0] : vector<8x8xf32> to vector<8xf32>
    %386 = vector.shape_cast %385 : vector<8xf32> to vector<1x8xf32>
    %387 = vector.broadcast %cst_32 : f32 to vector<1x8xf32>
    %388 = arith.addf %386, %387 : vector<1x8xf32>
    %389 = tpu.reciprocal %388 {approx = true} : vector<1x8xf32> -> vector<1x8xf32>
    %390 = vector.broadcast %389 : vector<1x8xf32> to vector<8x8xf32>
    %391 = arith.mulf %384, %390 : vector<8x8xf32>
    %392 = vector.shape_cast %391 : vector<8x8xf32> to vector<8x8x1xf32>
    %393 = arith.extf %8 : vector<8x8x128xbf16> to vector<8x8x128xf32>
    %394 = vector.broadcast %392 : vector<8x8x1xf32> to vector<8x8x128xf32>
    %395 = arith.mulf %394, %393 : vector<8x8x128xf32>
    %cst_149 = arith.constant dense<0.000000e+00> : vector<8x128xf32>
    %396 = vector.multi_reduction <add>, %395, %cst_149 [0] : vector<8x8x128xf32> to vector<8x128xf32>
    %397 = vector.shape_cast %370 : vector<8x128xf32> to vector<1x8x128xf32>
    %398 = arith.extf %11 : vector<8x8x128xbf16> to vector<8x8x128xf32>
    %399 = vector.broadcast %397 : vector<1x8x128xf32> to vector<8x8x128xf32>
    %400 = arith.mulf %399, %398 : vector<8x8x128xf32>
    %cst_150 = arith.constant dense<0.000000e+00> : vector<8x8xf32>
    %401 = vector.multi_reduction <add>, %400, %cst_150 [2] : vector<8x8x128xf32> to vector<8x8xf32>
    %402 = vector.broadcast %cst_31 : f32 to vector<8x8xf32>
    %403 = arith.select %19, %401, %402 : vector<8x8xi1>, vector<8x8xf32>
    %cst_151 = arith.constant dense<0xFF800000> : vector<8xf32>
    %404 = vector.multi_reduction <maximumf>, %403, %cst_151 [0] : vector<8x8xf32> to vector<8xf32>
    %405 = vector.shape_cast %404 : vector<8xf32> to vector<1x8xf32>
    %406 = vector.broadcast %405 : vector<1x8xf32> to vector<8x8xf32>
    %407 = arith.subf %403, %406 : vector<8x8xf32>
    %408 = math.exp %407 : vector<8x8xf32>
    %cst_152 = arith.constant 0.000000e+00 : f32
    %409 = vector.broadcast %cst_152 : f32 to vector<8x8xf32>
    %410 = arith.select %19, %408, %409 : vector<8x8xi1>, vector<8x8xf32>
    %cst_153 = arith.constant dense<0.000000e+00> : vector<8xf32>
    %411 = vector.multi_reduction <add>, %410, %cst_153 [0] : vector<8x8xf32> to vector<8xf32>
    %412 = vector.shape_cast %411 : vector<8xf32> to vector<1x8xf32>
    %413 = vector.broadcast %cst_32 : f32 to vector<1x8xf32>
    %414 = arith.addf %412, %413 : vector<1x8xf32>
    %415 = tpu.reciprocal %414 {approx = true} : vector<1x8xf32> -> vector<1x8xf32>
    %416 = vector.broadcast %415 : vector<1x8xf32> to vector<8x8xf32>
    %417 = arith.mulf %410, %416 : vector<8x8xf32>
    %418 = vector.shape_cast %417 : vector<8x8xf32> to vector<8x8x1xf32>
    %419 = arith.extf %9 : vector<8x8x128xbf16> to vector<8x8x128xf32>
    %420 = vector.broadcast %418 : vector<8x8x1xf32> to vector<8x8x128xf32>
    %421 = arith.mulf %420, %419 : vector<8x8x128xf32>
    %cst_154 = arith.constant dense<0.000000e+00> : vector<8x128xf32>
    %422 = vector.multi_reduction <add>, %421, %cst_154 [0] : vector<8x8x128xf32> to vector<8x128xf32>
    %423 = arith.truncf %370 : vector<8x128xf32> to vector<8x128xbf16>
    %c0_155 = arith.constant 0 : index
    %c0_156 = arith.constant 0 : index
    %424 = vector.load %arg17[%c0_155, %c0_156] : memref<8x384xbf16, #tpu.memory_space<vmem>>, vector<8x128xbf16>
    tpu.vector_store %arg17[%c0_155, %c0_156], %423 {strides = array<i32>} : memref<8x384xbf16, #tpu.memory_space<vmem>>, vector<8x128xbf16>,
    %425 = arith.truncf %396 : vector<8x128xf32> to vector<8x128xbf16>
    %c0_157 = arith.constant 0 : index
    %c128_158 = arith.constant 128 : index
    %426 = vector.load %arg17[%c0_157, %c128_158] : memref<8x384xbf16, #tpu.memory_space<vmem>>, vector<8x128xbf16>
    tpu.vector_store %arg17[%c0_157, %c128_158], %425 {strides = array<i32>} : memref<8x384xbf16, #tpu.memory_space<vmem>>, vector<8x128xbf16>,
    %427 = arith.truncf %422 : vector<8x128xf32> to vector<8x128xbf16>
    %c0_159 = arith.constant 0 : index
    %c256_160 = arith.constant 256 : index
    %428 = vector.load %arg17[%c0_159, %c256_160] : memref<8x384xbf16, #tpu.memory_space<vmem>>, vector<8x128xbf16>
    tpu.vector_store %arg17[%c0_159, %c256_160], %427 {strides = array<i32>} : memref<8x384xbf16, #tpu.memory_space<vmem>>, vector<8x128xbf16>,
    %c0_161 = arith.constant 0 : index
    %c0_162 = arith.constant 0 : index
    %429 = vector.load %arg17[%c0_161, %c0_162] : memref<8x384xbf16, #tpu.memory_space<vmem>>, vector<8x384xbf16>
    %cst_163 = arith.constant dense<0.000000e+00> : vector<8x128xf32>
    %430 = tpu.matmul %429, %6, %cst_163 {dimension_numbers = #tpu.dot_dimension_numbers<[1], [0], [0], [1], [0, 0, 1, 1], [], []>} : vector<8x384xbf16>, vector<384x128xbf16>, vector<8x128xf32> -> vector<8x128xf32>
    %431 = vector.broadcast %7 : vector<1x128xf32> to vector<8x128xf32>
    %432 = arith.addf %430, %431 : vector<8x128xf32>
    %433 = math.tanh %432 : vector<8x128xf32>
    %434 = arith.index_cast %c4_i32 : i32 to index
    %c0_164 = arith.constant 0 : index
    %c0_165 = arith.constant 0 : index
    %435 = vector.load %arg13[%434, %c0_164, %c0_165] : memref<7x8x128xf32, #tpu.memory_space<vmem>>, vector<1x8x128xf32>
    %436 = vector.shape_cast %435 : vector<1x8x128xf32> to vector<8x128xf32>
    %437 = vector.shape_cast %433 : vector<8x128xf32> to vector<1x8x128xf32>
    tpu.vector_store %arg13[%434, %c0_164, %c0_165], %437 {strides = array<i32>} : memref<7x8x128xf32, #tpu.memory_space<vmem>>, vector<1x8x128xf32>,
    %438 = arith.index_cast %c4_i32 : i32 to index
    %c0_166 = arith.constant 0 : index
    %c0_167 = arith.constant 0 : index
    %439 = vector.load %arg14[%438, %c0_166, %c0_167] : memref<7x8x8xf32, #tpu.memory_space<vmem>>, vector<1x8x8xf32>
    %440 = vector.shape_cast %439 : vector<1x8x8xf32> to vector<8x8xf32>
    %441 = vector.shape_cast %391 : vector<8x8xf32> to vector<1x8x8xf32>
    tpu.vector_store %arg14[%438, %c0_166, %c0_167], %441 {strides = array<i32>} : memref<7x8x8xf32, #tpu.memory_space<vmem>>, vector<1x8x8xf32>,
    %442 = arith.index_cast %c4_i32 : i32 to index
    %c0_168 = arith.constant 0 : index
    %c0_169 = arith.constant 0 : index
    %443 = vector.load %arg15[%442, %c0_168, %c0_169] : memref<7x8x8xf32, #tpu.memory_space<vmem>>, vector<1x8x8xf32>
    %444 = vector.shape_cast %443 : vector<1x8x8xf32> to vector<8x8xf32>
    %445 = vector.shape_cast %417 : vector<8x8xf32> to vector<1x8x8xf32>
    tpu.vector_store %arg15[%442, %c0_168, %c0_169], %445 {strides = array<i32>} : memref<7x8x8xf32, #tpu.memory_space<vmem>>, vector<1x8x8xf32>,
    %c5_i32 = arith.constant 5 : i32
    %c8_i32_170 = arith.constant 8 : i32
    %446 = arith.muli %c5_i32, %c8_i32_170 : i32
    %447 = tpu.assume_multiple %446, 8 : i32
    %448 = arith.index_cast %447 : i32 to index
    %c0_171 = arith.constant 0 : index
    %449 = vector.load %arg16[%448, %c0_171] : memref<56x128xf32, #tpu.memory_space<vmem>>, vector<8x128xf32>
    %450 = arith.truncf %370 : vector<8x128xf32> to vector<8x128xbf16>
    %cst_172 = arith.constant dense<0.000000e+00> : vector<8x128xf32>
    %451 = tpu.matmul %450, %4, %cst_172 {dimension_numbers = #tpu.dot_dimension_numbers<[1], [0], [0], [1], [0, 0, 1, 1], [], []>} : vector<8x128xbf16>, vector<128x128xbf16>, vector<8x128xf32> -> vector<8x128xf32>
    %452 = arith.addf %449, %451 : vector<8x128xf32>
    %453 = vector.broadcast %5 : vector<1x128xf32> to vector<8x128xf32>
    %454 = arith.addf %452, %453 : vector<8x128xf32>
    %455 = math.tanh %454 : vector<8x128xf32>
    %456 = vector.shape_cast %455 : vector<8x128xf32> to vector<1x8x128xf32>
    %457 = arith.extf %10 : vector<8x8x128xbf16> to vector<8x8x128xf32>
    %458 = vector.broadcast %456 : vector<1x8x128xf32> to vector<8x8x128xf32>
    %459 = arith.mulf %458, %457 : vector<8x8x128xf32>
    %cst_173 = arith.constant dense<0.000000e+00> : vector<8x8xf32>
    %460 = vector.multi_reduction <add>, %459, %cst_173 [2] : vector<8x8x128xf32> to vector<8x8xf32>
    %461 = vector.broadcast %cst_31 : f32 to vector<8x8xf32>
    %462 = arith.select %15, %460, %461 : vector<8x8xi1>, vector<8x8xf32>
    %cst_174 = arith.constant dense<0xFF800000> : vector<8xf32>
    %463 = vector.multi_reduction <maximumf>, %462, %cst_174 [0] : vector<8x8xf32> to vector<8xf32>
    %464 = vector.shape_cast %463 : vector<8xf32> to vector<1x8xf32>
    %465 = vector.broadcast %464 : vector<1x8xf32> to vector<8x8xf32>
    %466 = arith.subf %462, %465 : vector<8x8xf32>
    %467 = math.exp %466 : vector<8x8xf32>
    %cst_175 = arith.constant 0.000000e+00 : f32
    %468 = vector.broadcast %cst_175 : f32 to vector<8x8xf32>
    %469 = arith.select %15, %467, %468 : vector<8x8xi1>, vector<8x8xf32>
    %cst_176 = arith.constant dense<0.000000e+00> : vector<8xf32>
    %470 = vector.multi_reduction <add>, %469, %cst_176 [0] : vector<8x8xf32> to vector<8xf32>
    %471 = vector.shape_cast %470 : vector<8xf32> to vector<1x8xf32>
    %472 = vector.broadcast %cst_32 : f32 to vector<1x8xf32>
    %473 = arith.addf %471, %472 : vector<1x8xf32>
    %474 = tpu.reciprocal %473 {approx = true} : vector<1x8xf32> -> vector<1x8xf32>
    %475 = vector.broadcast %474 : vector<1x8xf32> to vector<8x8xf32>
    %476 = arith.mulf %469, %475 : vector<8x8xf32>
    %477 = vector.shape_cast %476 : vector<8x8xf32> to vector<8x8x1xf32>
    %478 = arith.extf %8 : vector<8x8x128xbf16> to vector<8x8x128xf32>
    %479 = vector.broadcast %477 : vector<8x8x1xf32> to vector<8x8x128xf32>
    %480 = arith.mulf %479, %478 : vector<8x8x128xf32>
    %cst_177 = arith.constant dense<0.000000e+00> : vector<8x128xf32>
    %481 = vector.multi_reduction <add>, %480, %cst_177 [0] : vector<8x8x128xf32> to vector<8x128xf32>
    %482 = vector.shape_cast %455 : vector<8x128xf32> to vector<1x8x128xf32>
    %483 = arith.extf %11 : vector<8x8x128xbf16> to vector<8x8x128xf32>
    %484 = vector.broadcast %482 : vector<1x8x128xf32> to vector<8x8x128xf32>
    %485 = arith.mulf %484, %483 : vector<8x8x128xf32>
    %cst_178 = arith.constant dense<0.000000e+00> : vector<8x8xf32>
    %486 = vector.multi_reduction <add>, %485, %cst_178 [2] : vector<8x8x128xf32> to vector<8x8xf32>
    %487 = vector.broadcast %cst_31 : f32 to vector<8x8xf32>
    %488 = arith.select %19, %486, %487 : vector<8x8xi1>, vector<8x8xf32>
    %cst_179 = arith.constant dense<0xFF800000> : vector<8xf32>
    %489 = vector.multi_reduction <maximumf>, %488, %cst_179 [0] : vector<8x8xf32> to vector<8xf32>
    %490 = vector.shape_cast %489 : vector<8xf32> to vector<1x8xf32>
    %491 = vector.broadcast %490 : vector<1x8xf32> to vector<8x8xf32>
    %492 = arith.subf %488, %491 : vector<8x8xf32>
    %493 = math.exp %492 : vector<8x8xf32>
    %cst_180 = arith.constant 0.000000e+00 : f32
    %494 = vector.broadcast %cst_180 : f32 to vector<8x8xf32>
    %495 = arith.select %19, %493, %494 : vector<8x8xi1>, vector<8x8xf32>
    %cst_181 = arith.constant dense<0.000000e+00> : vector<8xf32>
    %496 = vector.multi_reduction <add>, %495, %cst_181 [0] : vector<8x8xf32> to vector<8xf32>
    %497 = vector.shape_cast %496 : vector<8xf32> to vector<1x8xf32>
    %498 = vector.broadcast %cst_32 : f32 to vector<1x8xf32>
    %499 = arith.addf %497, %498 : vector<1x8xf32>
    %500 = tpu.reciprocal %499 {approx = true} : vector<1x8xf32> -> vector<1x8xf32>
    %501 = vector.broadcast %500 : vector<1x8xf32> to vector<8x8xf32>
    %502 = arith.mulf %495, %501 : vector<8x8xf32>
    %503 = vector.shape_cast %502 : vector<8x8xf32> to vector<8x8x1xf32>
    %504 = arith.extf %9 : vector<8x8x128xbf16> to vector<8x8x128xf32>
    %505 = vector.broadcast %503 : vector<8x8x1xf32> to vector<8x8x128xf32>
    %506 = arith.mulf %505, %504 : vector<8x8x128xf32>
    %cst_182 = arith.constant dense<0.000000e+00> : vector<8x128xf32>
    %507 = vector.multi_reduction <add>, %506, %cst_182 [0] : vector<8x8x128xf32> to vector<8x128xf32>
    %508 = arith.truncf %455 : vector<8x128xf32> to vector<8x128xbf16>
    %c0_183 = arith.constant 0 : index
    %c0_184 = arith.constant 0 : index
    %509 = vector.load %arg17[%c0_183, %c0_184] : memref<8x384xbf16, #tpu.memory_space<vmem>>, vector<8x128xbf16>
    tpu.vector_store %arg17[%c0_183, %c0_184], %508 {strides = array<i32>} : memref<8x384xbf16, #tpu.memory_space<vmem>>, vector<8x128xbf16>,
    %510 = arith.truncf %481 : vector<8x128xf32> to vector<8x128xbf16>
    %c0_185 = arith.constant 0 : index
    %c128_186 = arith.constant 128 : index
    %511 = vector.load %arg17[%c0_185, %c128_186] : memref<8x384xbf16, #tpu.memory_space<vmem>>, vector<8x128xbf16>
    tpu.vector_store %arg17[%c0_185, %c128_186], %510 {strides = array<i32>} : memref<8x384xbf16, #tpu.memory_space<vmem>>, vector<8x128xbf16>,
    %512 = arith.truncf %507 : vector<8x128xf32> to vector<8x128xbf16>
    %c0_187 = arith.constant 0 : index
    %c256_188 = arith.constant 256 : index
    %513 = vector.load %arg17[%c0_187, %c256_188] : memref<8x384xbf16, #tpu.memory_space<vmem>>, vector<8x128xbf16>
    tpu.vector_store %arg17[%c0_187, %c256_188], %512 {strides = array<i32>} : memref<8x384xbf16, #tpu.memory_space<vmem>>, vector<8x128xbf16>,
    %c0_189 = arith.constant 0 : index
    %c0_190 = arith.constant 0 : index
    %514 = vector.load %arg17[%c0_189, %c0_190] : memref<8x384xbf16, #tpu.memory_space<vmem>>, vector<8x384xbf16>
    %cst_191 = arith.constant dense<0.000000e+00> : vector<8x128xf32>
    %515 = tpu.matmul %514, %6, %cst_191 {dimension_numbers = #tpu.dot_dimension_numbers<[1], [0], [0], [1], [0, 0, 1, 1], [], []>} : vector<8x384xbf16>, vector<384x128xbf16>, vector<8x128xf32> -> vector<8x128xf32>
    %516 = vector.broadcast %7 : vector<1x128xf32> to vector<8x128xf32>
    %517 = arith.addf %515, %516 : vector<8x128xf32>
    %518 = math.tanh %517 : vector<8x128xf32>
    %519 = arith.index_cast %c5_i32 : i32 to index
    %c0_192 = arith.constant 0 : index
    %c0_193 = arith.constant 0 : index
    %520 = vector.load %arg13[%519, %c0_192, %c0_193] : memref<7x8x128xf32, #tpu.memory_space<vmem>>, vector<1x8x128xf32>
    %521 = vector.shape_cast %520 : vector<1x8x128xf32> to vector<8x128xf32>
    %522 = vector.shape_cast %518 : vector<8x128xf32> to vector<1x8x128xf32>
    tpu.vector_store %arg13[%519, %c0_192, %c0_193], %522 {strides = array<i32>} : memref<7x8x128xf32, #tpu.memory_space<vmem>>, vector<1x8x128xf32>,
    %523 = arith.index_cast %c5_i32 : i32 to index
    %c0_194 = arith.constant 0 : index
    %c0_195 = arith.constant 0 : index
    %524 = vector.load %arg14[%523, %c0_194, %c0_195] : memref<7x8x8xf32, #tpu.memory_space<vmem>>, vector<1x8x8xf32>
    %525 = vector.shape_cast %524 : vector<1x8x8xf32> to vector<8x8xf32>
    %526 = vector.shape_cast %476 : vector<8x8xf32> to vector<1x8x8xf32>
    tpu.vector_store %arg14[%523, %c0_194, %c0_195], %526 {strides = array<i32>} : memref<7x8x8xf32, #tpu.memory_space<vmem>>, vector<1x8x8xf32>,
    %527 = arith.index_cast %c5_i32 : i32 to index
    %c0_196 = arith.constant 0 : index
    %c0_197 = arith.constant 0 : index
    %528 = vector.load %arg15[%527, %c0_196, %c0_197] : memref<7x8x8xf32, #tpu.memory_space<vmem>>, vector<1x8x8xf32>
    %529 = vector.shape_cast %528 : vector<1x8x8xf32> to vector<8x8xf32>
    %530 = vector.shape_cast %502 : vector<8x8xf32> to vector<1x8x8xf32>
    tpu.vector_store %arg15[%527, %c0_196, %c0_197], %530 {strides = array<i32>} : memref<7x8x8xf32, #tpu.memory_space<vmem>>, vector<1x8x8xf32>,
    %c6_i32 = arith.constant 6 : i32
    %c8_i32_198 = arith.constant 8 : i32
    %531 = arith.muli %c6_i32, %c8_i32_198 : i32
    %532 = tpu.assume_multiple %531, 8 : i32
    %533 = arith.index_cast %532 : i32 to index
    %c0_199 = arith.constant 0 : index
    %534 = vector.load %arg16[%533, %c0_199] : memref<56x128xf32, #tpu.memory_space<vmem>>, vector<8x128xf32>
    %535 = arith.truncf %455 : vector<8x128xf32> to vector<8x128xbf16>
    %cst_200 = arith.constant dense<0.000000e+00> : vector<8x128xf32>
    %536 = tpu.matmul %535, %4, %cst_200 {dimension_numbers = #tpu.dot_dimension_numbers<[1], [0], [0], [1], [0, 0, 1, 1], [], []>} : vector<8x128xbf16>, vector<128x128xbf16>, vector<8x128xf32> -> vector<8x128xf32>
    %537 = arith.addf %534, %536 : vector<8x128xf32>
    %538 = vector.broadcast %5 : vector<1x128xf32> to vector<8x128xf32>
    %539 = arith.addf %537, %538 : vector<8x128xf32>
    %540 = math.tanh %539 : vector<8x128xf32>
    %541 = vector.shape_cast %540 : vector<8x128xf32> to vector<1x8x128xf32>
    %542 = arith.extf %10 : vector<8x8x128xbf16> to vector<8x8x128xf32>
    %543 = vector.broadcast %541 : vector<1x8x128xf32> to vector<8x8x128xf32>
    %544 = arith.mulf %543, %542 : vector<8x8x128xf32>
    %cst_201 = arith.constant dense<0.000000e+00> : vector<8x8xf32>
    %545 = vector.multi_reduction <add>, %544, %cst_201 [2] : vector<8x8x128xf32> to vector<8x8xf32>
    %546 = vector.broadcast %cst_31 : f32 to vector<8x8xf32>
    %547 = arith.select %15, %545, %546 : vector<8x8xi1>, vector<8x8xf32>
    %cst_202 = arith.constant dense<0xFF800000> : vector<8xf32>
    %548 = vector.multi_reduction <maximumf>, %547, %cst_202 [0] : vector<8x8xf32> to vector<8xf32>
    %549 = vector.shape_cast %548 : vector<8xf32> to vector<1x8xf32>
    %550 = vector.broadcast %549 : vector<1x8xf32> to vector<8x8xf32>
    %551 = arith.subf %547, %550 : vector<8x8xf32>
    %552 = math.exp %551 : vector<8x8xf32>
    %cst_203 = arith.constant 0.000000e+00 : f32
    %553 = vector.broadcast %cst_203 : f32 to vector<8x8xf32>
    %554 = arith.select %15, %552, %553 : vector<8x8xi1>, vector<8x8xf32>
    %cst_204 = arith.constant dense<0.000000e+00> : vector<8xf32>
    %555 = vector.multi_reduction <add>, %554, %cst_204 [0] : vector<8x8xf32> to vector<8xf32>
    %556 = vector.shape_cast %555 : vector<8xf32> to vector<1x8xf32>
    %557 = vector.broadcast %cst_32 : f32 to vector<1x8xf32>
    %558 = arith.addf %556, %557 : vector<1x8xf32>
    %559 = tpu.reciprocal %558 {approx = true} : vector<1x8xf32> -> vector<1x8xf32>
    %560 = vector.broadcast %559 : vector<1x8xf32> to vector<8x8xf32>
    %561 = arith.mulf %554, %560 : vector<8x8xf32>
    %562 = vector.shape_cast %561 : vector<8x8xf32> to vector<8x8x1xf32>
    %563 = arith.extf %8 : vector<8x8x128xbf16> to vector<8x8x128xf32>
    %564 = vector.broadcast %562 : vector<8x8x1xf32> to vector<8x8x128xf32>
    %565 = arith.mulf %564, %563 : vector<8x8x128xf32>
    %cst_205 = arith.constant dense<0.000000e+00> : vector<8x128xf32>
    %566 = vector.multi_reduction <add>, %565, %cst_205 [0] : vector<8x8x128xf32> to vector<8x128xf32>
    %567 = vector.shape_cast %540 : vector<8x128xf32> to vector<1x8x128xf32>
    %568 = arith.extf %11 : vector<8x8x128xbf16> to vector<8x8x128xf32>
    %569 = vector.broadcast %567 : vector<1x8x128xf32> to vector<8x8x128xf32>
    %570 = arith.mulf %569, %568 : vector<8x8x128xf32>
    %cst_206 = arith.constant dense<0.000000e+00> : vector<8x8xf32>
    %571 = vector.multi_reduction <add>, %570, %cst_206 [2] : vector<8x8x128xf32> to vector<8x8xf32>
    %572 = vector.broadcast %cst_31 : f32 to vector<8x8xf32>
    %573 = arith.select %19, %571, %572 : vector<8x8xi1>, vector<8x8xf32>
    %cst_207 = arith.constant dense<0xFF800000> : vector<8xf32>
    %574 = vector.multi_reduction <maximumf>, %573, %cst_207 [0] : vector<8x8xf32> to vector<8xf32>
    %575 = vector.shape_cast %574 : vector<8xf32> to vector<1x8xf32>
    %576 = vector.broadcast %575 : vector<1x8xf32> to vector<8x8xf32>
    %577 = arith.subf %573, %576 : vector<8x8xf32>
    %578 = math.exp %577 : vector<8x8xf32>
    %cst_208 = arith.constant 0.000000e+00 : f32
    %579 = vector.broadcast %cst_208 : f32 to vector<8x8xf32>
    %580 = arith.select %19, %578, %579 : vector<8x8xi1>, vector<8x8xf32>
    %cst_209 = arith.constant dense<0.000000e+00> : vector<8xf32>
    %581 = vector.multi_reduction <add>, %580, %cst_209 [0] : vector<8x8xf32> to vector<8xf32>
    %582 = vector.shape_cast %581 : vector<8xf32> to vector<1x8xf32>
    %583 = vector.broadcast %cst_32 : f32 to vector<1x8xf32>
    %584 = arith.addf %582, %583 : vector<1x8xf32>
    %585 = tpu.reciprocal %584 {approx = true} : vector<1x8xf32> -> vector<1x8xf32>
    %586 = vector.broadcast %585 : vector<1x8xf32> to vector<8x8xf32>
    %587 = arith.mulf %580, %586 : vector<8x8xf32>
    %588 = vector.shape_cast %587 : vector<8x8xf32> to vector<8x8x1xf32>
    %589 = arith.extf %9 : vector<8x8x128xbf16> to vector<8x8x128xf32>
    %590 = vector.broadcast %588 : vector<8x8x1xf32> to vector<8x8x128xf32>
    %591 = arith.mulf %590, %589 : vector<8x8x128xf32>
    %cst_210 = arith.constant dense<0.000000e+00> : vector<8x128xf32>
    %592 = vector.multi_reduction <add>, %591, %cst_210 [0] : vector<8x8x128xf32> to vector<8x128xf32>
    %593 = arith.truncf %540 : vector<8x128xf32> to vector<8x128xbf16>
    %c0_211 = arith.constant 0 : index
    %c0_212 = arith.constant 0 : index
    %594 = vector.load %arg17[%c0_211, %c0_212] : memref<8x384xbf16, #tpu.memory_space<vmem>>, vector<8x128xbf16>
    tpu.vector_store %arg17[%c0_211, %c0_212], %593 {strides = array<i32>} : memref<8x384xbf16, #tpu.memory_space<vmem>>, vector<8x128xbf16>,
    %595 = arith.truncf %566 : vector<8x128xf32> to vector<8x128xbf16>
    %c0_213 = arith.constant 0 : index
    %c128_214 = arith.constant 128 : index
    %596 = vector.load %arg17[%c0_213, %c128_214] : memref<8x384xbf16, #tpu.memory_space<vmem>>, vector<8x128xbf16>
    tpu.vector_store %arg17[%c0_213, %c128_214], %595 {strides = array<i32>} : memref<8x384xbf16, #tpu.memory_space<vmem>>, vector<8x128xbf16>,
    %597 = arith.truncf %592 : vector<8x128xf32> to vector<8x128xbf16>
    %c0_215 = arith.constant 0 : index
    %c256_216 = arith.constant 256 : index
    %598 = vector.load %arg17[%c0_215, %c256_216] : memref<8x384xbf16, #tpu.memory_space<vmem>>, vector<8x128xbf16>
    tpu.vector_store %arg17[%c0_215, %c256_216], %597 {strides = array<i32>} : memref<8x384xbf16, #tpu.memory_space<vmem>>, vector<8x128xbf16>,
    %c0_217 = arith.constant 0 : index
    %c0_218 = arith.constant 0 : index
    %599 = vector.load %arg17[%c0_217, %c0_218] : memref<8x384xbf16, #tpu.memory_space<vmem>>, vector<8x384xbf16>
    %cst_219 = arith.constant dense<0.000000e+00> : vector<8x128xf32>
    %600 = tpu.matmul %599, %6, %cst_219 {dimension_numbers = #tpu.dot_dimension_numbers<[1], [0], [0], [1], [0, 0, 1, 1], [], []>} : vector<8x384xbf16>, vector<384x128xbf16>, vector<8x128xf32> -> vector<8x128xf32>
    %601 = vector.broadcast %7 : vector<1x128xf32> to vector<8x128xf32>
    %602 = arith.addf %600, %601 : vector<8x128xf32>
    %603 = math.tanh %602 : vector<8x128xf32>
    %604 = arith.index_cast %c6_i32 : i32 to index
    %c0_220 = arith.constant 0 : index
    %c0_221 = arith.constant 0 : index
    %605 = vector.load %arg13[%604, %c0_220, %c0_221] : memref<7x8x128xf32, #tpu.memory_space<vmem>>, vector<1x8x128xf32>
    %606 = vector.shape_cast %605 : vector<1x8x128xf32> to vector<8x128xf32>
    %607 = vector.shape_cast %603 : vector<8x128xf32> to vector<1x8x128xf32>
    tpu.vector_store %arg13[%604, %c0_220, %c0_221], %607 {strides = array<i32>} : memref<7x8x128xf32, #tpu.memory_space<vmem>>, vector<1x8x128xf32>,
    %608 = arith.index_cast %c6_i32 : i32 to index
    %c0_222 = arith.constant 0 : index
    %c0_223 = arith.constant 0 : index
    %609 = vector.load %arg14[%608, %c0_222, %c0_223] : memref<7x8x8xf32, #tpu.memory_space<vmem>>, vector<1x8x8xf32>
    %610 = vector.shape_cast %609 : vector<1x8x8xf32> to vector<8x8xf32>
    %611 = vector.shape_cast %561 : vector<8x8xf32> to vector<1x8x8xf32>
    tpu.vector_store %arg14[%608, %c0_222, %c0_223], %611 {strides = array<i32>} : memref<7x8x8xf32, #tpu.memory_space<vmem>>, vector<1x8x8xf32>,
    %612 = arith.index_cast %c6_i32 : i32 to index
    %c0_224 = arith.constant 0 : index
    %c0_225 = arith.constant 0 : index
    %613 = vector.load %arg15[%612, %c0_224, %c0_225] : memref<7x8x8xf32, #tpu.memory_space<vmem>>, vector<1x8x8xf32>
    %614 = vector.shape_cast %613 : vector<1x8x8xf32> to vector<8x8xf32>
    %615 = vector.shape_cast %587 : vector<8x8xf32> to vector<1x8x8xf32>
    tpu.vector_store %arg15[%612, %c0_224, %c0_225], %615 {strides = array<i32>} : memref<7x8x8xf32, #tpu.memory_space<vmem>>, vector<1x8x8xf32>,
    %c7_i32 = arith.constant 7 : i32
    return
  }
}

</mosaic_0001>

<bundles_post_ra>
// kernel: multi_source_nmt_forward.2
= control target key start
LH: loop header
LB: loop body
LE: loop exit
PB: predicated region body
PF: predicated region fallthrough
CT: control target
= control target key end

     0   :  { %s1095_s21 = smov 0   ;;  %s1274_s0 = inlined_call_operand.vmem [shape: bf16[2,64,128], index: 0, kind: input, shape index: {}]   ;;  %s1275_s1 = inlined_call_operand.vmem [shape: s32[2,8,1], index: 1, kind: input, shape index: {}]   ;;  %s1276_s2 = inlined_call_operand.vmem [shape: bf16[2,128,128], index: 2, kind: input, shape index: {}]   ;;  %s1277_s3 = inlined_call_operand.vmem [shape: bf16[2,128,128], index: 3, kind: input, shape index: {}]   ;;  %s1278_s4 = inlined_call_operand.vmem [shape: f32[2,1,128], index: 4, kind: input, shape index: {}]   ;;  %s1279_s5 = inlined_call_operand.vmem [shape: bf16[2,8,8,128], index: 5, kind: output, shape index: {0}]   ;;  %s1280_s6 = inlined_call_operand.vmem [shape: f32[2,8,128], index: 6, kind: output, shape index: {1}]  }
   0x1 LB: > { %s891_s22 = sadd.s32 4294967295, %s1057_s21   ;;  %p895_p0 = scmp.ge.s32.totalorder %s1057_s21, 1  ;;  %s1057_s21 = sphi %s1095_s21, %s17_s21  }
   0x2   : > { %p252_p1 = scmp.lt.s32.totalorder %s1057_s21, 3 }
   0x4   : > { %p253_p2 = pnand %p895_p0, %p252_p1 }
   0x5   : > { %p303_p3 = scmp.lt.s32.totalorder (!%p253_p2), %s891_s22, 1 }
   0x6   : > { %256 = sbr.rel (%p253_p2) target bundleno = 1191 (0x4a7), region = 40 }
   0xb   : > { %s1282_s22 = smov (!%p303_p3, %s891_s22), 1  ;;  %v1059_v2 = vmov 0  }
   0xc   : > { %s999_s23 = sshll.u32 %s1282_s22, 6  ;;  %s898_s30 = sshll.u32 %s1282_s22, 3  ;;  %1031 = vset.pattern.permute.xlu0 %v1059_v2  ;;  %1032 = vset.pattern.permute.xlu1 %v1059_v2 }
   0xd   : > { %s1109_s26 = scalar_lea.vmem %s1276_s2, %s999_s23  ;;  %s1114_s29 = scalar_lea.vmem %s1277_s3, %s999_s23  ;;  %1033 = vset.pattern.permute.xlu2 %v1059_v2 }
   0xe   : > { %v1013_v0 = vld [vmem:[%s1109_s26 + $0x38] sm:$0xff]  ;;  %v1012_v3 = vld [vmem:[%s1109_s26 + $0x30] sm:$0xff]  ;;  %s311_s9 = scalar_lea.vmem %s1275_s1, %s898_s30  ;;  %v1011_v6 = vld [vmem:[%s1109_s26 + $0x28] sm:$0xff]  ;;  %s998_s10 = sshll.u32 %s1282_s22, 5 }
   0xf   : > { %v1118_v1 = vld [vmem:[%s1114_s29 + $0x38] sm:$0xff]  ;;  %431 = vmatpush.bf16.msra.mxu0 %v1013_v0  ;;  %v1126_v4 = vld [vmem:[%s1114_s29 + $0x30] sm:$0xff]  ;;  %v1136_v5 = vld [vmem:[%s311_s9] sm:$0xff]  ;;  %s1185_s13 = scalar_lea.vmem %s1274_s0, %s998_s10  ;;  %s324_s16 = scalar_lea.vmem %s1278_s4, %s1282_s22 }
  0x10   : > { %535 = vmatpush.bf16.msra.mxu1 %v1118_v1  ;;  %565 = vmatpush.bf16.msra.mxu2 %v1118_v1  ;;  %v1141_v7 = vld [vmem:[%s1114_s29 + $0x28] sm:$0xff]  ;;  %vm554_vm0 = vcmp.gt.s32.totalorder %v1136_v5, 0  ;;  %v1010_v9 = vld [vmem:[%s1109_s26 + $0x20] sm:$0xff]  ;;  %vm581_vm1 = vcmp.gt.s32.totalorder %v1136_v5, 1  ;;  %v1009_v12 = vld [vmem:[%s1109_s26 + $0x18] sm:$0xff]  ;;  %vm721_vm2 = vcmp.gt.s32.totalorder %v1136_v5, 6  ;;  %s1236_s23 = scalar_lea.vmem %s1279_s5, %s998_s10 }
  0x11   : > { %593 = vmatpush.bf16.msra.mxu3 %v1118_v1  ;;  %v555_v8 = vsel %vm554_vm0, 1, %v1059_v2  ;;  %v1150_v10 = vld [vmem:[%s1114_s29 + $0x20] sm:$0xff]  ;;  %v582_v11 = vsel %vm581_vm1, 1, %v1059_v2  ;;  %v1159_v13 = vld [vmem:[%s1114_s29 + $0x18] sm:$0xff]  ;;  %v1008_v14 = vld [vmem:[%s1109_s26 + $0x10] sm:$0xff]  ;;  %v722_v16 = vsel %vm721_vm2, 1, %v1059_v2 }
  0x12   : > { %557 = vperm.xlu0 %1031, %v555_v8   ;;  %v1166_v15 = vld [vmem:[%s1114_s29 + $0x10] sm:$0xff]  ;;  %v1007_v17 = vld [vmem:[%s1109_s26 + $0x8] sm:$0xff]  ;;  %v1006_v19 = vld [vmem:[%s1109_s26] sm:$0xff]  ;;  %vm609_vm5 = vcmp.gt.s32.totalorder %v1136_v5, 2  ;;  %vm637_vm6 = vcmp.gt.s32.totalorder %v1136_v5, 3  ;;  %vm749_vm7 = vcmp.gt.s32.totalorder %v1136_v5, 7  ;;  %s333_s26 = scalar_lea.vmem %s1280_s6, %s898_s30 }
  0x13   : > { %432 = vmatpush.bf16.msra.mxu0 %v1012_v3  ;;  %v1015_v18 = vld [vmem:[%s1114_s29 + $0x8] sm:$0xff]  ;;  %v1014_v20 = vld [vmem:[%s1114_s29] sm:$0xff]  ;;  %v610_v34 = vsel %vm609_vm5, 1, %v1059_v2  ;;  %v638_v35 = vsel %vm637_vm6, 1, %v1059_v2  ;;  %v750_v36 = vsel %vm749_vm7, 1, %v1059_v2  ;;  %v1004_v55 = vld [vmem:[%s1185_s13 + $0x10] sm:$0xff] }
  0x14   : > { %536 = vmatpush.bf16.msra.mxu1 %v1126_v4  ;;  %566 = vmatpush.bf16.msra.mxu2 %v1126_v4  ;;  %v1002_v21 = vld [vmem:[%s1185_s13] sm:$0xff]  ;;  %v1003_v33 = vld [vmem:[%s1185_s13 + $0x8] sm:$0xff]  ;;  %vm665_vm10 = vcmp.gt.s32.totalorder %v1136_v5, 4  ;;  %vm693_vm11 = vcmp.gt.s32.totalorder %v1136_v5, 5 }
  0x15   : > { %594 = vmatpush.bf16.msra.mxu3 %v1126_v4  ;;  %v1228_v22 = vld [vmem:[%s324_s16] ss:$0 sm:$0xff]  ;;  %612 = vperm.xlu1 %1032, %v610_v34   ;;  %v666_v56 = vsel %vm665_vm10, 1, %v1059_v2  ;;  %v694_v57 = vsel %vm693_vm11, 1, %v1059_v2 }
  0x16   : > { %668 = vperm.xlu2 %1033, %v666_v56  }
  0x17   : > { %433 = vmatpush.bf16.msra.mxu0 %v1011_v6 }
  0x18   : > { %537 = vmatpush.bf16.msra.mxu1 %v1141_v7  ;;  %567 = vmatpush.bf16.msra.mxu2 %v1141_v7 }
  0x19   : > { %595 = vmatpush.bf16.msra.mxu3 %v1141_v7 }
  0x1a   : > { %584 = vperm.xlu0 %1031, %v582_v11  }
  0x1b   : > { %434 = vmatpush.bf16.msra.mxu0 %v1010_v9 }
  0x1c   : > { %538 = vmatpush.bf16.msra.mxu1 %v1150_v10  ;;  %568 = vmatpush.bf16.msra.mxu2 %v1150_v10 }
  0x1d   : > { %596 = vmatpush.bf16.msra.mxu3 %v1150_v10  ;;  %640 = vperm.xlu1 %1032, %v638_v35  }
  0x1e   : > { %696 = vperm.xlu2 %1033, %v694_v57  }
  0x1f   : > { %435 = vmatpush.bf16.msra.mxu0 %v1009_v12 }
  0x20   : > { %539 = vmatpush.bf16.msra.mxu1 %v1159_v13  ;;  %569 = vmatpush.bf16.msra.mxu2 %v1159_v13 }
  0x21   : > { %597 = vmatpush.bf16.msra.mxu3 %v1159_v13 }
  0x22   : > { %724 = vperm.xlu0 %1031, %v722_v16  }
  0x23   : > { %436 = vmatpush.bf16.msra.mxu0 %v1008_v14 }
  0x24   : > { %540 = vmatpush.bf16.msra.mxu1 %v1166_v15  ;;  %570 = vmatpush.bf16.msra.mxu2 %v1166_v15 }
  0x25   : > { %598 = vmatpush.bf16.msra.mxu3 %v1166_v15  ;;  %752 = vperm.xlu1 %1032, %v750_v36  }
  0x27   : > { %437 = vmatpush.bf16.msra.mxu0 %v1007_v17 }
  0x28   : > { %541 = vmatpush.bf16.msra.mxu1 %v1015_v18  ;;  %571 = vmatpush.bf16.msra.mxu2 %v1015_v18 }
  0x29   : > { %599 = vmatpush.bf16.msra.mxu3 %v1015_v18 }
  0x2b   : > { %438 = vmatpush.bf16.msra.mxu0 %v1006_v19 }
  0x2c   : > { %542 = vmatpush.bf16.msra.mxu1 %v1014_v20  ;;  %572 = vmatpush.bf16.msra.mxu2 %v1014_v20 }
  0x2d   : > { %600 = vmatpush.bf16.msra.mxu3 %v1014_v20 }
  0x2e   : > { %439 = vmatmul.bf16.vlgmr.msra.gmra.mxu0 %v1002_v21 }
  0x2f   : > { %543 = vmatmul.bf16.vlgmr.msra.gmra.mxu1 %v1059_v2  ;;  %705 = vmatpush.bf16.msrb.mxu0 %v1118_v1 }
  0x30   : > { %621 = vmatpush.bf16.msrb.mxu1 %v1118_v1  ;;  %649 = vmatpush.bf16.msrb.mxu2 %v1118_v1 }
  0x31   : > { %677 = vmatpush.bf16.msrb.mxu3 %v1118_v1 }
  0x33   : > { %706 = vmatpush.bf16.msrb.mxu0 %v1126_v4 }
  0x34   : > { %622 = vmatpush.bf16.msrb.mxu1 %v1126_v4  ;;  %650 = vmatpush.bf16.msrb.mxu2 %v1126_v4 }
  0x35   : > { %678 = vmatpush.bf16.msrb.mxu3 %v1126_v4 }
  0x37   : > { %707 = vmatpush.bf16.msrb.mxu0 %v1141_v7 }
  0x38   : > { %623 = vmatpush.bf16.msrb.mxu1 %v1141_v7  ;;  %651 = vmatpush.bf16.msrb.mxu2 %v1141_v7 }
  0x39   : > { %679 = vmatpush.bf16.msrb.mxu3 %v1141_v7 }
  0x3b   : > { %708 = vmatpush.bf16.msrb.mxu0 %v1150_v10 }
  0x3c   : > { %624 = vmatpush.bf16.msrb.mxu1 %v1150_v10  ;;  %652 = vmatpush.bf16.msrb.mxu2 %v1150_v10 }
  0x3d   : > { %680 = vmatpush.bf16.msrb.mxu3 %v1150_v10 }
  0x3e   : > { %444 = vmatmul.bf16.gmra.mxu0 %v1003_v33 }
  0x3f   : > { %709 = vmatpush.bf16.msrb.mxu0 %v1159_v13 }
  0x40   : > { %625 = vmatpush.bf16.msrb.mxu1 %v1159_v13  ;;  %653 = vmatpush.bf16.msrb.mxu2 %v1159_v13 }
  0x41   : > { %681 = vmatpush.bf16.msrb.mxu3 %v1159_v13 }
  0x43   : > { %710 = vmatpush.bf16.msrb.mxu0 %v1166_v15 }
  0x44   : > { %626 = vmatpush.bf16.msrb.mxu1 %v1166_v15  ;;  %654 = vmatpush.bf16.msrb.mxu2 %v1166_v15 }
  0x45   : > { %682 = vmatpush.bf16.msrb.mxu3 %v1166_v15 }
  0x47   : > { %711 = vmatpush.bf16.msrb.mxu0 %v1015_v18 }
  0x48   : > { %627 = vmatpush.bf16.msrb.mxu1 %v1015_v18  ;;  %655 = vmatpush.bf16.msrb.mxu2 %v1015_v18 }
  0x49   : > { %683 = vmatpush.bf16.msrb.mxu3 %v1015_v18 }
  0x4b   : > { %712 = vmatpush.bf16.msrb.mxu0 %v1014_v20 }
  0x4c   : > { %628 = vmatpush.bf16.msrb.mxu1 %v1014_v20  ;;  %656 = vmatpush.bf16.msrb.mxu2 %v1014_v20 }
  0x4d   : > { %684 = vmatpush.bf16.msrb.mxu3 %v1014_v20 }
  0x4e   : > { %449 = vmatmul.bf16.gmra.mxu0 %v1004_v55 }
  0x50   : > { %733 = vmatpush.bf16.msra.mxu1 %v1118_v1 }
  0x54   : > { %734 = vmatpush.bf16.msra.mxu1 %v1126_v4  ;;  %v1005_v4 = vld [vmem:[%s1185_s13 + $0x18] sm:$0xff] }
  0x58   : > { %735 = vmatpush.bf16.msra.mxu1 %v1141_v7 }
  0x5c   : > { %736 = vmatpush.bf16.msra.mxu1 %v1150_v10 }
  0x5e   : > { %454 = vmatmul.bf16.gmra.mxu0 %v1005_v4 }
  0x60   : > { %737 = vmatpush.bf16.msra.mxu1 %v1159_v13 }
  0x64   : > { %738 = vmatpush.bf16.msra.mxu1 %v1166_v15 }
  0x68   : > { %739 = vmatpush.bf16.msra.mxu1 %v1015_v18 }
  0x6c   : > { %740 = vmatpush.bf16.msra.mxu1 %v1014_v20 }
  0x70   : > { %v669_v8 = vpop.permute.xlu2 %668 }
  0x71   : > { %vm670_vm13 = vcmp.eq.s32.totalorder %v669_v8, 1 }
  0x78   : > { %v697_v17 = vpop.permute.xlu2 %696 }
  0x79   : > { %vm698_vm14 = vcmp.eq.s32.totalorder %v697_v17, 1 }
  0x84   : > { %v558_v27 = vpop.permute.xlu0 %557 }
  0x85   : > { %vm559_vm3 = vcmp.eq.s32.totalorder %v558_v27, 1 }
  0x86   : > { %vm986_vm4 = vmpackc.low %vm559_vm3, %vm559_vm3 }
  0x87   : > { %v613_v50 = vpop.permute.xlu1 %612 }
  0x88   : > { %vm614_vm9 = vcmp.eq.s32.totalorder %v613_v50, 1 }
  0x8c   : > { %v585_v42 = vpop.permute.xlu0 %584 }
  0x8d   : > { %vm586_vm8 = vcmp.eq.s32.totalorder %v585_v42, 1 }
  0x8f   : > { %v641_v63 = vpop.permute.xlu1 %640 }
  0x90   : > { %vm642_vm12 = vcmp.eq.s32.totalorder %v641_v63, 1 }
  0x97   : > { %v753_v36 = vpop.permute.xlu1 %752 }
  0x98   : > { %vm754_vm0 = vcmp.eq.s32.totalorder %v753_v36, 1 }
  0xab   : > { %v440_v23 = vpop.f32.mrf.mxu0 }
  0xac   : > { %v544_v24 = vpop.f32.mrf.mxu1 }
  0xad   : > { %v548_v25 = vadd.f32 %v544_v24, %v440_v23 }
  0xaf   : > { %v552_v26 = vadd.f32 %v1228_v22, %v548_v25 }
  0xb1   : > { %1035 = vtanh.f32 %v552_v26 }
  0xb3   : > { %v442_v37 = vpop.f32.mrf.mxu0 }
  0xb4   : > { %v546_v28 = vpop.f32.mrf.mxu1 }
  0xb5   : > { %v725_v28 = vpop.permute.xlu0 %724 }
  0xb6   : > { %vm726_vm15 = vcmp.eq.s32.totalorder %v725_v28, 1 }
  0xb7   : > { %v1036_v29 = vpop.eup %1035 }
  0xb8   : > { %v987_v30 = vpack.c.bf16 %v1036_v29, %v1036_v29  ;;  %v560_v31 = vsel %vm559_vm3, %v1036_v29, 0.0 }
  0xb9   : > { %v561_v32 = vpack.c.bf16 %v560_v31, %v560_v31 }
  0xba   : > { %988 = vmatmul.msk.bf16.vlgmr.msra.gmra.mxu2 %vm986_vm4, %v987_v30 }
  0xbb   : > { %562 = vst [vmem:[%s1236_s23] sm:$0xf] %v561_v32  ;;  %v445_v46 = vpop.f32.mrf.mxu0 }
  0xc3   : > { %v447_v58 = vpop.f32.mrf.mxu0 }
  0xcb   : > { %v450_v5 = vpop.f32.mrf.mxu0 }
  0xd3   : > { %v452_v13 = vpop.f32.mrf.mxu0 }
  0xdb   : > { %v455_v23 = vpop.f32.mrf.mxu0 }
  0xe3   : > { %v457_v24 = vpop.f32.mrf.mxu0 }
 0x13d   : > { %v574_v38 = vpop.f32.mrf.mxu2 }
 0x13e   : > { %v578_v39 = vadd.f32 %v574_v38, %v442_v37 }
 0x140   : > { %v579_v40 = vadd.f32 %v1228_v22, %v578_v39 }
 0x142   : > { %1037 = vtanh.f32 %v579_v40 }
 0x145   : > { %v576_v41 = vpop.f32.mrf.mxu2 }
 0x148   : > { %v1038_v43 = vpop.eup %1037 }
 0x149   : > { %v587_v44 = vsel %vm586_vm8, %v1038_v43, %v560_v31 }
 0x14a   : > { %v588_v45 = vpack.c.bf16 %v587_v44, %v587_v44 }
 0x14c   : > { %989 = vst [vmem:[%s1236_s23 + $0x4] sm:$0xf] %v588_v45  ;;  %601 = vmatmul.bf16.vlgmr.msra.gmra.mxu3 %v588_v45 }
 0x1cf   : > { %v602_v47 = vpop.f32.mrf.mxu3 }
 0x1d0   : > { %v606_v48 = vadd.f32 %v602_v47, %v445_v46 }
 0x1d2   : > { %v607_v49 = vadd.f32 %v1228_v22, %v606_v48 }
 0x1d4   : > { %1039 = vtanh.f32 %v607_v49 }
 0x1d7   : > { %v604_v51 = vpop.f32.mrf.mxu3 }
 0x1da   : > { %v1040_v52 = vpop.eup %1039 }
 0x1db   : > { %v615_v53 = vsel %vm614_vm9, %v1040_v52, %v587_v44 }
 0x1dc   : > { %v616_v54 = vpack.c.bf16 %v615_v53, %v615_v53 }
 0x1de   : > { %990 = vst [vmem:[%s1236_s23 + $0x8] sm:$0xf] %v616_v54  ;;  %629 = vmatmul.bf16.vlgmr.msrb.gmra.mxu1 %v616_v54 }
 0x25b   : > { %v630_v59 = vpop.f32.mrf.mxu1 }
 0x25c   : > { %v634_v60 = vadd.f32 %v630_v59, %v447_v58 }
 0x25e   : > { %v635_v61 = vadd.f32 %v1228_v22, %v634_v60 }
 0x260   : > { %1041 = vtanh.f32 %v635_v61 }
 0x263   : > { %v632_v62 = vpop.f32.mrf.mxu1 }
 0x266   : > { %v1042_v0 = vpop.eup %1041 }
 0x267   : > { %v643_v1 = vsel %vm642_vm12, %v1042_v0, %v615_v53 }
 0x268   : > { %v644_v3 = vpack.c.bf16 %v643_v1, %v643_v1 }
 0x26a   : > { %991 = vst [vmem:[%s1236_s23 + $0xc] sm:$0xf] %v644_v3  ;;  %657 = vmatmul.bf16.vlgmr.msrb.gmra.mxu2 %v644_v3 }
 0x2ed   : > { %v658_v2 = vpop.f32.mrf.mxu2 }
 0x2ee   : > { %v662_v6 = vadd.f32 %v658_v2, %v450_v5 }
 0x2f0   : > { %v663_v7 = vadd.f32 %v1228_v22, %v662_v6 }
 0x2f2   : > { %1043 = vtanh.f32 %v663_v7 }
 0x2f5   : > { %v660_v9 = vpop.f32.mrf.mxu2 }
 0x2f8   : > { %v1044_v10 = vpop.eup %1043 }
 0x2f9   : > { %v671_v11 = vsel %vm670_vm13, %v1044_v10, %v643_v1 }
 0x2fa   : > { %v672_v12 = vpack.c.bf16 %v671_v11, %v671_v11 }
 0x2fc   : > { %992 = vst [vmem:[%s1236_s23 + $0x10] sm:$0xf] %v672_v12  ;;  %685 = vmatmul.bf16.vlgmr.msrb.gmra.mxu3 %v672_v12 }
 0x37f   : > { %v686_v14 = vpop.f32.mrf.mxu3 }
 0x380   : > { %v690_v15 = vadd.f32 %v686_v14, %v452_v13 }
 0x382   : > { %v691_v16 = vadd.f32 %v1228_v22, %v690_v15 }
 0x384   : > { %1045 = vtanh.f32 %v691_v16 }
 0x387   : > { %v688_v18 = vpop.f32.mrf.mxu3 }
 0x38a   : > { %v1046_v19 = vpop.eup %1045 }
 0x38b   : > { %v699_v20 = vsel %vm698_vm14, %v1046_v19, %v671_v11 }
 0x38c   : > { %v700_v21 = vpack.c.bf16 %v699_v20, %v699_v20 }
 0x38e   : > { %993 = vst [vmem:[%s1236_s23 + $0x14] sm:$0xf] %v700_v21  ;;  %713 = vmatmul.bf16.vlgmr.msrb.gmra.mxu0 %v700_v21 }
 0x40b   : > { %v714_v25 = vpop.f32.mrf.mxu0 }
 0x40c   : > { %v718_v26 = vadd.f32 %v714_v25, %v455_v23 }
 0x40e   : > { %v719_v27 = vadd.f32 %v1228_v22, %v718_v26 }
 0x410   : > { %1047 = vtanh.f32 %v719_v27 }
 0x413   : > { %v716_v29 = vpop.f32.mrf.mxu0 }
 0x416   : > { %v1048_v30 = vpop.eup %1047 }
 0x417   : > { %v727_v31 = vsel %vm726_vm15, %v1048_v30, %v699_v20 }
 0x418   : > { %v728_v32 = vpack.c.bf16 %v727_v31, %v727_v31 }
 0x41a   : > { %994 = vst [vmem:[%s1236_s23 + $0x18] sm:$0xf] %v728_v32  ;;  %741 = vmatmul.bf16.vlgmr.msra.gmra.mxu1 %v728_v32 }
 0x497   : > { %v742_v33 = vpop.f32.mrf.mxu1 }
 0x498   : > { %v746_v34 = vadd.f32 %v742_v33, %v457_v24 }
 0x49a   : > { %v747_v35 = vadd.f32 %v1228_v22, %v746_v34 }
 0x49c   : > { %1049 = vtanh.f32 %v747_v35 }
 0x49f   : > { %v744_v37 = vpop.f32.mrf.mxu1 }
 0x4a2   : > { %v1050_v38 = vpop.eup %1049 }
 0x4a3   : > { %v755_v39 = vsel %vm754_vm0, %v1050_v38, %v727_v31 }
 0x4a4   : > { %v756_v40 = vpack.c.bf16 %v755_v39, %v755_v39  ;;  %759 = vst [vmem:[%s333_s26] sm:$0xff] %v755_v39 }
 0x4a6   : > { %995 = vst [vmem:[%s1236_s23 + $0x1c] sm:$0xf] %v756_v40 }
 0x4a7 PF: > { %s17_s21 = sadd.s32 1, %s1057_s21  }
 0x4a8   : > { %p14_p4 = scmp.ge.s32.totalorder %s17_s21, 4  }
 0x4aa   :  { %16 = sbr.rel (!%p14_p4) target bundleno = 1 (0x1), region = 108 }

// kernel: multi_source_nmt_forward.3
= control target key start
LH: loop header
LB: loop body
LE: loop exit
PB: predicated region body
PF: predicated region fallthrough
CT: control target
= control target key end

     0   :  { %v273_v46 = vlaneseq  ;;  %vm401_vm0 = vcmask 1041409   ;;  %vm403_vm1 = vcmask 1042434   ;;  %vm405_vm2 = vcmask 1043459   ;;  %s5349_s8 = inlined_call_operand.vmem [shape: bf16[128,128], index: 8, kind: input, shape index: {}]   ;;  %s5350_s9 = inlined_call_operand.vmem [shape: bf16[128,128], index: 9, kind: input, shape index: {}]   ;;  %s5351_s1 = inlined_call_operand.vmem [shape: f32[8,128], index: 1, kind: input, shape index: {}]   ;;  %s5352_s0 = inlined_call_operand.vmem [shape: bf16[56,128], index: 0, kind: input, shape index: {}]   ;;  %s5353_s10 = inlined_call_operand.vmem [shape: f32[1,128], index: 10, kind: input, shape index: {}]   ;;  %s5354_s3 = inlined_call_operand.vmem [shape: bf16[8,8,128], index: 3, kind: input, shape index: {}]   ;;  %s5355_s6 = inlined_call_operand.vmem [shape: s32[1,8], index: 6, kind: input, shape index: {}]   ;;  %s5356_s14 = inlined_call_operand.vmem [shape: f32[7,8,8], index: 14, kind: output, shape index: {1}]   ;;  %s5357_s5 = inlined_call_operand.vmem [shape: bf16[8,8,128], index: 5, kind: input, shape index: {}]   ;;  %s5358_s11 = inlined_call_operand.vmem [shape: bf16[384,128], index: 11, kind: input, shape index: {}]   ;;  %s5359_s7 = inlined_call_operand.vmem [shape: s32[1,8], index: 7, kind: input, shape index: {}]   ;;  %s5360_s2 = inlined_call_operand.vmem [shape: bf16[8,8,128], index: 2, kind: input, shape index: {}]   ;;  %s5361_s12 = inlined_call_operand.vmem [shape: f32[1,128], index: 12, kind: input, shape index: {}]   ;;  %s5362_s15 = inlined_call_operand.vmem [shape: f32[7,8,8], index: 15, kind: output, shape index: {2}]   ;;  %s5363_s4 = inlined_call_operand.vmem [shape: bf16[8,8,128], index: 4, kind: input, shape index: {}]   ;;  %s5364_s13 = inlined_call_operand.vmem [shape: f32[7,8,128], index: 13, kind: output, shape index: {0}]  }
   0x1   :  { %v3286_v0 = vld [vmem:[%s5349_s8 + $0x38] sm:$0xff]  ;;  %v3285_v2 = vld [vmem:[%s5349_s8 + $0x30] sm:$0xff]  ;;  %v3284_v4 = vld [vmem:[%s5349_s8 + $0x28] sm:$0xff]  ;;  %vm407_vm3 = vcmask 1044484   ;;  %vm409_vm4 = vcmask 1045509   ;;  %vm411_vm5 = vcmask 1046534  }
   0x2   :  { %v3667_v1 = vld [vmem:[%s5350_s9 + $0x38] sm:$0xff]  ;;  %140 = vmatpush.bf16.msra.mxu0 %v3286_v0  ;;  %v3676_v3 = vld [vmem:[%s5350_s9 + $0x30] sm:$0xff]  ;;  %v3685_v5 = vld [vmem:[%s5350_s9 + $0x28] sm:$0xff]  ;;  %v3791_v47 = vshrl.u32 %v273_v46, 7  ;;  %v3796_v51 = vand.u32 127, %v273_v46  ;;  %vm413_vm6 = vcmask 1047559  }
   0x3   :  { %332 = vmatpush.bf16.msra.mxu1 %v3667_v1  ;;  %v3283_v6 = vld [vmem:[%s5349_s8 + $0x20] sm:$0xff]  ;;  %v3282_v8 = vld [vmem:[%s5349_s8 + $0x18] sm:$0xff]  ;;  %v3281_v10 = vld [vmem:[%s5349_s8 + $0x10] sm:$0xff]  ;;  %vm417_vm8 = vcmask 64512  }
   0x4   :  { %v3694_v7 = vld [vmem:[%s5350_s9 + $0x20] sm:$0xff]  ;;  %v3703_v9 = vld [vmem:[%s5350_s9 + $0x18] sm:$0xff]  ;;  %v3712_v11 = vld [vmem:[%s5350_s9 + $0x10] sm:$0xff]  ;;  %3432 = vset.pattern.permute.xlu1 %v3791_v47  ;;  %3431 = vset.pattern.permute.xlu0 %v3791_v47 }
   0x5   :  { %v3280_v12 = vld [vmem:[%s5349_s8 + $0x8] sm:$0xff]  ;;  %v3279_v14 = vld [vmem:[%s5349_s8] sm:$0xff]  ;;  %v3425_v24 = vld [vmem:[%s5354_s3 + $0x10] sm:$0xff]   ;;  %3430 = vset.pattern.permute.xlu2 %v3791_v47 }
   0x6   :  { %141 = vmatpush.bf16.msra.mxu0 %v3285_v2  ;;  %v3721_v13 = vld [vmem:[%s5350_s9 + $0x8] sm:$0xff]  ;;  %v3730_v15 = vld [vmem:[%s5350_s9] sm:$0xff]  ;;  %v3754_v28 = vunpack.c.l.bf16 %v3425_v24  ;;  %v3768_v35 = vunpack.c.h.bf16 %v3425_v24  ;;  %v3426_v41 = vld [vmem:[%s5354_s3 + $0x18] sm:$0xff]  }
   0x7   :  { %333 = vmatpush.bf16.msra.mxu1 %v3676_v3  ;;  %v281_v16 = vld [vmem:[%s5351_s1] sm:$0xff]  ;;  %v3424_v25 = vld [vmem:[%s5354_s3 + $0x8] sm:$0xff]   ;;  %v3783_v42 = vunpack.c.h.bf16 %v3426_v41  ;;  %v3785_v43 = vunpack.c.l.bf16 %v3426_v41 }
   0x8   :  { %v3276_v17 = vld [vmem:[%s5352_s0] sm:$0xff]  ;;  %v283_v18 = vpack.c.bf16 %v281_v16, %v281_v16  ;;  %v3756_v29 = vunpack.c.l.bf16 %v3424_v25  ;;  %v3770_v36 = vunpack.c.h.bf16 %v3424_v25 }
   0x9   :  { %v3742_v19 = vld [vmem:[%s5353_s10] ss:$0 sm:$0xff] }
   0xa   :  { %142 = vmatpush.bf16.msra.mxu0 %v3284_v4  ;;  %v3352_v26 = vld [vmem:[%s5354_s3] sm:$0xff]   ;;  %5416 = vst [vmem:[#allocation4_spill] sm:$0xff] %v3756_v29 }
   0xb   :  { %334 = vmatpush.bf16.msra.mxu1 %v3685_v5  ;;  %v3758_v30 = vunpack.c.l.bf16 %v3352_v26  ;;  %v3772_v37 = vunpack.c.h.bf16 %v3352_v26  ;;  %v3434_v63 = vld [vmem:[%s5355_s6] ss:$0 sm:$0xff] }
   0xc   :  { %vm3814_vm7 = vcmp.lt.s32.totalorder %v3791_v47, %v3434_v63  ;;  %v3428_v63 = vld [vmem:[%s5357_s5 + $0x10] sm:$0xff]  }
   0xd   :  { %5417 = vst [vmem:[#allocation5_spill] sm:$0xff] %v3772_v37 }
   0xe   :  { %143 = vmatpush.bf16.msra.mxu0 %v3283_v6 }
   0xf   :  { %335 = vmatpush.bf16.msra.mxu1 %v3694_v7 }
  0x12   :  { %144 = vmatpush.bf16.msra.mxu0 %v3282_v8 }
  0x13   :  { %336 = vmatpush.bf16.msra.mxu1 %v3703_v9 }
  0x16   :  { %145 = vmatpush.bf16.msra.mxu0 %v3281_v10 }
  0x17   :  { %337 = vmatpush.bf16.msra.mxu1 %v3712_v11 }
  0x1a   :  { %146 = vmatpush.bf16.msra.mxu0 %v3280_v12 }
  0x1b   :  { %338 = vmatpush.bf16.msra.mxu1 %v3721_v13 }
  0x1e   :  { %147 = vmatpush.bf16.msra.mxu0 %v3279_v14 }
  0x1f   :  { %339 = vmatpush.bf16.msra.mxu1 %v3730_v15 }
  0x21   :  { %148 = vmatmul.bf16.vlgmr.msra.gmra.mxu0 %v3276_v17 }
  0x22   :  { %340 = vmatmul.bf16.vlgmr.msra.gmra.mxu1 %v283_v18 }
  0x9e   :  { %v149_v20 = vpop.f32.mrf.mxu0 }
  0x9f   :  { %v341_v21 = vpop.f32.mrf.mxu1 }
  0xa0   :  { %v345_v22 = vadd.f32 %v341_v21, %v149_v20 }
  0xa2   :  { %v349_v23 = vadd.f32 %v3742_v19, %v345_v22 }
  0xa4   :  { %3437 = vtanh.f32 %v349_v23 }
  0xa7   :  { %v343_v27 = vpop.f32.mrf.mxu1 }
  0xaa   :  { %v3760_v31 = vpop.eup %3437 }
  0xab   :  { %v363_v32 = vmul.f32 %v3760_v31, %v3754_v28  ;;  %v361_v33 = vmul.f32 %v3760_v31, %v3756_v29  ;;  %v359_v34 = vmul.f32 %v3760_v31, %v3758_v30  ;;  %v364_v38 = vmul.f32 %v3760_v31, %v3768_v35 }
  0xac   :  { %v362_v39 = vmul.f32 %v3760_v31, %v3770_v36  ;;  %v360_v40 = vmul.f32 %v3760_v31, %v3772_v37  ;;  %v366_v44 = vmul.f32 %v3760_v31, %v3783_v42  ;;  %v365_v45 = vmul.f32 %v3760_v31, %v3785_v43 }
  0xad   :  { %375 = vadd.xlane.f32.xlu2 %v363_v32  ;;  %371 = vadd.xlane.f32.xlu1 %v361_v33 }
  0xae   :  { %367 = vadd.xlane.f32.xlu0 %v359_v34 }
  0xb5   :  { %377 = vadd.xlane.f32.xlu2 %v364_v38  ;;  %373 = vadd.xlane.f32.xlu1 %v362_v39 }
  0xb6   :  { %369 = vadd.xlane.f32.xlu0 %v360_v40 }
  0xbd   :  { %381 = vadd.xlane.f32.xlu1 %v366_v44 }
  0xbe   :  { %379 = vadd.xlane.f32.xlu0 %v365_v45 }
 0x120   :  { %v372_v48 = vpop.xlane.xlu1 %371  ;;  %v376_v50 = vpop.xlane.xlu2 %375 }
 0x121   :  { %v368_v49 = vpop.xlane.xlu0 %367  ;;  %v395_v56 = vperm.slane %v372_v48, %v3796_v51  ;;  %v397_v60 = vperm.slane %v376_v50, %v3796_v51 }
 0x122   :  { %v393_v54 = vperm.slane %v368_v49, %v3796_v51 }
 0x128   :  { %v374_v52 = vpop.xlane.xlu1 %373  ;;  %v378_v61 = vpop.xlane.xlu2 %377 }
 0x129   :  { %v370_v53 = vpop.xlane.xlu0 %369  ;;  %v396_v57 = vperm.slane %v374_v52, %v3796_v51  ;;  %v398_v4 = vperm.slane %v378_v61, %v3796_v51 }
 0x12a   :  { %v394_v55 = vperm.slane %v370_v53, %v3796_v51 }
 0x12c   :  { %v402_v58 = vsel %vm401_vm0, %v394_v55, %v393_v54 }
 0x12d   :  { %v404_v59 = vsel %vm403_vm1, %v395_v56, %v402_v58 }
 0x12e   :  { %v406_v62 = vsel %vm405_vm2, %v396_v57, %v404_v59 }
 0x12f   :  { %v408_v2 = vsel %vm407_vm3, %v397_v60, %v406_v62  ;;  %v3368_v60 = vld [vmem:[%s5357_s5] sm:$0xff]  }
 0x130   :  { %v382_v0 = vpop.xlane.xlu1 %381  ;;  %v410_v14 = vsel %vm409_vm4, %v398_v4, %v408_v2  ;;  %v3834_v61 = vunpack.c.l.bf16 %v3368_v60  ;;  %v3427_v4 = vld [vmem:[%s5357_s5 + $0x8] sm:$0xff]  }
 0x131   :  { %v400_v6 = vperm.slane %v382_v0, %v3796_v51  ;;  %v380_v8 = vpop.xlane.xlu0 %379  ;;  %v3841_v0 = vunpack.c.l.bf16 %v3428_v63 }
 0x132   :  { %v399_v10 = vperm.slane %v380_v8, %v3796_v51  ;;  %5420 = vst [vmem:[#allocation6_spill] sm:$0xff] %v3834_v61  ;;  %v526_v62 = vmul.f32 %v3760_v31, %v3834_v61  ;;  %v3851_v8 = vunpack.c.l.bf16 %v3427_v4 }
 0x133   :  { %v530_v2 = vmul.f32 %v3760_v31, %v3841_v0 }
 0x134   :  { %v412_v16 = vsel %vm411_vm5, %v399_v10, %v410_v14  ;;  %5421 = vst [vmem:[#allocation7_spill] sm:$0xff] %v3851_v8  ;;  %v528_v14 = vmul.f32 %v3760_v31, %v3851_v8 }
 0x135   :  { %v414_v17 = vsel %vm413_vm6, %v400_v6, %v412_v16  ;;  %v3429_v6 = vld [vmem:[%s5357_s5 + $0x18] sm:$0xff]  }
 0x136   :  { %v416_v18 = vsel %vm3814_vm7, %v414_v17, -1e+30  ;;  %v3853_v10 = vunpack.c.h.bf16 %v3429_v6  ;;  %v3859_v17 = vunpack.c.h.bf16 %v3368_v60  ;;  %v3419_v60 = vld [vmem:[%s5360_s2 + $0x10] sm:$0xff]  }
 0x137   :  { %v418_v20 = vsel %vm417_vm8, %v416_v18, -inf }
 0x138   :  { %v419_v21 = vrot.slane %v418_v20, 4  ;;  %5422 = vst [vmem:[#allocation8_spill] sm:$0xff] %v3853_v10  ;;  %v533_v16 = vmul.f32 %v3760_v31, %v3853_v10 }
 0x13a   :  { %v420_v22 = vmax.f32 %v418_v20, %v419_v21  ;;  %v527_v20 = vmul.f32 %v3760_v31, %v3859_v17 }
 0x13c   :  { %v421_v23 = vrot.slane %v420_v22, 2 }
 0x13e   :  { %v422_v24 = vmax.f32 %v420_v22, %v421_v23  ;;  %v3870_v22 = vld [vmem:[%s5358_s11 + $0x38] sm:$0xff]  ;;  %v3872_v23 = vunpack.c.h.bf16 %v3427_v4 }
 0x13f   :  { %841 = vmatpush.bf16.msra.mxu2 %v3870_v22 }
 0x140   :  { %v423_v25 = vrot.slane %v422_v24, 1 }
 0x142   :  { %v424_v26 = vmax.f32 %v422_v24, %v423_v25  ;;  %v3878_v24 = vld [vmem:[%s5358_s11 + $0x30] sm:$0xff]  ;;  %v529_v25 = vmul.f32 %v3760_v31, %v3872_v23 }
 0x143   :  { %842 = vmatpush.bf16.msra.mxu2 %v3878_v24 }
 0x144   :  { %v425_v27 = vsub.f32 %v416_v18, %v424_v26  ;;  %v3861_v18 = vunpack.c.h.bf16 %v3428_v63  ;;  %v3886_v26 = vld [vmem:[%s5358_s11 + $0x28] sm:$0xff] }
 0x146   :  { %v426_v32 = vmul.f32 1.442695, %v425_v27  ;;  %v531_v21 = vmul.f32 %v3760_v31, %v3861_v18  ;;  %v3888_v27 = vunpack.c.l.bf16 %v3429_v6 }
 0x147   :  { %843 = vmatpush.bf16.msra.mxu2 %v3886_v26 }
 0x148   :  { %3439 = vpow2.f32 %v426_v32  ;;  %5423 = vst [vmem:[#allocation9_spill] sm:$0xff] %v3888_v27  ;;  %v3894_v32 = vld [vmem:[%s5358_s11 + $0x20] sm:$0xff] }
 0x14b   :  { %844 = vmatpush.bf16.msra.mxu2 %v3894_v32 }
 0x14e   :  { %v3440_v33 = vpop.eup %3439 }
 0x14f   :  { %v428_v34 = vsel %vm3814_vm7, %v3440_v33, 0.0  ;;  %v3310_v33 = vld [vmem:[%s5358_s11 + $0x78] sm:$0xff] }
 0x150   :  { %v429_v38 = vsel %vm417_vm8, %v428_v34, 0.0  ;;  %854 = vmatpush.bf16.msra.mxu3 %v3310_v33  ;;  %1216 = vmatpush.bf16.msrb.mxu0 %v3310_v33 }
 0x151   :  { %v430_v39 = vrot.slane %v429_v38, 4 }
 0x153   :  { %v431_v40 = vadd.f32 %v430_v39, %v429_v38  ;;  %v3905_v38 = vld [vmem:[%s5358_s11 + $0x18] sm:$0xff]  ;;  %v3309_v39 = vld [vmem:[%s5358_s11 + $0x70] sm:$0xff] }
 0x154   :  { %845 = vmatpush.bf16.msra.mxu2 %v3905_v38  ;;  %855 = vmatpush.bf16.msra.mxu3 %v3309_v39 }
 0x155   :  { %v432_v41 = vrot.slane %v431_v40, 2  ;;  %1217 = vmatpush.bf16.msrb.mxu0 %v3309_v39 }
 0x157   :  { %v433_v44 = vadd.f32 %v432_v41, %v431_v40  ;;  %v3914_v40 = vld [vmem:[%s5358_s11 + $0x10] sm:$0xff]  ;;  %v3308_v41 = vld [vmem:[%s5358_s11 + $0x68] sm:$0xff] }
 0x158   :  { %846 = vmatpush.bf16.msra.mxu2 %v3914_v40  ;;  %856 = vmatpush.bf16.msra.mxu3 %v3308_v41 }
 0x159   :  { %v434_v45 = vrot.slane %v433_v44, 1  ;;  %1218 = vmatpush.bf16.msrb.mxu0 %v3308_v41 }
 0x15b   :  { %v435_v46 = vadd.f32 %v434_v45, %v433_v44  ;;  %v3923_v44 = vld [vmem:[%s5358_s11 + $0x8] sm:$0xff]  ;;  %v3307_v45 = vld [vmem:[%s5358_s11 + $0x60] sm:$0xff] }
 0x15c   :  { %847 = vmatpush.bf16.msra.mxu2 %v3923_v44  ;;  %857 = vmatpush.bf16.msra.mxu3 %v3307_v45 }
 0x15d   :  { %v436_v48 = vadd.f32 1e-20, %v435_v46  ;;  %1219 = vmatpush.bf16.msrb.mxu0 %v3307_v45  ;;  %v3932_v46 = vld [vmem:[%s5358_s11] sm:$0xff] }
 0x15f   :  { %3441 = vrcp.f32 %v436_v48  ;;  %v3306_v48 = vld [vmem:[%s5358_s11 + $0x58] sm:$0xff] }
 0x160   :  { %848 = vmatpush.bf16.msra.mxu2 %v3932_v46  ;;  %858 = vmatpush.bf16.msra.mxu3 %v3306_v48 }
 0x161   :  { %1220 = vmatpush.bf16.msrb.mxu0 %v3306_v48 }
 0x164   :  { %886 = vmatpush.bf16.msrb.mxu2 %v3667_v1 }
 0x165   :  { %v3442_v49 = vpop.eup %3441 }
 0x166   :  { %v438_v50 = vmul.f32 %v3442_v49, %v428_v34  ;;  %v532_v34 = vmul.f32 %v3760_v31, %v3888_v27 }
 0x168   :  { %882 = vst.msk [vmem:[%s5356_s14] sm:$0xff] %vm417_vm8, %v438_v50  ;;  %v453_v52 = vperm.slane %v438_v50, 2  ;;  %v446_v53 = vperm.slane %v438_v50, 1  ;;  %v439_v54 = vperm.slane %v438_v50, 0  ;;  %v474_v55 = vperm.slane %v438_v50, 5  ;;  %887 = vmatpush.bf16.msrb.mxu2 %v3676_v3 }
 0x169   :  { %v460_v56 = vperm.slane %v438_v50, 3  ;;  %v488_v57 = vperm.slane %v438_v50, 7  ;;  %v467_v58 = vperm.slane %v438_v50, 4  ;;  %v481_v59 = vperm.slane %v438_v50, 6  ;;  %v3305_v50 = vld [vmem:[%s5358_s11 + $0x50] sm:$0xff] }
 0x16a   :  { %458 = vperm.xlu1 %3432, %v453_v52   ;;  %451 = vperm.xlu0 %3431, %v446_v53   ;;  %v3304_v52 = vld [vmem:[%s5358_s11 + $0x48] sm:$0xff]  ;;  %v3950_v53 = vld [vmem:[%s5358_s11 + $0x40] sm:$0xff] }
 0x16b   :  { %444 = vperm.xlu2 %3430, %v439_v54   ;;  %859 = vmatpush.bf16.msra.mxu3 %v3305_v50 }
 0x16c   :  { %1221 = vmatpush.bf16.msrb.mxu0 %v3305_v50  ;;  %888 = vmatpush.bf16.msrb.mxu2 %v3685_v5 }
 0x16f   :  { %860 = vmatpush.bf16.msra.mxu3 %v3304_v52 }
 0x170   :  { %1222 = vmatpush.bf16.msrb.mxu0 %v3304_v52  ;;  %889 = vmatpush.bf16.msrb.mxu2 %v3694_v7 }
 0x172   :  { %479 = vperm.xlu1 %3432, %v474_v55   ;;  %v3320_v55 = vld [vmem:[%s5360_s2] sm:$0xff]  }
 0x173   :  { %465 = vperm.xlu2 %3430, %v460_v56   ;;  %861 = vmatpush.bf16.msra.mxu3 %v3950_v53  ;;  %v3959_v56 = vunpack.c.l.bf16 %v3320_v55 }
 0x174   :  { %1223 = vmatpush.bf16.msrb.mxu0 %v3950_v53  ;;  %890 = vmatpush.bf16.msrb.mxu2 %v3703_v9 }
 0x177   :  { %1203 = vmatpush.bf16.msrb.mxu3 %v3870_v22 }
 0x178   :  { %1581 = vmatpush.bf16.msra.mxu0 %v3310_v33  ;;  %891 = vmatpush.bf16.msrb.mxu2 %v3712_v11 }
 0x17a   :  { %493 = vperm.xlu1 %3432, %v488_v57   ;;  %v3961_v57 = vunpack.c.h.bf16 %v3320_v55 }
 0x17b   :  { %472 = vperm.xlu2 %3430, %v467_v58   ;;  %v3418_v58 = vld [vmem:[%s5360_s2 + $0x8] sm:$0xff]   ;;  %1204 = vmatpush.bf16.msrb.mxu3 %v3878_v24 }
 0x17c   :  { %v3974_v4 = vunpack.c.h.bf16 %v3418_v58  ;;  %1582 = vmatpush.bf16.msra.mxu0 %v3309_v39  ;;  %892 = vmatpush.bf16.msrb.mxu2 %v3721_v13  ;;  %v3420_v39 = vld [vmem:[%s5360_s2 + $0x18] sm:$0xff]  }
 0x17e   :  { %5425 = vst [vmem:[#allocation11_spill] sm:$0xff] %v3974_v4 }
 0x17f   :  { %1205 = vmatpush.bf16.msrb.mxu3 %v3886_v26 }
 0x180   :  { %1583 = vmatpush.bf16.msra.mxu0 %v3308_v41  ;;  %893 = vmatpush.bf16.msrb.mxu2 %v3730_v15 }
 0x183   :  { %486 = vperm.xlu2 %3430, %v481_v59   ;;  %v3966_v59 = vunpack.c.l.bf16 %v3418_v58  ;;  %1206 = vmatpush.bf16.msrb.mxu3 %v3894_v32 }
 0x184   :  { %1584 = vmatpush.bf16.msra.mxu0 %v3307_v45 }
 0x185   :  { %5424 = vst [vmem:[#allocation10_spill] sm:$0xff] %v3966_v59 }
 0x187   :  { %1207 = vmatpush.bf16.msrb.mxu3 %v3905_v38 }
 0x188   :  { %1585 = vmatpush.bf16.msra.mxu0 %v3306_v48 }
 0x18b   :  { %1208 = vmatpush.bf16.msrb.mxu3 %v3914_v40 }
 0x18c   :  { %1586 = vmatpush.bf16.msra.mxu0 %v3305_v50  ;;  %v675_v50 = vpack.c.bf16 %v3760_v31, %v3760_v31 }
 0x18f   :  { %1209 = vmatpush.bf16.msrb.mxu3 %v3923_v44 }
 0x190   :  { %1587 = vmatpush.bf16.msra.mxu0 %v3304_v52 }
 0x193   :  { %1210 = vmatpush.bf16.msrb.mxu3 %v3932_v46 }
 0x194   :  { %534 = vadd.xlane.f32.xlu0 %v526_v62  ;;  %1588 = vmatpush.bf16.msra.mxu0 %v3950_v53 }
 0x19c   :  { %542 = vadd.xlane.f32.xlu0 %v530_v2 }
 0x1a4   :  { %538 = vadd.xlane.f32.xlu1 %v528_v14  ;;  %548 = vadd.xlane.f32.xlu0 %v533_v16  ;;  %v3977_v16 = vunpack.c.l.bf16 %v3419_v60 }
 0x1a6   :  { %5426 = vst [vmem:[#allocation12_spill] sm:$0xff] %v3977_v16 }
 0x1ac   :  { %536 = vadd.xlane.f32.xlu2 %v527_v20  ;;  %544 = vadd.xlane.f32.xlu1 %v531_v21 }
 0x1b4   :  { %540 = vadd.xlane.f32.xlu2 %v529_v25 }
 0x1bc   :  { %546 = vadd.xlane.f32.xlu2 %v532_v34  ;;  %v3983_v34 = vunpack.c.h.bf16 %v3419_v60 }
 0x1be   :  { %5427 = vst [vmem:[#allocation13_spill] sm:$0xff] %v3983_v34 }
 0x1c5   :  { %v445_v49 = vpop.permute.xlu2 %444 }
 0x1c6   :  { %v503_v2 = vmul.f32 %v3959_v56, %v445_v49 }
 0x1cd   :  { %v466_v54 = vpop.permute.xlu2 %465 }
 0x1ce   :  { %v506_v25 = vmul.f32 %v3974_v4, %v466_v54  ;;  %v3992_v54 = vunpack.c.l.bf16 %v3420_v39 }
 0x1d5   :  { %v473_v14 = vpop.permute.xlu2 %472 }
 0x1d6   :  { %v507_v49 = vmul.f32 %v3977_v16, %v473_v14 }
 0x1dc   :  { %v459_v62 = vpop.permute.xlu1 %458  ;;  %v452_v63 = vpop.permute.xlu0 %451 }
 0x1dd   :  { %v504_v6 = vmul.f32 %v3961_v57, %v452_v63  ;;  %v505_v20 = vmul.f32 %v3966_v59, %v459_v62  ;;  %v487_v41 = vpop.permute.xlu2 %486 }
 0x1df   :  { %v511_v21 = vadd.f32 %v504_v6, %v503_v2  ;;  %v3996_v2 = vunpack.c.h.bf16 %v3420_v39  ;;  %v509_v6 = vmul.f32 %v3992_v54, %v487_v41 }
 0x1e1   :  { %v512_v33 = vadd.f32 %v511_v21, %v505_v20  ;;  %5428 = vst [vmem:[#allocation14_spill] sm:$0xff] %v3996_v2 }
 0x1e3   :  { %v513_v55 = vadd.f32 %v512_v33, %v506_v25 }
 0x1e4   :  { %v480_v58 = vpop.permute.xlu1 %479 }
 0x1e5   :  { %v508_v62 = vmul.f32 %v3983_v34, %v480_v58  ;;  %v514_v63 = vadd.f32 %v513_v55, %v507_v49 }
 0x1e7   :  { %v515_v60 = vadd.f32 %v514_v63, %v508_v62  ;;  %v3435_v63 = vld [vmem:[%s5359_s7] ss:$0 sm:$0xff] }
 0x1e8   :  { %vm4046_vm9 = vcmp.lt.s32.totalorder %v3791_v47, %v3435_v63 }
 0x1e9   :  { %v516_v21 = vadd.f32 %v515_v60, %v509_v6 }
 0x1ec   :  { %v494_v14 = vpop.permute.xlu1 %493 }
 0x1ed   :  { %v510_v20 = vmul.f32 %v3996_v2, %v494_v14 }
 0x1ef   :  { %v517_v45 = vadd.f32 %v516_v21, %v510_v20 }
 0x1f1   :  { %v3386_v25 = vpack.c.bf16 %v517_v45, %v3760_v31 }
 0x1f3   :  { %v688_v33 = vunpack.c.l.b16 %v3386_v25  ;;  %v689_v49 = vunpack.c.h.b16 %v3386_v25 }
 0x1f5   :  { %v691_v48 = vpack.c.b16 %v688_v33, %v688_v33  ;;  %v692_v55 = vpack.c.b16 %v689_v49, %v689_v49 }
 0x1f7   :  { %849 = vmatmul.bf16.vlgmr.msra.gmra.mxu2 %v691_v48  ;;  %862 = vmatmul.bf16.vlgmr.msra.gmra.mxu3 %v692_v55 }
 0x1f8   :  { %1251 = vmatpush.bf16.msra.mxu2 %v3667_v1  ;;  %1568 = vmatpush.bf16.msra.mxu3 %v3870_v22 }
 0x1fc   :  { %1252 = vmatpush.bf16.msra.mxu2 %v3676_v3  ;;  %1569 = vmatpush.bf16.msra.mxu3 %v3878_v24 }
 0x200   :  { %1253 = vmatpush.bf16.msra.mxu2 %v3685_v5  ;;  %1570 = vmatpush.bf16.msra.mxu3 %v3886_v26 }
 0x204   :  { %1254 = vmatpush.bf16.msra.mxu2 %v3694_v7  ;;  %1571 = vmatpush.bf16.msra.mxu3 %v3894_v32 }
 0x207   :  { %894 = vmatmul.bf16.vlgmr.msrb.gmra.mxu2 %v675_v50  ;;  %v535_v31 = vpop.xlane.xlu0 %534 }
 0x208   :  { %1255 = vmatpush.bf16.msra.mxu2 %v3703_v9  ;;  %1572 = vmatpush.bf16.msra.mxu3 %v3905_v38  ;;  %v558_v38 = vperm.slane %v535_v31, %v3796_v51 }
 0x20c   :  { %1256 = vmatpush.bf16.msra.mxu2 %v3712_v11  ;;  %1573 = vmatpush.bf16.msra.mxu3 %v3914_v40 }
 0x20f   :  { %v543_v32 = vpop.xlane.xlu0 %542 }
 0x210   :  { %1257 = vmatpush.bf16.msra.mxu2 %v3721_v13  ;;  %1574 = vmatpush.bf16.msra.mxu3 %v3923_v44  ;;  %v562_v58 = vperm.slane %v543_v32, %v3796_v51 }
 0x214   :  { %1258 = vmatpush.bf16.msra.mxu2 %v3730_v15  ;;  %1575 = vmatpush.bf16.msra.mxu3 %v3932_v46 }
 0x217   :  { %v539_v24 = vpop.xlane.xlu1 %538  ;;  %v549_v41 = vpop.xlane.xlu0 %548 }
 0x218   :  { %1616 = vmatpush.bf16.msrb.mxu2 %v3667_v1  ;;  %v560_v46 = vperm.slane %v539_v24, %v3796_v51  ;;  %v565_v21 = vperm.slane %v549_v41, %v3796_v51 }
 0x21c   :  { %1617 = vmatpush.bf16.msrb.mxu2 %v3676_v3 }
 0x21f   :  { %v537_v22 = vpop.xlane.xlu2 %536  ;;  %v545_v62 = vpop.xlane.xlu1 %544 }
 0x220   :  { %1618 = vmatpush.bf16.msrb.mxu2 %v3685_v5  ;;  %v559_v26 = vperm.slane %v537_v22, %v3796_v51  ;;  %v563_v6 = vperm.slane %v545_v62, %v3796_v51 }
 0x222   :  { %v566_v40 = vsel %vm401_vm0, %v559_v26, %v558_v38 }
 0x223   :  { %v567_v53 = vsel %vm403_vm1, %v560_v46, %v566_v40 }
 0x224   :  { %1619 = vmatpush.bf16.msrb.mxu2 %v3694_v7 }
 0x227   :  { %v541_v44 = vpop.xlane.xlu2 %540 }
 0x228   :  { %1620 = vmatpush.bf16.msrb.mxu2 %v3703_v9  ;;  %v561_v52 = vperm.slane %v541_v44, %v3796_v51 }
 0x22a   :  { %v568_v39 = vsel %vm405_vm2, %v561_v52, %v567_v53 }
 0x22b   :  { %v569_v60 = vsel %vm407_vm3, %v562_v58, %v568_v39 }
 0x22c   :  { %1621 = vmatpush.bf16.msrb.mxu2 %v3712_v11  ;;  %v570_v25 = vsel %vm409_vm4, %v563_v6, %v569_v60 }
 0x22f   :  { %v547_v14 = vpop.xlane.xlu2 %546 }
 0x230   :  { %1622 = vmatpush.bf16.msrb.mxu2 %v3721_v13  ;;  %v564_v20 = vperm.slane %v547_v14, %v3796_v51 }
 0x232   :  { %v571_v33 = vsel %vm411_vm5, %v564_v20, %v570_v25 }
 0x233   :  { %v572_v49 = vsel %vm413_vm6, %v565_v21, %v571_v33 }
 0x234   :  { %1623 = vmatpush.bf16.msrb.mxu2 %v3730_v15  ;;  %v574_v48 = vsel %vm4046_vm9, %v572_v49, -1e+30 }
 0x235   :  { %v575_v55 = vsel %vm417_vm8, %v574_v48, -inf }
 0x236   :  { %v576_v50 = vrot.slane %v575_v55, 4 }
 0x238   :  { %v577_v31 = vmax.f32 %v575_v55, %v576_v50 }
 0x23a   :  { %v578_v22 = vrot.slane %v577_v31, 2 }
 0x23c   :  { %v579_v47 = vmax.f32 %v577_v31, %v578_v22  ;;  %v3436_v31 = vld [vmem:[%s5361_s12] ss:$0 sm:$0xff] }
 0x23e   :  { %v580_v24 = vrot.slane %v579_v47, 1 }
 0x240   :  { %v581_v26 = vmax.f32 %v579_v47, %v580_v24 }
 0x242   :  { %v582_v32 = vsub.f32 %v574_v48, %v581_v26  ;;  %v3277_v48 = vld [vmem:[%s5352_s0 + $0x8] sm:$0xff] }
 0x243   :  { %153 = vmatmul.bf16.gmra.mxu0 %v3277_v48  ;;  %v4138_v48 = vld [vmem:[%s5358_s11 + $0xa0] sm:$0xff] }
 0x244   :  { %v583_v38 = vmul.f32 1.442695, %v582_v32  ;;  %5431 = vst [vmem:[#allocation15_spill] sm:$0xff] %v4138_v48 }
 0x246   :  { %3443 = vpow2.f32 %v583_v38 }
 0x24c   :  { %v3444_v40 = vpop.eup %3443 }
 0x24d   :  { %v585_v44 = vsel %vm4046_vm9, %v3444_v40, 0.0  ;;  %v151_v40 = vpop.f32.mrf.mxu0 }
 0x24e   :  { %v586_v46 = vsel %vm417_vm8, %v585_v44, 0.0 }
 0x24f   :  { %v587_v52 = vrot.slane %v586_v46, 4 }
 0x251   :  { %v588_v53 = vadd.f32 %v587_v52, %v586_v46 }
 0x253   :  { %v589_v39 = vrot.slane %v588_v53, 2 }
 0x255   :  { %v590_v58 = vadd.f32 %v589_v39, %v588_v53 }
 0x257   :  { %v591_v62 = vrot.slane %v590_v58, 1 }
 0x259   :  { %v592_v63 = vadd.f32 %v591_v62, %v590_v58 }
 0x25b   :  { %v593_v41 = vadd.f32 1e-20, %v592_v63 }
 0x25d   :  { %3445 = vrcp.f32 %v593_v41 }
 0x263   :  { %v3446_v60 = vpop.eup %3445 }
 0x264   :  { %v595_v6 = vmul.f32 %v3446_v60, %v585_v44 }
 0x266   :  { %883 = vst.msk [vmem:[%s5362_s15] sm:$0xff] %vm417_vm8, %v595_v6  ;;  %v610_v14 = vperm.slane %v595_v6, 2  ;;  %v603_v20 = vperm.slane %v595_v6, 1  ;;  %v596_v21 = vperm.slane %v595_v6, 0  ;;  %v624_v25 = vperm.slane %v595_v6, 4 }
 0x267   :  { %v631_v33 = vperm.slane %v595_v6, 5  ;;  %v617_v49 = vperm.slane %v595_v6, 3  ;;  %v645_v55 = vperm.slane %v595_v6, 7  ;;  %v638_v50 = vperm.slane %v595_v6, 6 }
 0x268   :  { %615 = vperm.xlu0 %3431, %v610_v14   ;;  %608 = vperm.xlu2 %3430, %v603_v20  }
 0x269   :  { %601 = vperm.xlu1 %3432, %v596_v21   ;;  %v4114_v21 = vld [vmem:[%s5358_s11 + $0xb8] sm:$0xff] }
 0x26a   :  { %867 = vmatpush.bf16.msrb.mxu1 %v4114_v21 }
 0x270   :  { %629 = vperm.xlu0 %3431, %v624_v25   ;;  %636 = vperm.xlu2 %3430, %v631_v33   ;;  %v4124_v25 = vld [vmem:[%s5358_s11 + $0xb0] sm:$0xff]  ;;  %v4130_v33 = vld [vmem:[%s5358_s11 + $0xa8] sm:$0xff] }
 0x271   :  { %622 = vperm.xlu1 %3432, %v617_v49   ;;  %868 = vmatpush.bf16.msrb.mxu1 %v4124_v25 }
 0x275   :  { %869 = vmatpush.bf16.msrb.mxu1 %v4130_v33 }
 0x278   :  { %650 = vperm.xlu0 %3431, %v645_v55   ;;  %v3314_v55 = vld [vmem:[%s5358_s11 + $0x98] sm:$0xff] }
 0x279   :  { %643 = vperm.xlu1 %3432, %v638_v50   ;;  %870 = vmatpush.bf16.msrb.mxu1 %v4138_v48  ;;  %v4147_v50 = vld [vmem:[%s5358_s11 + $0x90] sm:$0xff] }
 0x27a   :  { %v850_v22 = vpop.f32.mrf.mxu2  ;;  %v863_v47 = vpop.f32.mrf.mxu3  ;;  %5432 = vst [vmem:[#allocation16_spill] sm:$0xff] %v4147_v50 }
 0x27b   :  { %v851_v24 = vadd.f32 %v3436_v31, %v850_v22  ;;  %v3336_v31 = vld [vmem:[%s5363_s4] sm:$0xff]   ;;  %v4156_v22 = vld [vmem:[%s5358_s11 + $0x88] sm:$0xff] }
 0x27c   :  { %5433 = vst [vmem:[#allocation17_spill] sm:$0xff] %v4156_v22 }
 0x27d   :  { %v4070_v26 = vadd.f32 %v863_v47, %v851_v24  ;;  %871 = vmatpush.bf16.msrb.mxu1 %v3314_v55  ;;  %v4158_v47 = vunpack.c.l.bf16 %v3336_v31  ;;  %v4160_v24 = vunpack.c.h.bf16 %v3336_v31 }
 0x281   :  { %872 = vmatpush.bf16.msrb.mxu1 %v4147_v50 }
 0x282   :  { %v852_v32 = vpop.f32.mrf.mxu2  ;;  %v865_v38 = vpop.f32.mrf.mxu3 }
 0x285   :  { %873 = vmatpush.bf16.msrb.mxu1 %v4156_v22 }
 0x28a   :  { %v895_v44 = vpop.f32.mrf.mxu2 }
 0x28b   :  { %v899_v46 = vadd.f32 %v895_v44, %v151_v40  ;;  %v3421_v40 = vld [vmem:[%s5363_s4 + $0x8] sm:$0xff]  }
 0x28d   :  { %v900_v52 = vadd.f32 %v3742_v19, %v899_v46  ;;  %v4169_v46 = vld [vmem:[%s5358_s11 + $0x80] sm:$0xff] }
 0x28e   :  { %5434 = vst [vmem:[#allocation18_spill] sm:$0xff] %v4169_v46  ;;  %874 = vmatpush.bf16.msrb.mxu1 %v4169_v46 }
 0x28f   :  { %3447 = vtanh.f32 %v900_v52 }
 0x292   :  { %v897_v53 = vpop.f32.mrf.mxu2  ;;  %1229 = vmatpush.bf16.msra.mxu1 %v4114_v21 }
 0x295   :  { %v4073_v39 = vpop.eup %3447 }
 0x296   :  { %v1184_v58 = vpack.c.bf16 %v4073_v39, %v4073_v39  ;;  %v902_v62 = vmul.f32 %v4073_v39, %v3758_v30  ;;  %v905_v63 = vmul.f32 %v4073_v39, %v3770_v36  ;;  %v904_v41 = vmul.f32 %v4073_v39, %v3756_v29  ;;  %1230 = vmatpush.bf16.msra.mxu1 %v4124_v25 }
 0x297   :  { %v903_v60 = vmul.f32 %v4073_v39, %v3772_v37  ;;  %v906_v6 = vmul.f32 %v4073_v39, %v3754_v28  ;;  %v909_v14 = vmul.f32 %v4073_v39, %v3783_v42  ;;  %v1044_v20 = vmul.f32 %v4073_v39, %v3859_v17 }
 0x298   :  { %1259 = vmatmul.bf16.vlgmr.msra.gmra.mxu2 %v1184_v58  ;;  %v1050_v49 = vmul.f32 %v4073_v39, %v3853_v10  ;;  %v4173_v58 = vunpack.c.l.bf16 %v3421_v40 }
 0x299   :  { %910 = vadd.xlane.f32.xlu2 %v902_v62  ;;  %1981 = vmatpush.bf16.msra.mxu2 %v3667_v1  ;;  %v908_v1 = vmul.f32 %v4073_v39, %v3785_v43 }
 0x29a   :  { %1231 = vmatpush.bf16.msra.mxu1 %v4130_v33 }
 0x29d   :  { %1982 = vmatpush.bf16.msra.mxu2 %v3676_v3  ;;  %v907_v3 = vmul.f32 %v4073_v39, %v3768_v35 }
 0x29e   :  { %1232 = vmatpush.bf16.msra.mxu1 %v4138_v48 }
 0x2a1   :  { %916 = vadd.xlane.f32.xlu2 %v905_v63  ;;  %1983 = vmatpush.bf16.msra.mxu2 %v3685_v5  ;;  %v1045_v5 = vmul.f32 %v4073_v39, %v3851_v8  ;;  %v4176_v63 = vunpack.c.h.bf16 %v3421_v40 }
 0x2a2   :  { %914 = vadd.xlane.f32.xlu0 %v904_v41  ;;  %v3422_v41 = vld [vmem:[%s5363_s4 + $0x10] sm:$0xff]   ;;  %1233 = vmatpush.bf16.msra.mxu1 %v3314_v55 }
 0x2a3   :  { %912 = vadd.xlane.f32.xlu1 %v903_v60 }
 0x2a5   :  { %1984 = vmatpush.bf16.msra.mxu2 %v3694_v7  ;;  %v1043_v7 = vmul.f32 %v4073_v39, %v3834_v61 }
 0x2a6   :  { %1234 = vmatpush.bf16.msra.mxu1 %v4147_v50 }
 0x2a9   :  { %922 = vadd.xlane.f32.xlu2 %v908_v1  ;;  %1985 = vmatpush.bf16.msra.mxu2 %v3703_v9  ;;  %v1048_v9 = vmul.f32 %v4073_v39, %v3861_v18  ;;  %v4183_v1 = vunpack.c.l.bf16 %v3422_v41 }
 0x2aa   :  { %920 = vadd.xlane.f32.xlu0 %v907_v3  ;;  %1235 = vmatpush.bf16.msra.mxu1 %v4156_v22 }
 0x2ab   :  { %918 = vadd.xlane.f32.xlu1 %v906_v6 }
 0x2ad   :  { %1986 = vmatpush.bf16.msra.mxu2 %v3712_v11  ;;  %v1046_v11 = vmul.f32 %v4073_v39, %v3872_v23 }
 0x2ae   :  { %1236 = vmatpush.bf16.msra.mxu1 %v4169_v46 }
 0x2b1   :  { %1055 = vadd.xlane.f32.xlu2 %v1045_v5  ;;  %1987 = vmatpush.bf16.msra.mxu2 %v3721_v13  ;;  %v1049_v13 = vmul.f32 %v4073_v39, %v3888_v27 }
 0x2b2   :  { %1051 = vadd.xlane.f32.xlu0 %v1043_v7 }
 0x2b3   :  { %924 = vadd.xlane.f32.xlu1 %v909_v14  ;;  %v3423_v14 = vld [vmem:[%s5363_s4 + $0x18] sm:$0xff]  }
 0x2b5   :  { %1988 = vmatpush.bf16.msra.mxu2 %v3730_v15  ;;  %v1047_v15 = vmul.f32 %v4073_v39, %v3841_v0 }
 0x2b9   :  { %1061 = vadd.xlane.f32.xlu2 %v1048_v9  ;;  %v4190_v9 = vunpack.c.h.bf16 %v3422_v41 }
 0x2ba   :  { %1057 = vadd.xlane.f32.xlu0 %v1046_v11 }
 0x2bb   :  { %1053 = vadd.xlane.f32.xlu1 %v1044_v20  ;;  %5435 = vst [vmem:[#allocation19_spill] sm:$0xff] %v4190_v9 }
 0x2c2   :  { %1063 = vadd.xlane.f32.xlu0 %v1049_v13  ;;  %v609_v38 = vpop.permute.xlu2 %608 }
 0x2c3   :  { %1059 = vadd.xlane.f32.xlu1 %v1047_v15  ;;  %v661_v53 = vmul.f32 %v4160_v24, %v609_v38 }
 0x2ca   :  { %v637_v13 = vpop.permute.xlu2 %636 }
 0x2cb   :  { %1065 = vadd.xlane.f32.xlu1 %v1050_v49  ;;  %v4193_v49 = vunpack.c.l.bf16 %v3423_v14  ;;  %v665_v31 = vmul.f32 %v4190_v9, %v637_v13 }
 0x2cd   :  { %5436 = vst [vmem:[#allocation20_spill] sm:$0xff] %v4193_v49 }
 0x2da   :  { %v616_v32 = vpop.permute.xlu0 %615 }
 0x2db   :  { %v602_v44 = vpop.permute.xlu1 %601  ;;  %v662_v60 = vmul.f32 %v4173_v58, %v616_v32  ;;  %v4197_v32 = vunpack.c.h.bf16 %v3423_v14 }
 0x2dc   :  { %v660_v52 = vmul.f32 %v4158_v47, %v602_v44 }
 0x2dd   :  { %5437 = vst [vmem:[#allocation21_spill] sm:$0xff] %v4197_v32 }
 0x2de   :  { %v668_v62 = vadd.f32 %v661_v53, %v660_v52 }
 0x2e0   :  { %v669_v5 = vadd.f32 %v668_v62, %v662_v60 }
 0x2e2   :  { %v630_v3 = vpop.permute.xlu0 %629 }
 0x2e3   :  { %v623_v6 = vpop.permute.xlu1 %622  ;;  %v664_v11 = vmul.f32 %v4183_v1, %v630_v3 }
 0x2e4   :  { %v663_v7 = vmul.f32 %v4176_v63, %v623_v6 }
 0x2e6   :  { %v670_v20 = vadd.f32 %v669_v5, %v663_v7 }
 0x2e8   :  { %v671_v15 = vadd.f32 %v670_v20, %v664_v11 }
 0x2ea   :  { %v651_v38 = vpop.permute.xlu0 %650  ;;  %v672_v44 = vadd.f32 %v671_v15, %v665_v31 }
 0x2eb   :  { %v644_v40 = vpop.permute.xlu1 %643  ;;  %v667_v53 = vmul.f32 %v4197_v32, %v651_v38 }
 0x2ec   :  { %v666_v52 = vmul.f32 %v4193_v49, %v644_v40 }
 0x2ee   :  { %v673_v62 = vadd.f32 %v672_v44, %v666_v52 }
 0x2f0   :  { %v674_v41 = vadd.f32 %v673_v62, %v667_v53 }
 0x2f2   :  { %v679_v60 = vpack.c.bf16 %v674_v41, %v674_v41 }
 0x2f4   :  { %680 = vst [vmem:[#allocation3 + $0x8] sm:$0xf] %v679_v60 }
 0x2fb   :  { %v682_v3 = vld [vmem:[#allocation3 + $0x8] sm:$0xf] }
 0x2fc   :  { %v690_v6 = vunpack.c.l.b16 %v682_v3 }
 0x2fe   :  { %v693_v5 = vpack.c.b16 %v690_v6, %v690_v6 }
 0x300   :  { %875 = vmatmul.bf16.vlgmr.msrb.gmra.mxu1 %v693_v5 }
 0x301   :  { %1594 = vmatpush.bf16.msrb.mxu1 %v4114_v21 }
 0x305   :  { %1595 = vmatpush.bf16.msrb.mxu1 %v4124_v25 }
 0x309   :  { %1596 = vmatpush.bf16.msrb.mxu1 %v4130_v33  ;;  %v154_v33 = vpop.f32.mrf.mxu0 }
 0x30c   :  { %v911_v7 = vpop.xlane.xlu2 %910 }
 0x30d   :  { %1597 = vmatpush.bf16.msrb.mxu1 %v4138_v48  ;;  %v934_v13 = vperm.slane %v911_v7, %v3796_v51 }
 0x311   :  { %1598 = vmatpush.bf16.msrb.mxu1 %v3314_v55 }
 0x314   :  { %v917_v15 = vpop.xlane.xlu2 %916 }
 0x315   :  { %v915_v14 = vpop.xlane.xlu0 %914  ;;  %1599 = vmatpush.bf16.msrb.mxu1 %v4147_v50  ;;  %v937_v53 = vperm.slane %v917_v15, %v3796_v51 }
 0x316   :  { %v913_v11 = vpop.xlane.xlu1 %912  ;;  %v936_v21 = vperm.slane %v915_v14, %v3796_v51 }
 0x317   :  { %v935_v20 = vperm.slane %v913_v11, %v3796_v51 }
 0x319   :  { %1600 = vmatpush.bf16.msrb.mxu1 %v4156_v22  ;;  %v942_v25 = vsel %vm401_vm0, %v935_v20, %v934_v13 }
 0x31a   :  { %v943_v55 = vsel %vm403_vm1, %v936_v21, %v942_v25 }
 0x31b   :  { %v1260_v31 = vpop.f32.mrf.mxu2  ;;  %v944_v41 = vsel %vm405_vm2, %v937_v53, %v943_v55 }
 0x31c   :  { %v1264_v38 = vadd.f32 %v1260_v31, %v154_v33  ;;  %v923_v6 = vpop.xlane.xlu2 %922 }
 0x31d   :  { %v921_v40 = vpop.xlane.xlu0 %920  ;;  %1601 = vmatpush.bf16.msrb.mxu1 %v4169_v46  ;;  %v940_v11 = vperm.slane %v923_v6, %v3796_v51  ;;  %v4253_v6 = vld [vmem:[%s5350_s9 + $0x30] sm:$0xff] }
 0x31e   :  { %v919_v44 = vpop.xlane.xlu1 %918  ;;  %v1265_v52 = vadd.f32 %v3742_v19, %v1264_v38  ;;  %v939_v60 = vperm.slane %v921_v40, %v3796_v51 }
 0x31f   :  { %v938_v62 = vperm.slane %v919_v44, %v3796_v51  ;;  %v4244_v44 = vld [vmem:[%s5350_s9 + $0x38] sm:$0xff] }
 0x320   :  { %3449 = vtanh.f32 %v1265_v52 }
 0x321   :  { %v945_v3 = vsel %vm407_vm3, %v938_v62, %v944_v41 }
 0x322   :  { %v946_v7 = vsel %vm409_vm4, %v939_v60, %v945_v3 }
 0x323   :  { %v1262_v5 = vpop.f32.mrf.mxu2  ;;  %v947_v33 = vsel %vm411_vm5, %v940_v11, %v946_v7 }
 0x324   :  { %v1056_v62 = vpop.xlane.xlu2 %1055 }
 0x325   :  { %v1052_v20 = vpop.xlane.xlu0 %1051 }
 0x326   :  { %v4224_v14 = vpop.eup %3449  ;;  %v925_v19 = vpop.xlane.xlu1 %924 }
 0x327   :  { %5438 = vst [vmem:[#allocation22_spill] sm:$0xff] %v4224_v14  ;;  %v941_v13 = vperm.slane %v925_v19, %v3796_v51  ;;  %v1549_v15 = vpack.c.bf16 %v4224_v14, %v4224_v14  ;;  %v1269_v21 = vmul.f32 %v4224_v14, %v3756_v29  ;;  %v1268_v25 = vmul.f32 %v4224_v14, %v3772_v37 }
 0x328   :  { %v1267_v31 = vmul.f32 %v4224_v14, %v3758_v30  ;;  %v1272_v3 = vmul.f32 %v4224_v14, %v3768_v35  ;;  %v1271_v7 = vmul.f32 %v4224_v14, %v3754_v28  ;;  %v1270_v11 = vmul.f32 %v4224_v14, %v3770_v36 }
 0x329   :  { %v948_v38 = vsel %vm413_vm6, %v941_v13, %v947_v33  ;;  %1624 = vmatmul.bf16.vlgmr.msrb.gmra.mxu2 %v1549_v15  ;;  %1279 = vadd.xlane.f32.xlu2 %v1269_v21  ;;  %v1075_v19 = vperm.slane %v1052_v20, %v3796_v51  ;;  %v1415_v50 = vmul.f32 %v4224_v14, %v3853_v10 }
 0x32a   :  { %v950_v40 = vsel %vm3814_vm7, %v948_v38, -1e+30  ;;  %1277 = vadd.xlane.f32.xlu1 %v1268_v25  ;;  %1275 = vadd.xlane.f32.xlu0 %v1267_v31  ;;  %v4265_v25 = vld [vmem:[%s5350_s9 + $0x28] sm:$0xff]  ;;  %v1077_v31 = vperm.slane %v1056_v62, %v3796_v51 }
 0x32b   :  { %v951_v55 = vsel %vm417_vm8, %v950_v40, -inf  ;;  %2346 = vmatpush.bf16.msrb.mxu2 %v4244_v44 }
 0x32c   :  { %v952_v52 = vrot.slane %v951_v55, 4  ;;  %v1062_v62 = vpop.xlane.xlu2 %1061 }
 0x32d   :  { %v1058_v13 = vpop.xlane.xlu0 %1057 }
 0x32e   :  { %v953_v53 = vmax.f32 %v951_v55, %v952_v52  ;;  %v1054_v41 = vpop.xlane.xlu1 %1053  ;;  %v1078_v52 = vperm.slane %v1058_v13, %v3796_v51 }
 0x32f   :  { %v1076_v60 = vperm.slane %v1054_v41, %v3796_v51  ;;  %2347 = vmatpush.bf16.msrb.mxu2 %v4253_v6  ;;  %v1408_v41 = vmul.f32 %v4224_v14, %v3834_v61 }
 0x330   :  { %v954_v5 = vrot.slane %v953_v53, 2 }
 0x331   :  { %1285 = vadd.xlane.f32.xlu2 %v1272_v3  ;;  %v1083_v21 = vsel %vm401_vm0, %v1076_v60, %v1075_v19  ;;  %v4277_v60 = vld [vmem:[%s5350_s9 + $0x20] sm:$0xff] }
 0x332   :  { %v955_v15 = vmax.f32 %v953_v53, %v954_v5  ;;  %1283 = vadd.xlane.f32.xlu1 %v1271_v7  ;;  %1281 = vadd.xlane.f32.xlu0 %v1270_v11  ;;  %v1084_v20 = vsel %vm403_vm1, %v1077_v31, %v1083_v21  ;;  %v1274_v5 = vmul.f32 %v4224_v14, %v3783_v42 }
 0x333   :  { %2348 = vmatpush.bf16.msrb.mxu2 %v4265_v25  ;;  %v1273_v7 = vmul.f32 %v4224_v14, %v3785_v43  ;;  %v1085_v11 = vsel %vm405_vm2, %v1078_v52, %v1084_v20  ;;  %v4301_v52 = vld [vmem:[%s5350_s9 + $0x10] sm:$0xff] }
 0x334   :  { %v956_v33 = vrot.slane %v955_v15, 1 }
 0x335   :  { %v1064_v21 = vpop.xlane.xlu0 %1063 }
 0x336   :  { %v957_v38 = vmax.f32 %v955_v15, %v956_v33  ;;  %v1060_v55 = vpop.xlane.xlu1 %1059  ;;  %v1080_v15 = vperm.slane %v1062_v62, %v3796_v51  ;;  %v1081_v31 = vperm.slane %v1064_v21, %v3796_v51 }
 0x337   :  { %v1079_v53 = vperm.slane %v1060_v55, %v3796_v51  ;;  %2349 = vmatpush.bf16.msrb.mxu2 %v4277_v60  ;;  %v1411_v55 = vmul.f32 %v4224_v14, %v3872_v23 }
 0x338   :  { %v958_v3 = vsub.f32 %v950_v40, %v957_v38  ;;  %v4290_v40 = vld [vmem:[%s5350_s9 + $0x18] sm:$0xff] }
 0x339   :  { %1416 = vadd.xlane.f32.xlu2 %v1408_v41  ;;  %v1086_v13 = vsel %vm407_vm3, %v1079_v53, %v1085_v11  ;;  %v1409_v41 = vmul.f32 %v4224_v14, %v3859_v17 }
 0x33a   :  { %v959_v19 = vmul.f32 1.442695, %v958_v3  ;;  %1289 = vadd.xlane.f32.xlu1 %v1274_v5  ;;  %1287 = vadd.xlane.f32.xlu0 %v1273_v7  ;;  %v1087_v33 = vsel %vm409_vm4, %v1080_v15, %v1086_v13  ;;  %v1410_v3 = vmul.f32 %v4224_v14, %v3851_v8  ;;  %v4318_v13 = vld [vmem:[%s5350_s9 + $0x8] sm:$0xff] }
 0x33b   :  { %2350 = vmatpush.bf16.msrb.mxu2 %v4290_v40  ;;  %v1088_v53 = vsel %vm411_vm5, %v1081_v31, %v1087_v33 }
 0x33c   :  { %3451 = vpow2.f32 %v959_v19 }
 0x33e   :  { %v1066_v38 = vpop.xlane.xlu1 %1065 }
 0x33f   :  { %v1082_v20 = vperm.slane %v1066_v38, %v3796_v51  ;;  %2351 = vmatpush.bf16.msrb.mxu2 %v4301_v52 }
 0x341   :  { %v1089_v62 = vsel %vm413_vm6, %v1082_v20, %v1088_v53  ;;  %1422 = vadd.xlane.f32.xlu2 %v1411_v55  ;;  %v1414_v20 = vmul.f32 %v4224_v14, %v3888_v27  ;;  %v4327_v55 = vld [vmem:[%s5350_s9] sm:$0xff] }
 0x342   :  { %v3452_v5 = vpop.eup %3451  ;;  %v1091_v7 = vsel %vm4046_vm9, %v1089_v62, -1e+30  ;;  %1418 = vadd.xlane.f32.xlu1 %v1409_v41  ;;  %1420 = vadd.xlane.f32.xlu0 %v1410_v3  ;;  %v1412_v41 = vmul.f32 %v4224_v14, %v3841_v0  ;;  %v1413_v3 = vmul.f32 %v4224_v14, %v3861_v18 }
 0x343   :  { %v961_v11 = vsel %vm3814_vm7, %v3452_v5, 0.0  ;;  %v1092_v19 = vsel %vm417_vm8, %v1091_v7, -inf  ;;  %2352 = vmatpush.bf16.msrb.mxu2 %v4318_v13 }
 0x344   :  { %v962_v15 = vsel %vm417_vm8, %v961_v11, 0.0  ;;  %v1093_v21 = vrot.slane %v1092_v19, 4 }
 0x345   :  { %v963_v33 = vrot.slane %v962_v15, 4 }
 0x346   :  { %v1094_v31 = vmax.f32 %v1092_v19, %v1093_v21 }
 0x347   :  { %v964_v38 = vadd.f32 %v963_v33, %v962_v15  ;;  %2353 = vmatpush.bf16.msrb.mxu2 %v4327_v55 }
 0x348   :  { %v1095_v53 = vrot.slane %v1094_v31, 2 }
 0x349   :  { %v965_v62 = vrot.slane %v964_v38, 2  ;;  %1428 = vadd.xlane.f32.xlu2 %v1414_v20 }
 0x34a   :  { %v1096_v5 = vmax.f32 %v1094_v31, %v1095_v53  ;;  %1424 = vadd.xlane.f32.xlu1 %v1412_v41  ;;  %1426 = vadd.xlane.f32.xlu0 %v1413_v3 }
 0x34b   :  { %v966_v19 = vadd.f32 %v965_v62, %v964_v38 }
 0x34c   :  { %v1097_v15 = vrot.slane %v1096_v5, 1 }
 0x34d   :  { %v967_v21 = vrot.slane %v966_v19, 1 }
 0x34e   :  { %v1098_v33 = vmax.f32 %v1096_v5, %v1097_v15 }
 0x34f   :  { %v968_v46 = vadd.f32 %v967_v21, %v966_v19 }
 0x350   :  { %v1099_v22 = vsub.f32 %v1091_v7, %v1098_v33 }
 0x351   :  { %v969_v48 = vadd.f32 1e-20, %v968_v46 }
 0x352   :  { %v1100_v32 = vmul.f32 1.442695, %v1099_v22  ;;  %1430 = vadd.xlane.f32.xlu1 %v1415_v50 }
 0x353   :  { %3453 = vrcp.f32 %v969_v48 }
 0x354   :  { %3455 = vpow2.f32 %v1100_v32 }
 0x359   :  { %v3454_v49 = vpop.eup %3453 }
 0x35a   :  { %v3456_v9 = vpop.eup %3455  ;;  %v971_v20 = vmul.f32 %v3454_v49, %v961_v11 }
 0x35b   :  { %v1102_v31 = vsel %vm4046_vm9, %v3456_v9, 0.0 }
 0x35c   :  { %3259 = vst.msk [vmem:[%s5356_s14 + $0x8] sm:$0xff] %vm417_vm8, %v971_v20  ;;  %v1103_v7 = vsel %vm417_vm8, %v1102_v31, 0.0  ;;  %v972_v38 = vperm.slane %v971_v20, 0  ;;  %v979_v50 = vperm.slane %v971_v20, 1  ;;  %v993_v32 = vperm.slane %v971_v20, 3 }
 0x35d   :  { %v1104_v53 = vrot.slane %v1103_v7, 4  ;;  %v1000_v9 = vperm.slane %v971_v20, 4  ;;  %v986_v3 = vperm.slane %v971_v20, 2  ;;  %v1007_v62 = vperm.slane %v971_v20, 5 }
 0x35e   :  { %977 = vperm.xlu0 %3431, %v972_v38   ;;  %v1021_v5 = vperm.slane %v971_v20, 7  ;;  %v1014_v15 = vperm.slane %v971_v20, 6 }
 0x35f   :  { %v1105_v22 = vadd.f32 %v1104_v53, %v1103_v7 }
 0x361   :  { %v1106_v48 = vrot.slane %v1105_v22, 2  ;;  %984 = vperm.xlu2 %3430, %v979_v50  }
 0x363   :  { %v1107_v46 = vadd.f32 %v1106_v48, %v1105_v22 }
 0x365   :  { %v1108_v49 = vrot.slane %v1107_v46, 1 }
 0x366   :  { %998 = vperm.xlu0 %3431, %v993_v32  }
 0x367   :  { %v1109_v11 = vadd.f32 %v1108_v49, %v1107_v46 }
 0x369   :  { %v1110_v41 = vadd.f32 1e-20, %v1109_v11  ;;  %1005 = vperm.xlu2 %3430, %v1000_v9  }
 0x36b   :  { %3457 = vrcp.f32 %v1110_v41  ;;  %991 = vperm.xlu1 %3432, %v986_v3  }
 0x36e   :  { %1012 = vperm.xlu0 %3431, %v1007_v62  }
 0x371   :  { %v3458_v19 = vpop.eup %3457  ;;  %1026 = vperm.xlu2 %3430, %v1021_v5  }
 0x372   :  { %v1112_v21 = vmul.f32 %v3458_v19, %v1102_v31 }
 0x373   :  { %1019 = vperm.xlu1 %3432, %v1014_v15  }
 0x374   :  { %3260 = vst.msk [vmem:[%s5362_s15 + $0x8] sm:$0xff] %vm417_vm8, %v1112_v21  ;;  %v1120_v33 = vperm.slane %v1112_v21, 1  ;;  %v1113_v7 = vperm.slane %v1112_v21, 0  ;;  %v1127_v38 = vperm.slane %v1112_v21, 2  ;;  %v1134_v53 = vperm.slane %v1112_v21, 3 }
 0x375   :  { %v1141_v48 = vperm.slane %v1112_v21, 4  ;;  %v1155_v20 = vperm.slane %v1112_v21, 6  ;;  %v1148_v31 = vperm.slane %v1112_v21, 5  ;;  %v1162_v49 = vperm.slane %v1112_v21, 7 }
 0x376   :  { %1125 = vperm.xlu0 %3431, %v1120_v33  }
 0x379   :  { %1118 = vperm.xlu2 %3430, %v1113_v7  }
 0x37b   :  { %1132 = vperm.xlu1 %3432, %v1127_v38  }
 0x37d   :  { %v876_v22 = vpop.f32.mrf.mxu1 }
 0x37e   :  { %v877_v50 = vadd.f32 %v876_v22, %v4070_v26  ;;  %1139 = vperm.xlu0 %3431, %v1134_v53   ;;  %v3278_v26 = vld [vmem:[%s5352_s0 + $0x10] sm:$0xff] }
 0x37f   :  { %158 = vmatmul.bf16.gmra.mxu0 %v3278_v26 }
 0x380   :  { %3459 = vtanh.f32 %v877_v50  ;;  %v156_v50 = vpop.f32.mrf.mxu0 }
 0x381   :  { %1146 = vperm.xlu2 %3430, %v1141_v48  }
 0x383   :  { %1160 = vperm.xlu1 %3432, %v1155_v20  }
 0x385   :  { %v878_v46 = vpop.f32.mrf.mxu1 }
 0x386   :  { %v3460_v32 = vpop.eup %3459  ;;  %1153 = vperm.xlu0 %3431, %v1148_v31  }
 0x387   :  { %881 = vst [vmem:[%s5364_s13] sm:$0xff] %v3460_v32 }
 0x389   :  { %1167 = vperm.xlu2 %3430, %v1162_v49  }
 0x39c   :  { %v1280_v11 = vpop.xlane.xlu2 %1279 }
 0x39d   :  { %v1278_v9 = vpop.xlane.xlu1 %1277  ;;  %v1276_v41 = vpop.xlane.xlu0 %1275  ;;  %v1301_v5 = vperm.slane %v1280_v11, %v3796_v51 }
 0x39e   :  { %v1300_v3 = vperm.slane %v1278_v9, %v3796_v51  ;;  %v1299_v62 = vperm.slane %v1276_v41, %v3796_v51  ;;  %v4369_v41 = vld [vmem:[%s5353_s10] ss:$0 sm:$0xff] }
 0x3a0   :  { %v1307_v15 = vsel %vm401_vm0, %v1300_v3, %v1299_v62 }
 0x3a1   :  { %v1308_v53 = vsel %vm403_vm1, %v1301_v5, %v1307_v15 }
 0x3a4   :  { %v1286_v19 = vpop.xlane.xlu2 %1285 }
 0x3a5   :  { %v1284_v33 = vpop.xlane.xlu1 %1283  ;;  %v1282_v21 = vpop.xlane.xlu0 %1281  ;;  %v1304_v46 = vperm.slane %v1286_v19, %v3796_v51 }
 0x3a6   :  { %v1302_v7 = vperm.slane %v1282_v21, %v3796_v51  ;;  %v1303_v38 = vperm.slane %v1284_v33, %v3796_v51 }
 0x3a8   :  { %v1309_v22 = vsel %vm405_vm2, %v1302_v7, %v1308_v53 }
 0x3a9   :  { %v1310_v48 = vsel %vm407_vm3, %v1303_v38, %v1309_v22 }
 0x3aa   :  { %v1311_v62 = vsel %vm409_vm4, %v1304_v46, %v1310_v48 }
 0x3ac   :  { %v1625_v20 = vpop.f32.mrf.mxu2  ;;  %v1417_v31 = vpop.xlane.xlu2 %1416 }
 0x3ad   :  { %v1629_v32 = vadd.f32 %v1625_v20, %v156_v50  ;;  %v1290_v49 = vpop.xlane.xlu1 %1289  ;;  %v1288_v26 = vpop.xlane.xlu0 %1287  ;;  %v1440_v48 = vperm.slane %v1417_v31, %v3796_v51 }
 0x3ae   :  { %v1306_v11 = vperm.slane %v1290_v49, %v3796_v51  ;;  %v1305_v9 = vperm.slane %v1288_v26, %v3796_v51 }
 0x3af   :  { %v1630_v3 = vadd.f32 %v4369_v41, %v1629_v32 }
 0x3b0   :  { %v1312_v5 = vsel %vm411_vm5, %v1305_v9, %v1311_v62 }
 0x3b1   :  { %3461 = vtanh.f32 %v1630_v3  ;;  %v1313_v19 = vsel %vm413_vm6, %v1306_v11, %v1312_v5 }
 0x3b2   :  { %v1315_v15 = vsel %vm3814_vm7, %v1313_v19, -1e+30 }
 0x3b3   :  { %v1316_v33 = vsel %vm417_vm8, %v1315_v15, -inf }
 0x3b4   :  { %v1317_v21 = vrot.slane %v1316_v33, 4  ;;  %v1627_v7 = vpop.f32.mrf.mxu2  ;;  %v1423_v38 = vpop.xlane.xlu2 %1422 }
 0x3b5   :  { %v1419_v53 = vpop.xlane.xlu1 %1418  ;;  %v1421_v22 = vpop.xlane.xlu0 %1420 }
 0x3b6   :  { %v1318_v50 = vmax.f32 %v1316_v33, %v1317_v21  ;;  %v1441_v20 = vperm.slane %v1419_v53, %v3796_v51  ;;  %v1442_v11 = vperm.slane %v1421_v22, %v3796_v51  ;;  %v1443_v53 = vperm.slane %v1423_v38, %v3796_v51 }
 0x3b7   :  { %v4379_v32 = vpop.eup %3461 }
 0x3b8   :  { %5439 = vst [vmem:[#allocation23_spill] sm:$0xff] %v4379_v32  ;;  %v1319_v46 = vrot.slane %v1318_v50, 2  ;;  %v1914_v49 = vpack.c.bf16 %v4379_v32, %v4379_v32  ;;  %v1634_v26 = vmul.f32 %v4379_v32, %v3756_v29  ;;  %v1633_v9 = vmul.f32 %v4379_v32, %v3772_v37 }
 0x3b9   :  { %v1632_v3 = vmul.f32 %v4379_v32, %v3758_v30  ;;  %v1448_v5 = vsel %vm401_vm0, %v1441_v20, %v1440_v48  ;;  %v1635_v38 = vmul.f32 %v4379_v32, %v3770_v36 }
 0x3ba   :  { %v1320_v62 = vmax.f32 %v1318_v50, %v1319_v46  ;;  %1989 = vmatmul.bf16.vlgmr.msra.gmra.mxu2 %v1914_v49  ;;  %1644 = vadd.xlane.f32.xlu2 %v1634_v26  ;;  %v1449_v19 = vsel %vm403_vm1, %v1442_v11, %v1448_v5  ;;  %v1637_v46 = vmul.f32 %v4379_v32, %v3768_v35 }
 0x3bb   :  { %1642 = vadd.xlane.f32.xlu1 %v1633_v9  ;;  %1640 = vadd.xlane.f32.xlu0 %v1632_v3  ;;  %v1450_v20 = vsel %vm405_vm2, %v1443_v53, %v1449_v19  ;;  %v1636_v49 = vmul.f32 %v4379_v32, %v3754_v28 }
 0x3bc   :  { %v1321_v31 = vrot.slane %v1320_v62, 1  ;;  %2711 = vmatpush.bf16.msra.mxu2 %v4244_v44  ;;  %v1429_v22 = vpop.xlane.xlu2 %1428 }
 0x3bd   :  { %v1425_v33 = vpop.xlane.xlu1 %1424  ;;  %v1427_v21 = vpop.xlane.xlu0 %1426 }
 0x3be   :  { %v1322_v7 = vmax.f32 %v1320_v62, %v1321_v31  ;;  %v1444_v14 = vperm.slane %v1425_v33, %v3796_v51  ;;  %v1445_v48 = vperm.slane %v1427_v21, %v3796_v51  ;;  %v1775_v33 = vmul.f32 %v4379_v32, %v3851_v8 }
 0x3bf   :  { %v1639_v21 = vmul.f32 %v4379_v32, %v3783_v42 }
 0x3c0   :  { %v1323_v50 = vsub.f32 %v1315_v15, %v1322_v7  ;;  %2712 = vmatpush.bf16.msra.mxu2 %v4253_v6  ;;  %v1451_v44 = vsel %vm407_vm3, %v1444_v14, %v1450_v20  ;;  %v53_v15 = vld [vmem:[%s5352_s0 + $0x18] sm:$0xf]  ;;  %v1446_v14 = vperm.slane %v1429_v22, %v3796_v51  ;;  %v1638_v7 = vmul.f32 %v4379_v32, %v3785_v43 }
 0x3c1   :  { %v1452_v11 = vsel %vm409_vm4, %v1445_v48, %v1451_v44  ;;  %v83_v6 = vunpack.c.l.b16 %v53_v15 }
 0x3c2   :  { %v1324_v26 = vmul.f32 1.442695, %v1323_v50  ;;  %1650 = vadd.xlane.f32.xlu2 %v1637_v46  ;;  %v1453_v5 = vsel %vm411_vm5, %v1446_v14, %v1452_v11  ;;  %v1774_v14 = vmul.f32 %v4379_v32, %v3859_v17 }
 0x3c3   :  { %1648 = vadd.xlane.f32.xlu1 %v1636_v49  ;;  %1646 = vadd.xlane.f32.xlu0 %v1635_v38  ;;  %v87_v62 = vpack.c.b16 %v83_v6, %v83_v6  ;;  %v1773_v6 = vmul.f32 %v4379_v32, %v3834_v61 }
 0x3c4   :  { %3463 = vpow2.f32 %v1324_v26  ;;  %2713 = vmatpush.bf16.msra.mxu2 %v4265_v25  ;;  %v985_v31 = vpop.permute.xlu2 %984  ;;  %v1778_v26 = vmul.f32 %v4379_v32, %v3861_v18 }
 0x3c5   :  { %v1431_v9 = vpop.xlane.xlu1 %1430  ;;  %163 = vmatmul.bf16.gmra.mxu0 %v87_v62 }
 0x3c6   :  { %v1447_v3 = vperm.slane %v1431_v9, %v3796_v51 }
 0x3c8   :  { %v1454_v19 = vsel %vm413_vm6, %v1447_v3, %v1453_v5  ;;  %2714 = vmatpush.bf16.msra.mxu2 %v4277_v60 }
 0x3c9   :  { %v1456_v25 = vsel %vm4046_vm9, %v1454_v19, -1e+30 }
 0x3ca   :  { %v3464_v53 = vpop.eup %3463  ;;  %v1457_v22 = vsel %vm417_vm8, %v1456_v25, -inf  ;;  %1785 = vadd.xlane.f32.xlu2 %v1775_v33 }
 0x3cb   :  { %v1326_v50 = vsel %vm3814_vm7, %v3464_v53, 0.0  ;;  %v1458_v20 = vrot.slane %v1457_v22, 4  ;;  %1654 = vadd.xlane.f32.xlu1 %v1639_v21  ;;  %1652 = vadd.xlane.f32.xlu0 %v1638_v7  ;;  %v1776_v53 = vmul.f32 %v4379_v32, %v3872_v23 }
 0x3cc   :  { %v1327_v60 = vsel %vm417_vm8, %v1326_v50, 0.0  ;;  %2715 = vmatpush.bf16.msra.mxu2 %v4290_v40  ;;  %v1006_v9 = vpop.permute.xlu2 %1005 }
 0x3cd   :  { %v1328_v48 = vrot.slane %v1327_v60, 4  ;;  %v1459_v46 = vmax.f32 %v1457_v22, %v1458_v20  ;;  %v1777_v22 = vmul.f32 %v4379_v32, %v3841_v0 }
 0x3cf   :  { %v1329_v44 = vadd.f32 %v1328_v48, %v1327_v60  ;;  %v1460_v49 = vrot.slane %v1459_v46, 2 }
 0x3d0   :  { %v978_v38 = vpop.permute.xlu0 %977  ;;  %2716 = vmatpush.bf16.msra.mxu2 %v4301_v52 }
 0x3d1   :  { %v1330_v15 = vrot.slane %v1329_v44, 2  ;;  %v1461_v11 = vmax.f32 %v1459_v46, %v1460_v49  ;;  %v1028_v20 = vmul.f32 %v3959_v56, %v978_v38  ;;  %v1780_v38 = vmul.f32 %v4379_v32, %v3853_v10 }
 0x3d2   :  { %1791 = vadd.xlane.f32.xlu2 %v1778_v26 }
 0x3d3   :  { %v1331_v40 = vadd.f32 %v1330_v15, %v1329_v44  ;;  %v1462_v3 = vrot.slane %v1461_v11, 1  ;;  %1781 = vadd.xlane.f32.xlu1 %v1773_v6  ;;  %1783 = vadd.xlane.f32.xlu0 %v1774_v14  ;;  %v1779_v15 = vmul.f32 %v4379_v32, %v3888_v27 }
 0x3d4   :  { %2717 = vmatpush.bf16.msra.mxu2 %v4318_v13  ;;  %v1029_v13 = vmul.f32 %v3961_v57, %v985_v31  ;;  %v1032_v31 = vmul.f32 %v3977_v16, %v1006_v9 }
 0x3d5   :  { %v1332_v62 = vrot.slane %v1331_v40, 1  ;;  %v1463_v5 = vmax.f32 %v1461_v11, %v1462_v3 }
 0x3d6   :  { %v1036_v48 = vadd.f32 %v1029_v13, %v1028_v20 }
 0x3d7   :  { %v1333_v19 = vadd.f32 %v1332_v62, %v1331_v40  ;;  %v1464_v52 = vsub.f32 %v1456_v25, %v1463_v5  ;;  %v1027_v25 = vpop.permute.xlu2 %1026 }
 0x3d8   :  { %v999_v33 = vpop.permute.xlu0 %998  ;;  %2718 = vmatpush.bf16.msra.mxu2 %v4327_v55 }
 0x3d9   :  { %v1334_v21 = vadd.f32 1e-20, %v1333_v19  ;;  %v1465_v7 = vmul.f32 1.442695, %v1464_v52  ;;  %v1031_v46 = vmul.f32 %v3974_v4, %v999_v33 }
 0x3db   :  { %3465 = vrcp.f32 %v1334_v21  ;;  %1787 = vadd.xlane.f32.xlu1 %v1776_v53  ;;  %1789 = vadd.xlane.f32.xlu0 %v1777_v22 }
 0x3dc   :  { %3467 = vpow2.f32 %v1465_v7  ;;  %v1035_v7 = vmul.f32 %v3996_v2, %v1027_v25 }
 0x3dd   :  { %v992_v60 = vpop.permute.xlu1 %991 }
 0x3de   :  { %v1030_v55 = vmul.f32 %v3966_v59, %v992_v60 }
 0x3df   :  { %v1119_v9 = vpop.permute.xlu2 %1118 }
 0x3e0   :  { %v1037_v44 = vadd.f32 %v1036_v48, %v1030_v55  ;;  %v1013_v49 = vpop.permute.xlu0 %1012 }
 0x3e1   :  { %v3466_v26 = vpop.eup %3465 }
 0x3e2   :  { %v3468_v11 = vpop.eup %3467  ;;  %v4450_v6 = vmul.f32 %v3466_v26, %v1326_v50  ;;  %v1038_v14 = vadd.f32 %v1037_v44, %v1031_v46  ;;  %v1033_v50 = vmul.f32 %v3983_v34, %v1013_v49  ;;  %v1169_v49 = vmul.f32 %v4158_v47, %v1119_v9  ;;  %v4474_v9 = vld [vmem:[%s5358_s11 + $0x38] sm:$0xff] }
 0x3e3   :  { %v1467_v40 = vsel %vm4046_vm9, %v3468_v11, 0.0  ;;  %1793 = vadd.xlane.f32.xlu1 %v1779_v15  ;;  %1795 = vadd.xlane.f32.xlu0 %v1780_v38 }
 0x3e4   :  { %3262 = vst.msk [vmem:[%s5356_s14 + $0x10] sm:$0xff] %vm417_vm8, %v4450_v6  ;;  %v1468_v3 = vsel %vm417_vm8, %v1467_v40, 0.0  ;;  %v1039_v62 = vadd.f32 %v1038_v14, %v1032_v31  ;;  %v1337_v20 = vperm.slane %v4450_v6, 0 }
 0x3e5   :  { %v1469_v5 = vrot.slane %v1468_v3, 4  ;;  %v1020_v19 = vpop.permute.xlu1 %1019 }
 0x3e6   :  { %v1040_v52 = vadd.f32 %v1039_v62, %v1033_v50  ;;  %v1034_v33 = vmul.f32 %v3992_v54, %v1020_v19  ;;  %v1358_v62 = vperm.slane %v4450_v6, 3 }
 0x3e7   :  { %v1470_v21 = vadd.f32 %v1469_v5, %v1468_v3  ;;  %v1147_v14 = vpop.permute.xlu2 %1146 }
 0x3e8   :  { %v1041_v53 = vadd.f32 %v1040_v52, %v1034_v33  ;;  %v1126_v22 = vpop.permute.xlu0 %1125  ;;  %v4480_v33 = vld [vmem:[%s5358_s11 + $0x78] sm:$0xff] }
 0x3e9   :  { %v1471_v13 = vrot.slane %v1470_v21, 2  ;;  %v1170_v55 = vmul.f32 %v4160_v24, %v1126_v22  ;;  %v4488_v22 = vld [vmem:[%s5358_s11 + $0x30] sm:$0xff] }
 0x3ea   :  { %v1042_v60 = vadd.f32 %v1041_v53, %v1035_v7  ;;  %1342 = vperm.xlu2 %3430, %v1337_v20   ;;  %v1344_v7 = vperm.slane %v4450_v6, 1  ;;  %v1173_v53 = vmul.f32 %v4183_v1, %v1147_v14  ;;  %v4506_v14 = vld [vmem:[%s5358_s11 + $0x28] sm:$0xff] }
 0x3eb   :  { %v1472_v48 = vadd.f32 %v1471_v13, %v1470_v21  ;;  %v1177_v31 = vadd.f32 %v1170_v55, %v1169_v49 }
 0x3ec   :  { %v3391_v46 = vpack.c.bf16 %v1042_v60, %v4073_v39  ;;  %v1372_v60 = vperm.slane %v4450_v6, 5 }
 0x3ed   :  { %v1473_v44 = vrot.slane %v1472_v48, 1  ;;  %v1133_v26 = vpop.permute.xlu1 %1132 }
 0x3ee   :  { %v1171_v15 = vmul.f32 %v4173_v58, %v1133_v26  ;;  %v1194_v38 = vunpack.c.l.b16 %v3391_v46  ;;  %v1195_v25 = vunpack.c.h.b16 %v3391_v46 }
 0x3ef   :  { %v1474_v11 = vadd.f32 %v1473_v44, %v1472_v48  ;;  %v4495_v48 = vld [vmem:[%s5358_s11 + $0x70] sm:$0xff]  ;;  %v5440_v44 = vld [vmem:[#allocation19_spill] sm:$0xff] }
 0x3f0   :  { %v1140_v3 = vpop.permute.xlu0 %1139  ;;  %v1197_v50 = vpack.c.b16 %v1194_v38, %v1194_v38  ;;  %v1198_v5 = vpack.c.b16 %v1195_v25, %v1195_v25  ;;  %v1178_v52 = vadd.f32 %v1177_v31, %v1171_v15  ;;  %v1168_v15 = vpop.permute.xlu2 %1167  ;;  %v1351_v38 = vperm.slane %v4450_v6, 2  ;;  %v5441_v25 = vld [vmem:[#allocation20_spill] sm:$0xff] }
 0x3f1   :  { %v1475_v19 = vadd.f32 1e-20, %v1474_v11  ;;  %v1172_v39 = vmul.f32 %v4176_v63, %v1140_v3  ;;  %v5442_v3 = vld [vmem:[#allocation21_spill] sm:$0xff] }
 0x3f2   :  { %1363 = vperm.xlu2 %3430, %v1358_v62   ;;  %1211 = vmatmul.bf16.vlgmr.msrb.gmra.mxu3 %v1197_v50  ;;  %v1176_v62 = vmul.f32 %v5442_v3, %v1168_v15 }
 0x3f3   :  { %3469 = vrcp.f32 %v1475_v19  ;;  %1224 = vmatmul.bf16.vlgmr.msrb.gmra.mxu0 %v1198_v5  ;;  %1933 = vmatpush.bf16.msrb.mxu3 %v4474_v9  ;;  %v1179_v21 = vadd.f32 %v1178_v52, %v1172_v39  ;;  %v1365_v5 = vperm.slane %v4450_v6, 4  ;;  %v4525_v52 = vld [vmem:[%s5358_s11 + $0x20] sm:$0xff] }
 0x3f4   :  { %1946 = vmatpush.bf16.msrb.mxu0 %v4480_v33 }
 0x3f5   :  { %v1161_v20 = vpop.permute.xlu1 %1160  ;;  %v1180_v46 = vadd.f32 %v1179_v21, %v1173_v53  ;;  %v4532_v21 = vld [vmem:[%s5358_s11 + $0x60] sm:$0xff]  ;;  %v1379_v53 = vperm.slane %v4450_v6, 6 }
 0x3f6   :  { %v1175_v11 = vmul.f32 %v5441_v25, %v1161_v20  ;;  %v4539_v20 = vld [vmem:[%s5358_s11 + $0x18] sm:$0xff] }
 0x3f7   :  { %1349 = vperm.xlu0 %3431, %v1344_v7   ;;  %1934 = vmatpush.bf16.msrb.mxu3 %v4488_v22 }
 0x3f8   :  { %v1154_v13 = vpop.permute.xlu0 %1153  ;;  %1947 = vmatpush.bf16.msrb.mxu0 %v4495_v48 }
 0x3f9   :  { %v3470_v55 = vpop.eup %3469  ;;  %v1174_v49 = vmul.f32 %v5440_v44, %v1154_v13  ;;  %v4545_v13 = vld [vmem:[%s5358_s11 + $0x58] sm:$0xff] }
 0x3fa   :  { %v4499_v26 = vmul.f32 %v3470_v55, %v1467_v40  ;;  %1377 = vperm.xlu2 %3430, %v1372_v60   ;;  %v4517_v40 = vld [vmem:[%s5358_s11 + $0x68] sm:$0xff]  ;;  %5443 = vst [vmem:[#allocation19_spill] sm:$0xff] %v4545_v13  ;;  %v1386_v60 = vperm.slane %v4450_v6, 7  ;;  %v4552_v55 = vld [vmem:[%s5358_s11 + $0x10] sm:$0xff] }
 0x3fb   :  { %v1181_v31 = vadd.f32 %v1180_v46, %v1174_v49  ;;  %1935 = vmatpush.bf16.msrb.mxu3 %v4506_v14  ;;  %5444 = vst [vmem:[#allocation20_spill] sm:$0xff] %v4552_v55  ;;  %v4559_v49 = vld [vmem:[%s5358_s11 + $0x50] sm:$0xff] }
 0x3fc   :  { %3263 = vst.msk [vmem:[%s5362_s15 + $0x10] sm:$0xff] %vm417_vm8, %v4499_v26  ;;  %1356 = vperm.xlu1 %3432, %v1351_v38   ;;  %1948 = vmatpush.bf16.msrb.mxu0 %v4517_v40  ;;  %v1485_v39 = vperm.slane %v4499_v26, 1  ;;  %v1506_v46 = vperm.slane %v4499_v26, 4  ;;  %v1492_v6 = vperm.slane %v4499_v26, 2 }
 0x3fd   :  { %v1182_v50 = vadd.f32 %v1181_v31, %v1175_v11  ;;  %5445 = vst [vmem:[#allocation21_spill] sm:$0xff] %v4559_v49  ;;  %v4566_v11 = vld [vmem:[%s5358_s11 + $0x8] sm:$0xff] }
 0x3fe   :  { %5446 = vst [vmem:[#allocation24_spill] sm:$0xff] %v4566_v11  ;;  %v4572_v31 = vld [vmem:[%s5358_s11 + $0x48] sm:$0xff] }
 0x3ff   :  { %v1183_v19 = vadd.f32 %v1182_v50, %v1176_v62  ;;  %1370 = vperm.xlu0 %3431, %v1365_v5   ;;  %1936 = vmatpush.bf16.msrb.mxu3 %v4525_v52  ;;  %5447 = vst [vmem:[#allocation25_spill] sm:$0xff] %v4572_v31  ;;  %v1478_v50 = vperm.slane %v4499_v26, 0  ;;  %v1527_v5 = vperm.slane %v4499_v26, 7 }
 0x400   :  { %1949 = vmatpush.bf16.msrb.mxu0 %v4532_v21 }
 0x401   :  { %v1188_v7 = vpack.c.bf16 %v1183_v19, %v1183_v19  ;;  %v4580_v19 = vld [vmem:[%s5358_s11 + $0xb8] sm:$0xff] }
 0x402   :  { %1490 = vperm.xlu2 %3430, %v1485_v39   ;;  %5448 = vst [vmem:[#allocation26_spill] sm:$0xff] %v4580_v19  ;;  %v4586_v39 = vld [vmem:[%s5358_s11] sm:$0xff] }
 0x403   :  { %1189 = vst [vmem:[#allocation3 + $0x8] sm:$0xf] %v1188_v7  ;;  %1937 = vmatpush.bf16.msrb.mxu3 %v4539_v20  ;;  %v4592_v7 = vld [vmem:[%s5358_s11 + $0x40] sm:$0xff] }
 0x404   :  { %1384 = vperm.xlu1 %3432, %v1379_v53   ;;  %1950 = vmatpush.bf16.msrb.mxu0 %v4545_v13  ;;  %5449 = vst [vmem:[#allocation27_spill] sm:$0xff] %v4586_v39  ;;  %v1520_v53 = vperm.slane %v4499_v26, 6 }
 0x405   :  { %5450 = vst [vmem:[#allocation28_spill] sm:$0xff] %v4592_v7 }
 0x407   :  { %1391 = vperm.xlu0 %3431, %v1386_v60   ;;  %1938 = vmatpush.bf16.msrb.mxu3 %v4552_v55  ;;  %v4599_v60 = vld [vmem:[%s5358_s11 + $0xb0] sm:$0xff] }
 0x408   :  { %1951 = vmatpush.bf16.msrb.mxu0 %v4559_v49  ;;  %5451 = vst [vmem:[#allocation29_spill] sm:$0xff] %v4599_v60 }
 0x40a   :  { %1511 = vperm.xlu2 %3430, %v1506_v46   ;;  %v1191_v15 = vld [vmem:[#allocation3 + $0x8] sm:$0xf]  ;;  %v1499_v46 = vperm.slane %v4499_v26, 3 }
 0x40b   :  { %v1196_v38 = vunpack.c.l.b16 %v1191_v15  ;;  %1939 = vmatpush.bf16.msrb.mxu3 %v4566_v11  ;;  %v5453_v15 = vld [vmem:[#allocation15_spill] sm:$0xff] }
 0x40c   :  { %1497 = vperm.xlu1 %3432, %v1492_v6   ;;  %1952 = vmatpush.bf16.msrb.mxu0 %v4572_v31  ;;  %v4606_v6 = vld [vmem:[%s5358_s11 + $0xa8] sm:$0xff] }
 0x40d   :  { %v1199_v62 = vpack.c.b16 %v1196_v38, %v1196_v38  ;;  %5452 = vst [vmem:[#allocation30_spill] sm:$0xff] %v4606_v6  ;;  %v1513_v38 = vperm.slane %v4499_v26, 5 }
 0x40f   :  { %1237 = vmatmul.bf16.vlgmr.msra.gmra.mxu1 %v1199_v62  ;;  %1483 = vperm.xlu0 %3431, %v1478_v50   ;;  %v4614_v62 = vld [vmem:[%s5358_s11 + $0x98] sm:$0xff]  ;;  %v5455_v50 = vld [vmem:[#allocation16_spill] sm:$0xff] }
 0x410   :  { %1959 = vmatpush.bf16.msra.mxu1 %v4580_v19  ;;  %1940 = vmatpush.bf16.msrb.mxu3 %v4586_v39  ;;  %5454 = vst [vmem:[#allocation15_spill] sm:$0xff] %v4614_v62 }
 0x411   :  { %1953 = vmatpush.bf16.msrb.mxu0 %v4592_v7 }
 0x412   :  { %1532 = vperm.xlu2 %3430, %v1527_v5   ;;  %v5456_v5 = vld [vmem:[#allocation17_spill] sm:$0xff] }
 0x414   :  { %1525 = vperm.xlu1 %3432, %v1520_v53   ;;  %1960 = vmatpush.bf16.msra.mxu1 %v4599_v60  ;;  %v5457_v53 = vld [vmem:[#allocation18_spill] sm:$0xff]  ;;  %v159_v60 = vpop.f32.mrf.mxu0 }
 0x417   :  { %1504 = vperm.xlu0 %3431, %v1499_v46  }
 0x418   :  { %1961 = vmatpush.bf16.msra.mxu1 %v4606_v6 }
 0x41c   :  { %1962 = vmatpush.bf16.msra.mxu1 %v5453_v15 }
 0x41f   :  { %1518 = vperm.xlu0 %3431, %v1513_v38  }
 0x420   :  { %1963 = vmatpush.bf16.msra.mxu1 %v4614_v62 }
 0x424   :  { %1964 = vmatpush.bf16.msra.mxu1 %v5455_v50 }
 0x428   :  { %1965 = vmatpush.bf16.msra.mxu1 %v5456_v5 }
 0x42c   :  { %1966 = vmatpush.bf16.msra.mxu1 %v5457_v53 }
 0x42d   :  { %v1645_v6 = vpop.xlane.xlu2 %1644 }
 0x42e   :  { %v1643_v46 = vpop.xlane.xlu1 %1642  ;;  %v1641_v32 = vpop.xlane.xlu0 %1640  ;;  %v1666_v38 = vperm.slane %v1645_v6, %v3796_v51 }
 0x42f   :  { %v1665_v15 = vperm.slane %v1643_v46, %v3796_v51  ;;  %v1664_v26 = vperm.slane %v1641_v32, %v3796_v51 }
 0x431   :  { %v1672_v19 = vsel %vm401_vm0, %v1665_v15, %v1664_v26 }
 0x432   :  { %v1673_v53 = vsel %vm403_vm1, %v1666_v38, %v1672_v19 }
 0x435   :  { %v1651_v31 = vpop.xlane.xlu2 %1650 }
 0x436   :  { %v1649_v7 = vpop.xlane.xlu1 %1648  ;;  %v1647_v62 = vpop.xlane.xlu0 %1646  ;;  %v1669_v32 = vperm.slane %v1651_v31, %v3796_v51 }
 0x437   :  { %v1667_v50 = vperm.slane %v1647_v62, %v3796_v51  ;;  %v1668_v5 = vperm.slane %v1649_v7, %v3796_v51  ;;  %v4632_v62 = vpop.f32.mrf.mxu0 }
 0x438   :  { %5458 = vst [vmem:[#allocation16_spill] sm:$0xff] %v4632_v62 }
 0x439   :  { %v1674_v39 = vsel %vm405_vm2, %v1667_v50, %v1673_v53 }
 0x43a   :  { %v1675_v46 = vsel %vm407_vm3, %v1668_v5, %v1674_v39 }
 0x43b   :  { %v1676_v19 = vsel %vm409_vm4, %v1669_v32, %v1675_v46 }
 0x43d   :  { %v1990_v11 = vpop.f32.mrf.mxu2  ;;  %v1786_v46 = vpop.xlane.xlu2 %1785 }
 0x43e   :  { %v1994_v6 = vadd.f32 %v1990_v11, %v159_v60  ;;  %v1655_v49 = vpop.xlane.xlu1 %1654  ;;  %v1653_v55 = vpop.xlane.xlu0 %1652 }
 0x43f   :  { %v1671_v15 = vperm.slane %v1655_v49, %v3796_v51  ;;  %v1670_v26 = vperm.slane %v1653_v55, %v3796_v51 }
 0x440   :  { %v1995_v7 = vadd.f32 %v4369_v41, %v1994_v6 }
 0x441   :  { %v1677_v38 = vsel %vm411_vm5, %v1670_v26, %v1676_v19 }
 0x442   :  { %3471 = vtanh.f32 %v1995_v7  ;;  %v1678_v39 = vsel %vm413_vm6, %v1671_v15, %v1677_v38  ;;  %v4641_v53 = vpop.f32.mrf.mxu0 }
 0x443   :  { %v1680_v11 = vsel %vm3814_vm7, %v1678_v39, -1e+30  ;;  %5459 = vst [vmem:[#allocation17_spill] sm:$0xff] %v4641_v53 }
 0x444   :  { %v1681_v31 = vsel %vm417_vm8, %v1680_v11, -inf }
 0x445   :  { %v1682_v60 = vrot.slane %v1681_v31, 4  ;;  %v1992_v49 = vpop.f32.mrf.mxu2 }
 0x446   :  { %v1782_v50 = vpop.xlane.xlu1 %1781  ;;  %v1784_v55 = vpop.xlane.xlu0 %1783 }
 0x447   :  { %v1683_v5 = vmax.f32 %v1681_v31, %v1682_v60  ;;  %v1805_v26 = vperm.slane %v1782_v50, %v3796_v51  ;;  %v1806_v7 = vperm.slane %v1784_v55, %v3796_v51  ;;  %v1807_v50 = vperm.slane %v1786_v46, %v3796_v51 }
 0x448   :  { %v4643_v41 = vpop.eup %3471 }
 0x449   :  { %5460 = vst [vmem:[#allocation18_spill] sm:$0xff] %v4643_v41  ;;  %v1684_v32 = vrot.slane %v1683_v5, 2  ;;  %v2279_v6 = vpack.c.bf16 %v4643_v41, %v4643_v41  ;;  %v1999_v15 = vmul.f32 %v4643_v41, %v3756_v29  ;;  %v1998_v19 = vmul.f32 %v4643_v41, %v3772_v37 }
 0x44a   :  { %v1997_v38 = vmul.f32 %v4643_v41, %v3758_v30  ;;  %v1813_v60 = vsel %vm401_vm0, %v1806_v7, %v1805_v26  ;;  %v166_v62 = vpop.f32.mrf.mxu0  ;;  %v2000_v46 = vmul.f32 %v4643_v41, %v3770_v36  ;;  %v1792_v7 = vpop.xlane.xlu2 %1791 }
 0x44b   :  { %v1685_v39 = vmax.f32 %v1683_v5, %v1684_v32  ;;  %2354 = vmatmul.bf16.vlgmr.msrb.gmra.mxu2 %v2279_v6  ;;  %2009 = vadd.xlane.f32.xlu0 %v1999_v15  ;;  %v1814_v13 = vsel %vm403_vm1, %v1807_v50, %v1813_v60  ;;  %v2002_v32 = vmul.f32 %v4643_v41, %v3768_v35 }
 0x44c   :  { %2007 = vadd.xlane.f32.xlu2 %v1998_v19  ;;  %2005 = vadd.xlane.f32.xlu1 %v1997_v38  ;;  %v2001_v15 = vmul.f32 %v4643_v41, %v3754_v28  ;;  %v1810_v62 = vperm.slane %v1792_v7, %v3796_v51  ;;  %v2004_v60 = vmul.f32 %v4643_v41, %v3783_v42 }
 0x44d   :  { %v1686_v31 = vrot.slane %v1685_v39, 1 }
 0x44e   :  { %v1788_v49 = vpop.xlane.xlu1 %1787  ;;  %v1790_v53 = vpop.xlane.xlu0 %1789 }
 0x44f   :  { %v1687_v29 = vmax.f32 %v1685_v39, %v1686_v31  ;;  %v1808_v55 = vperm.slane %v1788_v49, %v3796_v51  ;;  %v1809_v5 = vperm.slane %v1790_v53, %v3796_v51  ;;  %v2003_v49 = vmul.f32 %v4643_v41, %v3785_v43 }
 0x451   :  { %v1688_v37 = vsub.f32 %v1680_v11, %v1687_v29  ;;  %v1815_v6 = vsel %vm405_vm2, %v1808_v55, %v1814_v13 }
 0x452   :  { %v1816_v29 = vsel %vm407_vm3, %v1809_v5, %v1815_v6 }
 0x453   :  { %v1689_v26 = vmul.f32 1.442695, %v1688_v37  ;;  %2015 = vadd.xlane.f32.xlu0 %v2002_v32  ;;  %v1817_v38 = vsel %vm409_vm4, %v1810_v62, %v1816_v29  ;;  %v2140_v37 = vmul.f32 %v4643_v41, %v3851_v8  ;;  %v2142_v8 = vmul.f32 %v4643_v41, %v3841_v0 }
 0x454   :  { %2013 = vadd.xlane.f32.xlu2 %v2001_v15  ;;  %2011 = vadd.xlane.f32.xlu1 %v2000_v46 }
 0x455   :  { %3473 = vpow2.f32 %v1689_v26  ;;  %v1343_v26 = vpop.permute.xlu2 %1342 }
 0x456   :  { %v1794_v11 = vpop.xlane.xlu1 %1793  ;;  %v1796_v53 = vpop.xlane.xlu0 %1795 }
 0x457   :  { %v1811_v13 = vperm.slane %v1794_v11, %v3796_v51  ;;  %v1812_v19 = vperm.slane %v1796_v53, %v3796_v51  ;;  %v2144_v11 = vmul.f32 %v4643_v41, %v3888_v27 }
 0x459   :  { %v1818_v39 = vsel %vm411_vm5, %v1811_v13, %v1817_v38  ;;  %v2138_v13 = vmul.f32 %v4643_v41, %v3834_v61 }
 0x45a   :  { %v1819_v31 = vsel %vm413_vm6, %v1812_v19, %v1818_v39  ;;  %v2139_v19 = vmul.f32 %v4643_v41, %v3859_v17 }
 0x45b   :  { %v3474_v50 = vpop.eup %3473  ;;  %v1821_v55 = vsel %vm4046_vm9, %v1819_v31, -1e+30  ;;  %2150 = vadd.xlane.f32.xlu0 %v2140_v37 }
 0x45c   :  { %v1691_v5 = vsel %vm3814_vm7, %v3474_v50, 0.0  ;;  %v1822_v32 = vsel %vm417_vm8, %v1821_v55, -inf  ;;  %2019 = vadd.xlane.f32.xlu2 %v2004_v60  ;;  %2017 = vadd.xlane.f32.xlu1 %v2003_v49 }
 0x45d   :  { %v1692_v6 = vsel %vm417_vm8, %v1691_v5, 0.0  ;;  %v1823_v15 = vrot.slane %v1822_v32, 4  ;;  %v1364_v50 = vpop.permute.xlu2 %1363 }
 0x45e   :  { %v1693_v46 = vrot.slane %v1692_v6, 4 }
 0x45f   :  { %v1824_v7 = vmax.f32 %v1822_v32, %v1823_v15 }
 0x460   :  { %v1694_v29 = vadd.f32 %v1693_v46, %v1692_v6  ;;  %v2141_v46 = vmul.f32 %v4643_v41, %v3872_v23 }
 0x461   :  { %v1825_v62 = vrot.slane %v1824_v7, 2 }
 0x462   :  { %v1695_v53 = vrot.slane %v1694_v29, 2 }
 0x463   :  { %v1826_v38 = vmax.f32 %v1824_v7, %v1825_v62  ;;  %2158 = vadd.xlane.f32.xlu0 %v2144_v11 }
 0x464   :  { %v1696_v39 = vadd.f32 %v1695_v53, %v1694_v29  ;;  %2146 = vadd.xlane.f32.xlu2 %v2138_v13  ;;  %2148 = vadd.xlane.f32.xlu1 %v2139_v19  ;;  %v1393_v29 = vmul.f32 %v3959_v56, %v1343_v26  ;;  %v1396_v13 = vmul.f32 %v3974_v4, %v1364_v50 }
 0x465   :  { %v1827_v37 = vrot.slane %v1826_v38, 1 }
 0x466   :  { %v1697_v31 = vrot.slane %v1696_v39, 1 }
 0x467   :  { %v1828_v60 = vmax.f32 %v1826_v38, %v1827_v37  ;;  %v1378_v37 = vpop.permute.xlu2 %1377 }
 0x468   :  { %v1698_v49 = vadd.f32 %v1697_v31, %v1696_v39 }
 0x469   :  { %v1829_v32 = vsub.f32 %v1821_v55, %v1828_v60  ;;  %v1350_v6 = vpop.permute.xlu0 %1349 }
 0x46a   :  { %v1699_v15 = vadd.f32 1e-20, %v1698_v49  ;;  %v1394_v7 = vmul.f32 %v3961_v57, %v1350_v6  ;;  %v1398_v6 = vmul.f32 %v3983_v34, %v1378_v37 }
 0x46b   :  { %v1830_v61 = vmul.f32 1.442695, %v1829_v32 }
 0x46c   :  { %3475 = vrcp.f32 %v1699_v15  ;;  %2152 = vadd.xlane.f32.xlu2 %v2141_v46  ;;  %2154 = vadd.xlane.f32.xlu1 %v2142_v8  ;;  %v1401_v11 = vadd.f32 %v1394_v7, %v1393_v29  ;;  %v2143_v8 = vmul.f32 %v4643_v41, %v3861_v18 }
 0x46d   :  { %3477 = vpow2.f32 %v1830_v61  ;;  %v2145_v61 = vmul.f32 %v4643_v41, %v3853_v10  ;;  %v5461_v41 = vld [vmem:[#allocation22_spill] sm:$0xff] }
 0x46e   :  { %v1357_v62 = vpop.permute.xlu1 %1356 }
 0x46f   :  { %v1395_v55 = vmul.f32 %v3966_v59, %v1357_v62  ;;  %v1491_v34 = vpop.permute.xlu2 %1490 }
 0x470   :  { %v4699_v53 = vpop.f32.mrf.mxu0 }
 0x471   :  { %v1402_v19 = vadd.f32 %v1401_v11, %v1395_v55  ;;  %v1371_v38 = vpop.permute.xlu0 %1370 }
 0x472   :  { %v3476_v39 = vpop.eup %3475  ;;  %v1397_v31 = vmul.f32 %v3977_v16, %v1371_v38 }
 0x473   :  { %v3478_v26 = vpop.eup %3477  ;;  %v4707_v60 = vmul.f32 %v3476_v39, %v1691_v5  ;;  %v1403_v49 = vadd.f32 %v1402_v19, %v1396_v13 }
 0x474   :  { %v1832_v32 = vsel %vm4046_vm9, %v3478_v26, 0.0  ;;  %2156 = vadd.xlane.f32.xlu2 %v2143_v8  ;;  %2160 = vadd.xlane.f32.xlu1 %v2145_v61 }
 0x475   :  { %3265 = vst.msk [vmem:[%s5356_s14 + $0x18] sm:$0xff] %vm417_vm8, %v4707_v60  ;;  %v1833_v50 = vsel %vm417_vm8, %v1832_v32, 0.0  ;;  %v1404_v15 = vadd.f32 %v1403_v49, %v1397_v31  ;;  %v1709_v5 = vperm.slane %v4707_v60, 1  ;;  %v1212_v46 = vpop.f32.mrf.mxu3  ;;  %v1723_v37 = vperm.slane %v4707_v60, 3 }
 0x476   :  { %v1834_v7 = vrot.slane %v1833_v50, 4  ;;  %v1385_v29 = vpop.permute.xlu1 %1384 }
 0x477   :  { %v1399_v62 = vmul.f32 %v3992_v54, %v1385_v29  ;;  %v1405_v11 = vadd.f32 %v1404_v15, %v1398_v6  ;;  %1714 = vperm.xlu0 %3431, %v1709_v5  }
 0x478   :  { %v1835_v55 = vadd.f32 %v1834_v7, %v1833_v50  ;;  %v1227_v13 = vpop.f32.mrf.mxu0 }
 0x479   :  { %v1406_v19 = vadd.f32 %v1405_v11, %v1399_v62  ;;  %v1392_v38 = vpop.permute.xlu0 %1391 }
 0x47a   :  { %v1836_v39 = vrot.slane %v1835_v55, 2  ;;  %v1400_v8 = vmul.f32 %v3996_v2, %v1392_v38 }
 0x47c   :  { %v1837_v61 = vadd.f32 %v1836_v39, %v1835_v55  ;;  %v1407_v26 = vadd.f32 %v1406_v19, %v1400_v8  ;;  %v1744_v55 = vperm.slane %v4707_v60, 6  ;;  %v1512_v39 = vpop.permute.xlu2 %1511 }
 0x47d   :  { %v1214_v31 = vpop.f32.mrf.mxu3 }
 0x47e   :  { %v1838_v49 = vrot.slane %v1837_v61, 1  ;;  %v3396_v10 = vpack.c.bf16 %v1407_v26, %v5461_v41  ;;  %v1535_v41 = vmul.f32 %v4160_v24, %v1491_v34  ;;  %v1498_v19 = vpop.permute.xlu1 %1497 }
 0x47f   :  { %1728 = vperm.xlu0 %3431, %v1723_v37   ;;  %v1716_v37 = vperm.slane %v4707_v60, 2 }
 0x480   :  { %v1839_v29 = vadd.f32 %v1838_v49, %v1837_v61  ;;  %v1559_v6 = vunpack.c.l.b16 %v3396_v10  ;;  %v1560_v15 = vunpack.c.h.b16 %v3396_v10  ;;  %v4731_v10 = vld [vmem:[%s5361_s12] ss:$0 sm:$0xff]  ;;  %v1702_v61 = vperm.slane %v4707_v60, 0 }
 0x481   :  { %v1484_v50 = vpop.permute.xlu0 %1483  ;;  %v1213_v13 = vadd.f32 %v4731_v10, %v1212_v46 }
 0x482   :  { %v1840_v5 = vadd.f32 1e-20, %v1839_v29  ;;  %v1562_v7 = vpack.c.b16 %v1559_v6, %v1559_v6  ;;  %v1563_v62 = vpack.c.b16 %v1560_v15, %v1560_v15  ;;  %v1534_v11 = vmul.f32 %v4158_v47, %v1484_v50 }
 0x483   :  { %v1226_v46 = vadd.f32 %v4699_v53, %v1213_v13  ;;  %v1538_v53 = vmul.f32 %v4183_v1, %v1512_v39  ;;  %v5462_v13 = vld [vmem:[#allocation19_spill] sm:$0xff] }
 0x484   :  { %3479 = vrcp.f32 %v1840_v5  ;;  %1576 = vmatmul.bf16.vlgmr.msra.gmra.mxu3 %v1562_v7  ;;  %1589 = vmatmul.bf16.vlgmr.msra.gmra.mxu0 %v1563_v62  ;;  %v1542_v38 = vadd.f32 %v1535_v41, %v1534_v11  ;;  %v1730_v5 = vperm.slane %v4707_v60, 4  ;;  %v1533_v7 = vpop.permute.xlu2 %1532 }
 0x485   :  { %2298 = vmatpush.bf16.msra.mxu3 %v4474_v9  ;;  %2311 = vmatpush.bf16.msra.mxu0 %v4480_v33  ;;  %v1536_v33 = vmul.f32 %v4173_v58, %v1498_v19 }
 0x486   :  { %v1526_v29 = vpop.permute.xlu1 %1525 }
 0x487   :  { %1749 = vperm.xlu0 %3431, %v1744_v55   ;;  %v1543_v31 = vadd.f32 %v1542_v38, %v1536_v33  ;;  %v5463_v38 = vld [vmem:[#allocation20_spill] sm:$0xff] }
 0x489   :  { %v1505_v8 = vpop.permute.xlu0 %1504  ;;  %2299 = vmatpush.bf16.msra.mxu3 %v4488_v22  ;;  %2312 = vmatpush.bf16.msra.mxu0 %v4495_v48 }
 0x48a   :  { %v3480_v9 = vpop.eup %3479  ;;  %v1537_v34 = vmul.f32 %v4176_v63, %v1505_v8  ;;  %v1751_v8 = vperm.slane %v4707_v60, 7 }
 0x48b   :  { %v4739_v26 = vmul.f32 %v3480_v9, %v1832_v32  ;;  %v5464_v9 = vld [vmem:[#allocation21_spill] sm:$0xff] }
 0x48c   :  { %v1238_v49 = vpop.f32.mrf.mxu1  ;;  %1707 = vperm.xlu2 %3430, %v1702_v61   ;;  %v1544_v32 = vadd.f32 %v1543_v31, %v1537_v34  ;;  %v5465_v34 = vld [vmem:[#allocation24_spill] sm:$0xff]  ;;  %v5466_v61 = vld [vmem:[#allocation25_spill] sm:$0xff] }
 0x48d   :  { %3266 = vst.msk [vmem:[%s5362_s15 + $0x18] sm:$0xff] %vm417_vm8, %v4739_v26  ;;  %v1239_v22 = vadd.f32 %v1238_v49, %v1226_v46  ;;  %1721 = vperm.xlu1 %3432, %v1716_v37   ;;  %v1857_v48 = vperm.slane %v4739_v26, 2  ;;  %2300 = vmatpush.bf16.msra.mxu3 %v4506_v14  ;;  %v1737_v14 = vperm.slane %v4707_v60, 5  ;;  %v1871_v41 = vperm.slane %v4739_v26, 4  ;;  %v5467_v46 = vld [vmem:[#allocation27_spill] sm:$0xff]  ;;  %v5468_v31 = vld [vmem:[#allocation28_spill] sm:$0xff] }
 0x48e   :  { %2313 = vmatpush.bf16.msra.mxu0 %v4517_v40  ;;  %v1545_v15 = vadd.f32 %v1544_v32, %v1538_v53  ;;  %v1540_v40 = vmul.f32 %v5441_v25, %v1526_v29  ;;  %v1892_v33 = vperm.slane %v4739_v26, 7  ;;  %v1843_v37 = vperm.slane %v4739_v26, 0  ;;  %v5469_v32 = vld [vmem:[#allocation26_spill] sm:$0xff]  ;;  %v5470_v29 = vld [vmem:[#allocation29_spill] sm:$0xff] }
 0x48f   :  { %3481 = vtanh.f32 %v1239_v22  ;;  %1862 = vperm.xlu0 %3431, %v1857_v48   ;;  %v1878_v60 = vperm.slane %v4739_v26, 5  ;;  %v1864_v53 = vperm.slane %v4739_v26, 3 }
 0x491   :  { %v1519_v6 = vpop.permute.xlu0 %1518  ;;  %2301 = vmatpush.bf16.msra.mxu3 %v4525_v52  ;;  %v1541_v52 = vmul.f32 %v5442_v3, %v1533_v7  ;;  %v4791_v7 = vld [vmem:[%s5358_s11 + $0x90] sm:$0xff] }
 0x492   :  { %v1539_v50 = vmul.f32 %v5440_v44, %v1519_v6  ;;  %2314 = vmatpush.bf16.msra.mxu0 %v4532_v21  ;;  %v5471_v6 = vld [vmem:[#allocation30_spill] sm:$0xff] }
 0x494   :  { %v1546_v62 = vadd.f32 %v1545_v15, %v1539_v50  ;;  %v1240_v11 = vpop.f32.mrf.mxu1  ;;  %1735 = vperm.xlu2 %3430, %v1730_v5   ;;  %v1885_v15 = vperm.slane %v4739_v26, 6  ;;  %v4784_v50 = vld [vmem:[%s5358_s11 + $0xa0] sm:$0xff] }
 0x495   :  { %v3482_v55 = vpop.eup %3481  ;;  %1742 = vperm.xlu1 %3432, %v1737_v14   ;;  %2302 = vmatpush.bf16.msra.mxu3 %v4539_v20  ;;  %v1850_v20 = vperm.slane %v4739_v26, 1  ;;  %v5472_v5 = vld [vmem:[#allocation15_spill] sm:$0xff] }
 0x496   :  { %3258 = vst [vmem:[%s5364_s13 + $0x8] sm:$0xff] %v3482_v55  ;;  %v1547_v21 = vadd.f32 %v1546_v62, %v1540_v40  ;;  %2315 = vmatpush.bf16.msra.mxu0 %v5462_v13  ;;  %v4797_v26 = vld [vmem:[%s5358_s11 + $0x88] sm:$0xff] }
 0x497   :  { %1876 = vperm.xlu0 %3431, %v1871_v41   ;;  %v4805_v41 = vld [vmem:[%s5358_s11 + $0x80] sm:$0xff] }
 0x498   :  { %v1548_v19 = vadd.f32 %v1547_v21, %v1541_v52 }
 0x499   :  { %2303 = vmatpush.bf16.msra.mxu3 %v5463_v38 }
 0x49a   :  { %v1553_v39 = vpack.c.bf16 %v1548_v19, %v1548_v19  ;;  %2316 = vmatpush.bf16.msra.mxu0 %v5464_v9 }
 0x49c   :  { %1554 = vst [vmem:[#allocation3 + $0x8] sm:$0xf] %v1553_v39  ;;  %1756 = vperm.xlu2 %3430, %v1751_v8  }
 0x49d   :  { %1855 = vperm.xlu1 %3432, %v1850_v20   ;;  %2304 = vmatpush.bf16.msra.mxu3 %v5465_v34 }
 0x49e   :  { %2317 = vmatpush.bf16.msra.mxu0 %v5466_v61 }
 0x49f   :  { %1897 = vperm.xlu0 %3431, %v1892_v33  }
 0x4a1   :  { %2305 = vmatpush.bf16.msra.mxu3 %v5467_v46  ;;  %v5473_v46 = vld [vmem:[#allocation16_spill] sm:$0xff] }
 0x4a2   :  { %2318 = vmatpush.bf16.msra.mxu0 %v5468_v31 }
 0x4a3   :  { %v1556_v49 = vld [vmem:[#allocation3 + $0x8] sm:$0xf] }
 0x4a4   :  { %1848 = vperm.xlu2 %3430, %v1843_v37   ;;  %v1561_v22 = vunpack.c.l.b16 %v1556_v49 }
 0x4a5   :  { %1883 = vperm.xlu1 %3432, %v1878_v60  }
 0x4a6   :  { %v1564_v48 = vpack.c.b16 %v1561_v22, %v1561_v22 }
 0x4a8   :  { %1602 = vmatmul.bf16.vlgmr.msrb.gmra.mxu1 %v1564_v48  ;;  %v4822_v48 = vld [vmem:[%s5353_s10] ss:$0 sm:$0xff] }
 0x4a9   :  { %2324 = vmatpush.bf16.msrb.mxu1 %v5469_v32 }
 0x4ac   :  { %1869 = vperm.xlu2 %3430, %v1864_v53  }
 0x4ad   :  { %2325 = vmatpush.bf16.msrb.mxu1 %v5470_v29 }
 0x4b1   :  { %2326 = vmatpush.bf16.msrb.mxu1 %v5471_v6 }
 0x4b4   :  { %1890 = vperm.xlu2 %3430, %v1885_v15  }
 0x4b5   :  { %2327 = vmatpush.bf16.msrb.mxu1 %v4784_v50 }
 0x4b9   :  { %2328 = vmatpush.bf16.msrb.mxu1 %v5472_v5 }
 0x4bd   :  { %2329 = vmatpush.bf16.msrb.mxu1 %v4791_v7 }
 0x4be   :  { %v2010_v62 = vpop.xlane.xlu0 %2009 }
 0x4bf   :  { %v2008_v14 = vpop.xlane.xlu2 %2007  ;;  %v2006_v40 = vpop.xlane.xlu1 %2005  ;;  %v2031_v52 = vperm.slane %v2010_v62, %v3796_v51 }
 0x4c0   :  { %v2030_v11 = vperm.slane %v2008_v14, %v3796_v51  ;;  %v2029_v55 = vperm.slane %v2006_v40, %v3796_v51 }
 0x4c1   :  { %2330 = vmatpush.bf16.msrb.mxu1 %v4797_v26 }
 0x4c2   :  { %v2037_v21 = vsel %vm401_vm0, %v2030_v11, %v2029_v55 }
 0x4c3   :  { %v2038_v8 = vsel %vm403_vm1, %v2031_v52, %v2037_v21 }
 0x4c5   :  { %2331 = vmatpush.bf16.msrb.mxu1 %v4805_v41 }
 0x4c6   :  { %v2016_v20 = vpop.xlane.xlu0 %2015 }
 0x4c7   :  { %v2014_v13 = vpop.xlane.xlu2 %2013  ;;  %v2012_v19 = vpop.xlane.xlu1 %2011  ;;  %v2034_v61 = vperm.slane %v2016_v20, %v3796_v51 }
 0x4c8   :  { %v2032_v38 = vperm.slane %v2012_v19, %v3796_v51  ;;  %v2033_v39 = vperm.slane %v2014_v13, %v3796_v51 }
 0x4ca   :  { %v2039_v9 = vsel %vm405_vm2, %v2032_v38, %v2038_v8  ;;  %v5475_v38 = vld [vmem:[#allocation4_spill] sm:$0xff]  ;;  %v5476_v8 = vld [vmem:[#allocation5_spill] sm:$0xff] }
 0x4cb   :  { %v2040_v33 = vsel %vm407_vm3, %v2033_v39, %v2039_v9 }
 0x4cc   :  { %v2041_v53 = vsel %vm409_vm4, %v2034_v61, %v2040_v33 }
 0x4ce   :  { %v2355_v34 = vpop.f32.mrf.mxu2  ;;  %v2151_v14 = vpop.xlane.xlu0 %2150 }
 0x4cf   :  { %v2359_v37 = vadd.f32 %v2355_v34, %v5473_v46  ;;  %v2020_v31 = vpop.xlane.xlu2 %2019  ;;  %v2018_v60 = vpop.xlane.xlu1 %2017 }
 0x4d0   :  { %v2036_v49 = vperm.slane %v2020_v31, %v3796_v51  ;;  %v2035_v22 = vperm.slane %v2018_v60, %v3796_v51 }
 0x4d1   :  { %v2360_v32 = vadd.f32 %v4822_v48, %v2359_v37 }
 0x4d2   :  { %v2042_v29 = vsel %vm411_vm5, %v2035_v22, %v2041_v53 }
 0x4d3   :  { %3483 = vtanh.f32 %v2360_v32  ;;  %v2043_v6 = vsel %vm413_vm6, %v2036_v49, %v2042_v29  ;;  %v2172_v29 = vperm.slane %v2151_v14, %v3796_v51 }
 0x4d4   :  { %v2045_v15 = vsel %vm3814_vm7, %v2043_v6, -1e+30 }
 0x4d5   :  { %v2046_v5 = vsel %vm417_vm8, %v2045_v15, -inf }
 0x4d6   :  { %v2047_v40 = vrot.slane %v2046_v5, 4  ;;  %v2357_v62 = vpop.f32.mrf.mxu2  ;;  %v2159_v49 = vpop.xlane.xlu0 %2158 }
 0x4d7   :  { %v2147_v11 = vpop.xlane.xlu2 %2146  ;;  %v2149_v55 = vpop.xlane.xlu1 %2148 }
 0x4d8   :  { %v2048_v52 = vmax.f32 %v2046_v5, %v2047_v40  ;;  %v2170_v61 = vperm.slane %v2147_v11, %v3796_v51  ;;  %v2171_v46 = vperm.slane %v2149_v55, %v3796_v51 }
 0x4d9   :  { %v4831_v21 = vpop.eup %3483 }
 0x4da   :  { %5474 = vst [vmem:[#allocation22_spill] sm:$0xff] %v4831_v21  ;;  %v2049_v13 = vrot.slane %v2048_v52, 2  ;;  %v2644_v19 = vpack.c.bf16 %v4831_v21, %v4831_v21  ;;  %v2364_v39 = vmul.f32 %v4831_v21, %v5475_v38  ;;  %v2363_v9 = vmul.f32 %v4831_v21, %v5476_v8 }
 0x4db   :  { %v2362_v20 = vmul.f32 %v4831_v21, %v3758_v30  ;;  %v2178_v32 = vsel %vm401_vm0, %v2171_v46, %v2170_v61  ;;  %v2367_v6 = vmul.f32 %v4831_v21, %v3768_v35  ;;  %v2366_v5 = vmul.f32 %v4831_v21, %v3754_v28 }
 0x4dc   :  { %v2050_v33 = vmax.f32 %v2048_v52, %v2049_v13  ;;  %2719 = vmatmul.bf16.vlgmr.msra.gmra.mxu2 %v2644_v19  ;;  %2372 = vadd.xlane.f32.xlu0 %v2363_v9  ;;  %v2365_v62 = vmul.f32 %v4831_v21, %v3770_v36  ;;  %v2179_v11 = vsel %vm403_vm1, %v2172_v29, %v2178_v32 }
 0x4dd   :  { %2374 = vadd.xlane.f32.xlu2 %v2364_v39  ;;  %2370 = vadd.xlane.f32.xlu1 %v2362_v20  ;;  %v2176_v19 = vperm.slane %v2159_v49, %v3796_v51  ;;  %v2509_v61 = vmul.f32 %v4831_v21, %v3888_v27  ;;  %v2369_v46 = vmul.f32 %v4831_v21, %v3783_v42  ;;  %v5480_v27 = vld [vmem:[#allocation8_spill] sm:$0xff] }
 0x4de   :  { %v2051_v34 = vrot.slane %v2050_v33, 1 }
 0x4df   :  { %v2153_v37 = vpop.xlane.xlu2 %2152  ;;  %v2155_v31 = vpop.xlane.xlu1 %2154 }
 0x4e0   :  { %v2052_v60 = vmax.f32 %v2050_v33, %v2051_v34  ;;  %v2173_v53 = vperm.slane %v2153_v37, %v3796_v51 }
 0x4e2   :  { %v2053_v22 = vsub.f32 %v2045_v15, %v2052_v60  ;;  %v2174_v15 = vperm.slane %v2155_v31, %v3796_v51  ;;  %v2180_v55 = vsel %vm405_vm2, %v2173_v53, %v2179_v11  ;;  %v2368_v60 = vmul.f32 %v4831_v21, %v3785_v43 }
 0x4e4   :  { %v2054_v40 = vmul.f32 1.442695, %v2053_v22  ;;  %2378 = vadd.xlane.f32.xlu0 %v2366_v5  ;;  %v2181_v39 = vsel %vm407_vm3, %v2174_v15, %v2180_v55 }
 0x4e5   :  { %2380 = vadd.xlane.f32.xlu2 %v2367_v6  ;;  %2376 = vadd.xlane.f32.xlu1 %v2365_v62 }
 0x4e6   :  { %3485 = vpow2.f32 %v2054_v40 }
 0x4e7   :  { %v2157_v14 = vpop.xlane.xlu2 %2156  ;;  %v2161_v52 = vpop.xlane.xlu1 %2160 }
 0x4e8   :  { %v2175_v13 = vperm.slane %v2157_v14, %v3796_v51  ;;  %v2177_v33 = vperm.slane %v2161_v52, %v3796_v51  ;;  %v2504_v14 = vmul.f32 %v4831_v21, %v3859_v17  ;;  %v5477_v52 = vld [vmem:[#allocation6_spill] sm:$0xff] }
 0x4e9   :  { %v1715_v9 = vpop.permute.xlu0 %1714 }
 0x4ea   :  { %v2182_v20 = vsel %vm409_vm4, %v2175_v13, %v2181_v39  ;;  %v2503_v13 = vmul.f32 %v4831_v21, %v5477_v52 }
 0x4eb   :  { %v2183_v34 = vsel %vm411_vm5, %v2176_v19, %v2182_v20 }
 0x4ec   :  { %v3486_v37 = vpop.eup %3485  ;;  %v2184_v31 = vsel %vm413_vm6, %v2177_v33, %v2183_v34  ;;  %2384 = vadd.xlane.f32.xlu0 %v2369_v46 }
 0x4ed   :  { %v2056_v49 = vsel %vm3814_vm7, %v3486_v37, 0.0  ;;  %v2186_v22 = vsel %vm4046_vm9, %v2184_v31, -1e+30  ;;  %2523 = vadd.xlane.f32.xlu2 %v2509_v61  ;;  %2382 = vadd.xlane.f32.xlu1 %v2368_v60 }
 0x4ee   :  { %v2057_v32 = vsel %vm417_vm8, %v2056_v49, 0.0  ;;  %v2187_v53 = vsel %vm417_vm8, %v2186_v22, -inf }
 0x4ef   :  { %v2058_v29 = vrot.slane %v2057_v32, 4  ;;  %v2188_v6 = vrot.slane %v2187_v53, 4  ;;  %v1708_v5 = vpop.permute.xlu2 %1707 }
 0x4f1   :  { %v2059_v40 = vadd.f32 %v2058_v29, %v2057_v32  ;;  %v2189_v62 = vmax.f32 %v2187_v53, %v2188_v6  ;;  %v1729_v11 = vpop.permute.xlu0 %1728  ;;  %v2506_v32 = vmul.f32 %v4831_v21, %v3872_v23  ;;  %v1758_v53 = vmul.f32 %v3959_v56, %v1708_v5  ;;  %v5478_v29 = vld [vmem:[#allocation7_spill] sm:$0xff] }
 0x4f2   :  { %v2505_v6 = vmul.f32 %v4831_v21, %v5478_v29 }
 0x4f3   :  { %v2060_v15 = vrot.slane %v2059_v40, 2  ;;  %v2190_v55 = vrot.slane %v2189_v62, 2 }
 0x4f4   :  { %2513 = vadd.xlane.f32.xlu0 %v2504_v14 }
 0x4f5   :  { %v2061_v19 = vadd.f32 %v2060_v15, %v2059_v40  ;;  %v2191_v39 = vmax.f32 %v2189_v62, %v2190_v55  ;;  %2511 = vadd.xlane.f32.xlu1 %v2503_v13  ;;  %v1759_v62 = vmul.f32 %v3961_v57, %v1715_v9 }
 0x4f7   :  { %v2062_v20 = vrot.slane %v2061_v19, 1  ;;  %v2192_v33 = vrot.slane %v2191_v39, 1  ;;  %v1736_v34 = vpop.permute.xlu2 %1735  ;;  %v1766_v14 = vadd.f32 %v1759_v62, %v1758_v53 }
 0x4f9   :  { %v2063_v61 = vadd.f32 %v2062_v20, %v2061_v19  ;;  %v2193_v46 = vmax.f32 %v2191_v39, %v2192_v33  ;;  %v1750_v37 = vpop.permute.xlu0 %1749  ;;  %v1761_v19 = vmul.f32 %v3974_v4, %v1729_v11  ;;  %v2508_v20 = vmul.f32 %v4831_v21, %v3861_v18 }
 0x4fb   :  { %v2064_v31 = vadd.f32 1e-20, %v2063_v61  ;;  %v2194_v60 = vsub.f32 %v2186_v22, %v2193_v46  ;;  %v2507_v46 = vmul.f32 %v4831_v21, %v3841_v0 }
 0x4fc   :  { %2517 = vadd.xlane.f32.xlu0 %v2506_v32 }
 0x4fd   :  { %3487 = vrcp.f32 %v2064_v31  ;;  %v2195_v40 = vmul.f32 1.442695, %v2194_v60  ;;  %2515 = vadd.xlane.f32.xlu1 %v2505_v6 }
 0x4ff   :  { %3489 = vpow2.f32 %v2195_v40  ;;  %v1757_v15 = vpop.permute.xlu2 %1756  ;;  %v1722_v55 = vpop.permute.xlu1 %1721 }
 0x500   :  { %v1760_v22 = vmul.f32 %v3966_v59, %v1722_v55  ;;  %v5479_v55 = vld [vmem:[#allocation13_spill] sm:$0xff] }
 0x501   :  { %v4885_v13 = vpop.f32.mrf.mxu0  ;;  %v1863_v9 = vpop.permute.xlu0 %1862 }
 0x502   :  { %v1767_v5 = vadd.f32 %v1766_v14, %v1760_v22 }
 0x503   :  { %v3488_v39 = vpop.eup %3487 }
 0x504   :  { %v4890_v33 = vmul.f32 %v3488_v39, %v2056_v49  ;;  %v1768_v61 = vadd.f32 %v1767_v5, %v1761_v19  ;;  %2521 = vadd.xlane.f32.xlu0 %v2508_v20  ;;  %v1762_v49 = vmul.f32 %v3977_v16, %v1736_v34  ;;  %v1764_v39 = vmul.f32 %v3992_v54, %v1750_v37  ;;  %v5481_v37 = vld [vmem:[#allocation23_spill] sm:$0xff] }
 0x505   :  { %v3490_v31 = vpop.eup %3489  ;;  %2519 = vadd.xlane.f32.xlu1 %v2507_v46  ;;  %v1765_v46 = vmul.f32 %v3996_v2, %v1757_v15  ;;  %v2510_v16 = vmul.f32 %v4831_v21, %v5480_v27 }
 0x506   :  { %3268 = vst.msk [vmem:[%s5356_s14 + $0x20] sm:$0xff] %vm417_vm8, %v4890_v33  ;;  %v4901_v11 = vsel %vm4046_vm9, %v3490_v31, 0.0  ;;  %v2081_v60 = vperm.slane %v4890_v33, 2  ;;  %v1769_v62 = vadd.f32 %v1768_v61, %v1762_v49  ;;  %v2102_v49 = vperm.slane %v4890_v33, 5 }
 0x507   :  { %v2198_v32 = vsel %vm417_vm8, %v4901_v11, 0.0  ;;  %v1849_v53 = vpop.permute.xlu2 %1848  ;;  %v1743_v6 = vpop.permute.xlu1 %1742 }
 0x508   :  { %v2199_v40 = vrot.slane %v2198_v32, 4  ;;  %v1763_v14 = vmul.f32 %v5479_v55, %v1743_v6  ;;  %2086 = vperm.xlu2 %3430, %v2081_v60   ;;  %v4908_v22 = vpop.f32.mrf.mxu3 }
 0x509   :  { %v1592_v19 = vpop.f32.mrf.mxu0  ;;  %v1877_v61 = vpop.permute.xlu0 %1876 }
 0x50a   :  { %v2200_v5 = vadd.f32 %v2199_v40, %v2198_v32  ;;  %v1770_v34 = vadd.f32 %v1769_v62, %v1763_v14  ;;  %v1899_v32 = vmul.f32 %v4158_v47, %v1849_v53  ;;  %v1903_v53 = vmul.f32 %v4183_v1, %v1877_v61  ;;  %v4932_v61 = vld [vmem:[%s5358_s11 + $0x78] sm:$0xff] }
 0x50c   :  { %v2201_v20 = vrot.slane %v2200_v5, 2  ;;  %v1771_v31 = vadd.f32 %v1770_v34, %v1764_v39  ;;  %v1901_v39 = vmul.f32 %v4173_v58, %v1863_v9  ;;  %v4925_v9 = vld [vmem:[%s5358_s11 + $0x38] sm:$0xff] }
 0x50d   :  { %2525 = vadd.xlane.f32.xlu1 %v2510_v16 }
 0x50e   :  { %v2202_v4 = vadd.f32 %v2201_v20, %v2200_v5  ;;  %v1772_v59 = vadd.f32 %v1771_v31, %v1765_v46 }
 0x50f   :  { %v1870_v60 = vpop.permute.xlu2 %1869  ;;  %v1856_v6 = vpop.permute.xlu1 %1855 }
 0x510   :  { %v2203_v19 = vrot.slane %v2202_v4, 1  ;;  %v3401_v40 = vpack.c.bf16 %v1772_v59, %v5481_v37  ;;  %v1900_v62 = vmul.f32 %v4160_v24, %v1856_v6  ;;  %2107 = vperm.xlu2 %3430, %v2102_v49   ;;  %v1579_v15 = vpop.f32.mrf.mxu3  ;;  %v1902_v46 = vmul.f32 %v4176_v63, %v1870_v60  ;;  %v4939_v37 = vld [vmem:[%s5358_s11 + $0x30] sm:$0xff] }
 0x512   :  { %v2204_v14 = vadd.f32 %v2203_v19, %v2202_v4  ;;  %v1907_v5 = vadd.f32 %v1900_v62, %v1899_v32  ;;  %v1924_v34 = vunpack.c.l.b16 %v3401_v40  ;;  %v1925_v20 = vunpack.c.h.b16 %v3401_v40 }
 0x513   :  { %v2067_v4 = vperm.slane %v4890_v33, 0 }
 0x514   :  { %v2205_v16 = vadd.f32 1e-20, %v2204_v14  ;;  %v1908_v31 = vadd.f32 %v1907_v5, %v1901_v39  ;;  %v1927_v21 = vpack.c.b16 %v1924_v34, %v1924_v34  ;;  %v1928_v2 = vpack.c.b16 %v1925_v20, %v1925_v20  ;;  %v4946_v14 = vld [vmem:[%s5358_s11 + $0x70] sm:$0xff] }
 0x515   :  { %v2088_v20 = vperm.slane %v4890_v33, 3 }
 0x516   :  { %3491 = vrcp.f32 %v2205_v16  ;;  %v1909_v59 = vadd.f32 %v1908_v31, %v1902_v46  ;;  %1941 = vmatmul.bf16.vlgmr.msrb.gmra.mxu3 %v1927_v21  ;;  %1954 = vmatmul.bf16.vlgmr.msrb.gmra.mxu0 %v1928_v2  ;;  %v1898_v21 = vpop.permute.xlu0 %1897  ;;  %v4962_v16 = vld [vmem:[%s5358_s11 + $0x28] sm:$0xff] }
 0x517   :  { %v1891_v6 = vpop.permute.xlu2 %1890  ;;  %v1884_v49 = vpop.permute.xlu1 %1883  ;;  %2663 = vmatpush.bf16.msrb.mxu3 %v4925_v9  ;;  %2676 = vmatpush.bf16.msrb.mxu0 %v4932_v61  ;;  %v1906_v62 = vmul.f32 %v5442_v3, %v1898_v21  ;;  %v4970_v31 = vld [vmem:[%s5358_s11 + $0x68] sm:$0xff]  ;;  %v4998_v21 = vld [vmem:[%s5358_s11 + $0x58] sm:$0xff] }
 0x518   :  { %v1910_v60 = vadd.f32 %v1909_v59, %v1903_v53  ;;  %v1904_v19 = vmul.f32 %v5440_v44, %v1884_v49  ;;  %2072 = vperm.xlu0 %3431, %v2067_v4   ;;  %v1905_v2 = vmul.f32 %v5441_v25, %v1891_v6  ;;  %v4976_v53 = vld [vmem:[%s5358_s11 + $0x20] sm:$0xff]  ;;  %v2074_v49 = vperm.slane %v4890_v33, 1 }
 0x519   :  { %v4983_v59 = vld [vmem:[%s5358_s11 + $0x60] sm:$0xff] }
 0x51a   :  { %v1911_v32 = vadd.f32 %v1910_v60, %v1904_v19  ;;  %v2095_v19 = vperm.slane %v4890_v33, 4 }
 0x51b   :  { %2664 = vmatpush.bf16.msrb.mxu3 %v4939_v37  ;;  %2677 = vmatpush.bf16.msrb.mxu0 %v4946_v14 }
 0x51c   :  { %v3492_v40 = vpop.eup %3491  ;;  %v1912_v15 = vadd.f32 %v1911_v32, %v1905_v2 }
 0x51d   :  { %v4950_v39 = vmul.f32 %v3492_v40, %v4901_v11  ;;  %v1578_v11 = vadd.f32 %v4731_v10, %v4908_v22  ;;  %v5004_v40 = vld [vmem:[%s5358_s11 + $0x10] sm:$0xff] }
 0x51e   :  { %v1913_v5 = vadd.f32 %v1912_v15, %v1906_v62  ;;  %v5010_v15 = vld [vmem:[%s5358_s11 + $0x50] sm:$0xff] }
 0x51f   :  { %3269 = vst.msk [vmem:[%s5362_s15 + $0x20] sm:$0xff] %vm417_vm8, %v4950_v39  ;;  %v2208_v34 = vperm.slane %v4950_v39, 0  ;;  %2665 = vmatpush.bf16.msrb.mxu3 %v4962_v16  ;;  %2678 = vmatpush.bf16.msrb.mxu0 %v4970_v31  ;;  %v1591_v22 = vadd.f32 %v4885_v13, %v1578_v11  ;;  %v2236_v60 = vperm.slane %v4950_v39, 4  ;;  %v4992_v13 = vld [vmem:[%s5358_s11 + $0x18] sm:$0xff]  ;;  %v2257_v11 = vperm.slane %v4950_v39, 7 }
 0x520   :  { %v1918_v46 = vpack.c.bf16 %v1913_v5, %v1913_v5  ;;  %2093 = vperm.xlu0 %3431, %v2088_v20  }
 0x521   :  { %2213 = vperm.xlu2 %3430, %v2208_v34   ;;  %v2109_v34 = vperm.slane %v4890_v33, 6 }
 0x522   :  { %1919 = vst [vmem:[#allocation3 + $0x8] sm:$0xf] %v1918_v46  ;;  %v2116_v46 = vperm.slane %v4890_v33, 7  ;;  %v5040_v33 = vld [vmem:[%s5358_s11 + $0xb0] sm:$0xff] }
 0x523   :  { %2666 = vmatpush.bf16.msrb.mxu3 %v4976_v53  ;;  %2679 = vmatpush.bf16.msrb.mxu0 %v4983_v59  ;;  %5483 = vst [vmem:[#allocation20_spill] sm:$0xff] %v5040_v33 }
 0x525   :  { %v1603_v6 = vpop.f32.mrf.mxu1 }
 0x526   :  { %v1604_v4 = vadd.f32 %v1603_v6, %v1591_v22  ;;  %2079 = vperm.xlu1 %3432, %v2074_v49   ;;  %v5022_v22 = vld [vmem:[%s5358_s11 + $0xb8] sm:$0xff]  ;;  %v5028_v6 = vld [vmem:[%s5358_s11 + $0x8] sm:$0xff] }
 0x527   :  { %2667 = vmatpush.bf16.msrb.mxu3 %v4992_v13  ;;  %2680 = vmatpush.bf16.msrb.mxu0 %v4998_v21  ;;  %5482 = vst [vmem:[#allocation19_spill] sm:$0xff] %v5022_v22  ;;  %v5034_v49 = vld [vmem:[%s5358_s11 + $0x48] sm:$0xff] }
 0x528   :  { %3493 = vtanh.f32 %v1604_v4  ;;  %2100 = vperm.xlu0 %3431, %v2095_v19   ;;  %v5046_v4 = vld [vmem:[%s5358_s11] sm:$0xff]  ;;  %v2222_v19 = vperm.slane %v4950_v39, 2 }
 0x529   :  { %2241 = vperm.xlu2 %3430, %v2236_v60   ;;  %v1921_v2 = vld [vmem:[#allocation3 + $0x8] sm:$0xf]  ;;  %v5052_v60 = vld [vmem:[%s5358_s11 + $0x40] sm:$0xff] }
 0x52a   :  { %v1926_v32 = vunpack.c.l.b16 %v1921_v2  ;;  %5484 = vst [vmem:[#allocation21_spill] sm:$0xff] %v5052_v60  ;;  %v2215_v2 = vperm.slane %v4950_v39, 1 }
 0x52b   :  { %2668 = vmatpush.bf16.msrb.mxu3 %v5004_v40  ;;  %2681 = vmatpush.bf16.msrb.mxu0 %v5010_v15 }
 0x52c   :  { %v1929_v62 = vpack.c.b16 %v1926_v32, %v1926_v32  ;;  %v5060_v32 = vld [vmem:[%s5358_s11 + $0xa8] sm:$0xff] }
 0x52d   :  { %v1605_v5 = vpop.f32.mrf.mxu1  ;;  %5485 = vst [vmem:[#allocation24_spill] sm:$0xff] %v5060_v32 }
 0x52e   :  { %v3494_v20 = vpop.eup %3493  ;;  %1967 = vmatmul.bf16.vlgmr.msra.gmra.mxu1 %v1929_v62  ;;  %2114 = vperm.xlu1 %3432, %v2109_v34   ;;  %v2243_v62 = vperm.slane %v4950_v39, 5  ;;  %v2229_v5 = vperm.slane %v4950_v39, 3  ;;  %v5069_v34 = vld [vmem:[%s5358_s11 + $0x98] sm:$0xff] }
 0x52f   :  { %3261 = vst [vmem:[%s5364_s13 + $0x10] sm:$0xff] %v3494_v20  ;;  %2689 = vmatpush.bf16.msra.mxu1 %v5022_v22  ;;  %2669 = vmatpush.bf16.msrb.mxu3 %v5028_v6  ;;  %v2250_v20 = vperm.slane %v4950_v39, 6  ;;  %v5487_v22 = vld [vmem:[#allocation17_spill] sm:$0xff] }
 0x530   :  { %2682 = vmatpush.bf16.msrb.mxu0 %v5034_v49  ;;  %2121 = vperm.xlu0 %3431, %v2116_v46   ;;  %5486 = vst [vmem:[#allocation25_spill] sm:$0xff] %v5069_v34 }
 0x531   :  { %2262 = vperm.xlu2 %3430, %v2257_v11  }
 0x533   :  { %2690 = vmatpush.bf16.msra.mxu1 %v5040_v33  ;;  %2670 = vmatpush.bf16.msrb.mxu3 %v5046_v4 }
 0x534   :  { %2683 = vmatpush.bf16.msrb.mxu0 %v5052_v60 }
 0x536   :  { %2227 = vperm.xlu1 %3432, %v2222_v19  }
 0x537   :  { %2691 = vmatpush.bf16.msra.mxu1 %v5060_v32 }
 0x538   :  { %2220 = vperm.xlu0 %3431, %v2215_v2  }
 0x53b   :  { %2692 = vmatpush.bf16.msra.mxu1 %v4784_v50 }
 0x53e   :  { %2248 = vperm.xlu1 %3432, %v2243_v62  }
 0x53f   :  { %2693 = vmatpush.bf16.msra.mxu1 %v5069_v34 }
 0x540   :  { %2234 = vperm.xlu0 %3431, %v2229_v5  }
 0x543   :  { %2694 = vmatpush.bf16.msra.mxu1 %v4791_v7 }
 0x547   :  { %2695 = vmatpush.bf16.msra.mxu1 %v4797_v26 }
 0x548   :  { %2255 = vperm.xlu0 %3431, %v2250_v20  }
 0x54b   :  { %2696 = vmatpush.bf16.msra.mxu1 %v4805_v41 }
 0x54f   :  { %v2373_v50 = vpop.xlane.xlu0 %2372 }
 0x550   :  { %v2371_v11 = vpop.xlane.xlu1 %2370  ;;  %v2375_v46 = vpop.xlane.xlu2 %2374  ;;  %v2395_v19 = vperm.slane %v2373_v50, %v3796_v51 }
 0x551   :  { %v2394_v2 = vperm.slane %v2371_v11, %v3796_v51  ;;  %v2396_v62 = vperm.slane %v2375_v46, %v3796_v51 }
 0x553   :  { %v2402_v5 = vsel %vm401_vm0, %v2395_v19, %v2394_v2 }
 0x554   :  { %v2403_v20 = vsel %vm403_vm1, %v2396_v62, %v2402_v5 }
 0x557   :  { %v2379_v34 = vpop.xlane.xlu0 %2378 }
 0x558   :  { %v2377_v7 = vpop.xlane.xlu1 %2376  ;;  %v2398_v26 = vperm.slane %v2379_v34, %v3796_v51  ;;  %v2381_v32 = vpop.xlane.xlu2 %2380 }
 0x559   :  { %v2397_v39 = vperm.slane %v2377_v7, %v3796_v51  ;;  %v2399_v46 = vperm.slane %v2381_v32, %v3796_v51 }
 0x55b   :  { %v2404_v41 = vsel %vm405_vm2, %v2397_v39, %v2403_v20 }
 0x55c   :  { %v2405_v50 = vsel %vm407_vm3, %v2398_v26, %v2404_v41 }
 0x55d   :  { %v2406_v62 = vsel %vm409_vm4, %v2399_v46, %v2405_v50 }
 0x55f   :  { %v2720_v33 = vpop.f32.mrf.mxu2  ;;  %v2385_v60 = vpop.xlane.xlu0 %2384 }
 0x560   :  { %v2724_v11 = vadd.f32 %v2720_v33, %v5487_v22  ;;  %v2401_v19 = vperm.slane %v2385_v60, %v3796_v51  ;;  %v2383_v2 = vpop.xlane.xlu1 %2382 }
 0x561   :  { %v2400_v34 = vperm.slane %v2383_v2, %v3796_v51 }
 0x562   :  { %v2725_v7 = vadd.f32 %v4822_v48, %v2724_v11 }
 0x563   :  { %v2407_v5 = vsel %vm411_vm5, %v2400_v34, %v2406_v62 }
 0x564   :  { %3495 = vtanh.f32 %v2725_v7  ;;  %v2408_v39 = vsel %vm413_vm6, %v2401_v19, %v2407_v5 }
 0x565   :  { %v2410_v22 = vsel %vm3814_vm7, %v2408_v39, -1e+30 }
 0x566   :  { %v2411_v33 = vsel %vm417_vm8, %v2410_v22, -inf }
 0x567   :  { %v2722_v32 = vpop.f32.mrf.mxu2  ;;  %v2412_v26 = vrot.slane %v2411_v33, 4  ;;  %v2514_v60 = vpop.xlane.xlu0 %2513 }
 0x568   :  { %v2512_v20 = vpop.xlane.xlu1 %2511 }
 0x569   :  { %v2413_v48 = vmax.f32 %v2411_v33, %v2412_v26  ;;  %v2535_v32 = vperm.slane %v2512_v20, %v3796_v51 }
 0x56a   :  { %v5096_v41 = vpop.eup %3495 }
 0x56b   :  { %v2869_v50 = vmul.f32 %v5096_v41, %v3859_v17  ;;  %v2728_v11 = vmul.f32 %v5096_v41, %v5476_v8  ;;  %v2414_v46 = vrot.slane %v2413_v48, 2  ;;  %v2727_v62 = vmul.f32 %v5096_v41, %v3758_v30 }
 0x56c   :  { %v2872_v39 = vmul.f32 %v5096_v41, %v3841_v0  ;;  %v2730_v17 = vmul.f32 %v5096_v41, %v3770_v36  ;;  %v2536_v8 = vperm.slane %v2514_v60, %v3796_v51  ;;  %v2729_v36 = vmul.f32 %v5096_v41, %v5475_v38 }
 0x56d   :  { %2878 = vadd.xlane.f32.xlu2 %v2869_v50  ;;  %2737 = vadd.xlane.f32.xlu1 %v2728_v11  ;;  %v2415_v19 = vmax.f32 %v2413_v48, %v2414_v46  ;;  %v2875_v60 = vmul.f32 %v5096_v41, %v5480_v27  ;;  %v2732_v20 = vmul.f32 %v5096_v41, %v3768_v35 }
 0x56e   :  { %v2543_v30 = vsel %vm401_vm0, %v2536_v8, %v2535_v32 }
 0x56f   :  { %v2416_v2 = vrot.slane %v2415_v19, 1  ;;  %v2518_v7 = vpop.xlane.xlu0 %2517 }
 0x570   :  { %v2516_v34 = vpop.xlane.xlu1 %2515  ;;  %v2538_v50 = vperm.slane %v2518_v7, %v3796_v51 }
 0x571   :  { %v2417_v5 = vmax.f32 %v2415_v19, %v2416_v2  ;;  %v2537_v26 = vperm.slane %v2516_v34, %v3796_v51 }
 0x572   :  { %2735 = vadd.xlane.f32.xlu0 %v2727_v62  ;;  %v2524_v62 = vpop.xlane.xlu2 %2523 }
 0x573   :  { %v2418_v33 = vsub.f32 %v2410_v22, %v2417_v5  ;;  %v2544_v0 = vsel %vm403_vm1, %v2537_v26, %v2543_v30 }
 0x574   :  { %v2545_v2 = vsel %vm405_vm2, %v2538_v50, %v2544_v0 }
 0x575   :  { %2884 = vadd.xlane.f32.xlu2 %v2872_v39  ;;  %2741 = vadd.xlane.f32.xlu1 %v2730_v17  ;;  %v2419_v48 = vmul.f32 1.442695, %v2418_v33  ;;  %v2541_v39 = vperm.slane %v2524_v62, %v3796_v51  ;;  %v2731_v33 = vmul.f32 %v5096_v41, %v3754_v28 }
 0x577   :  { %3497 = vpow2.f32 %v2419_v48  ;;  %v2522_v11 = vpop.xlane.xlu0 %2521  ;;  %v2734_v48 = vmul.f32 %v5096_v41, %v3783_v42  ;;  %v2870_v42 = vmul.f32 %v5096_v41, %v5478_v29 }
 0x578   :  { %v2520_v46 = vpop.xlane.xlu1 %2519  ;;  %v2540_v19 = vperm.slane %v2522_v11, %v3796_v51 }
 0x579   :  { %v2539_v22 = vperm.slane %v2520_v46, %v3796_v51 }
 0x57a   :  { %2739 = vadd.xlane.f32.xlu0 %v2729_v36 }
 0x57b   :  { %v2546_v7 = vsel %vm407_vm3, %v2539_v22, %v2545_v2 }
 0x57c   :  { %v2547_v27 = vsel %vm409_vm4, %v2540_v19, %v2546_v7 }
 0x57d   :  { %2890 = vadd.xlane.f32.xlu2 %v2875_v60  ;;  %2745 = vadd.xlane.f32.xlu1 %v2732_v20  ;;  %v3498_v34 = vpop.eup %3497  ;;  %v2548_v26 = vsel %vm411_vm5, %v2541_v39, %v2547_v27  ;;  %v2733_v60 = vmul.f32 %v5096_v41, %v3785_v43  ;;  %v2868_v27 = vmul.f32 %v5096_v41, %v5477_v52 }
 0x57e   :  { %v2421_v38 = vsel %vm3814_vm7, %v3498_v34, 0.0  ;;  %v2873_v43 = vmul.f32 %v5096_v41, %v3861_v18  ;;  %v2871_v18 = vmul.f32 %v5096_v41, %v3872_v23 }
 0x57f   :  { %v2422_v5 = vsel %vm417_vm8, %v2421_v38, 0.0 }
 0x580   :  { %v2423_v35 = vrot.slane %v2422_v5, 4  ;;  %v2526_v17 = vpop.xlane.xlu1 %2525 }
 0x581   :  { %v2542_v8 = vperm.slane %v2526_v17, %v3796_v51 }
 0x582   :  { %v2424_v32 = vadd.f32 %v2423_v35, %v2422_v5  ;;  %2743 = vadd.xlane.f32.xlu0 %v2731_v33 }
 0x583   :  { %v2549_v30 = vsel %vm413_vm6, %v2542_v8, %v2548_v26  ;;  %v2087_v8 = vpop.permute.xlu2 %2086 }
 0x584   :  { %v2425_v50 = vrot.slane %v2424_v32, 2  ;;  %v2551_v0 = vsel %vm4046_vm9, %v2549_v30, -1e+30 }
 0x585   :  { %2749 = vadd.xlane.f32.xlu1 %v2734_v48  ;;  %v2552_v11 = vsel %vm417_vm8, %v2551_v0, -inf }
 0x586   :  { %v2426_v46 = vadd.f32 %v2425_v50, %v2424_v32  ;;  %v2553_v28 = vrot.slane %v2552_v11, 4 }
 0x588   :  { %v2427_v36 = vrot.slane %v2426_v46, 1  ;;  %v2554_v22 = vmax.f32 %v2552_v11, %v2553_v28 }
 0x58a   :  { %v2428_v20 = vadd.f32 %v2427_v36, %v2426_v46  ;;  %v2555_v19 = vrot.slane %v2554_v22, 2  ;;  %v2073_v2 = vpop.permute.xlu0 %2072  ;;  %2747 = vadd.xlane.f32.xlu0 %v2733_v60  ;;  %v5489_v60 = vld [vmem:[#allocation11_spill] sm:$0xff] }
 0x58b   :  { %v2123_v30 = vmul.f32 %v3959_v56, %v2073_v2 }
 0x58c   :  { %v2429_v7 = vadd.f32 1e-20, %v2428_v20  ;;  %v2556_v34 = vmax.f32 %v2554_v22, %v2555_v19  ;;  %v2108_v19 = vpop.permute.xlu2 %2107 }
 0x58d   :  { %2880 = vadd.xlane.f32.xlu1 %v2870_v42 }
 0x58e   :  { %3499 = vrcp.f32 %v2429_v7  ;;  %v2557_v62 = vrot.slane %v2556_v34, 1  ;;  %v5490_v7 = vld [vmem:[#allocation12_spill] sm:$0xff] }
 0x590   :  { %v2558_v5 = vmax.f32 %v2556_v34, %v2557_v62 }
 0x592   :  { %v2559_v39 = vsub.f32 %v2551_v0, %v2558_v5  ;;  %v2094_v35 = vpop.permute.xlu0 %2093  ;;  %2876 = vadd.xlane.f32.xlu0 %v2868_v27  ;;  %v5488_v0 = vld [vmem:[#allocation10_spill] sm:$0xff] }
 0x593   :  { %v1955_v17 = vpop.f32.mrf.mxu0  ;;  %v2125_v11 = vmul.f32 %v5488_v0, %v2087_v8  ;;  %v2126_v20 = vmul.f32 %v5489_v60, %v2094_v35  ;;  %v2128_v8 = vmul.f32 %v5479_v55, %v2108_v19 }
 0x594   :  { %v3500_v33 = vpop.eup %3499  ;;  %v2560_v32 = vmul.f32 1.442695, %v2559_v39  ;;  %v5491_v39 = vld [vmem:[#allocation9_spill] sm:$0xff] }
 0x595   :  { %2886 = vadd.xlane.f32.xlu1 %v2873_v43  ;;  %v5147_v29 = vmul.f32 %v3500_v33, %v2421_v38  ;;  %v2874_v43 = vmul.f32 %v5096_v41, %v5491_v39 }
 0x596   :  { %3501 = vpow2.f32 %v2560_v32 }
 0x597   :  { %3271 = vst.msk [vmem:[%s5356_s14 + $0x28] sm:$0xff] %vm417_vm8, %v5147_v29  ;;  %v2432_v52 = vperm.slane %v5147_v29, 0  ;;  %v2453_v5 = vperm.slane %v5147_v29, 3  ;;  %v2474_v19 = vperm.slane %v5147_v29, 6 }
 0x598   :  { %v2080_v26 = vpop.permute.xlu1 %2079 }
 0x599   :  { %v1942_v48 = vpop.f32.mrf.mxu3  ;;  %v2124_v50 = vmul.f32 %v3961_v57, %v2080_v26  ;;  %2437 = vperm.xlu2 %3430, %v2432_v52  }
 0x59a   :  { %v2101_v38 = vpop.permute.xlu0 %2100  ;;  %2882 = vadd.xlane.f32.xlu0 %v2871_v18 }
 0x59b   :  { %v2131_v46 = vadd.f32 %v2124_v50, %v2123_v30  ;;  %v1957_v28 = vpop.f32.mrf.mxu0  ;;  %v2127_v34 = vmul.f32 %v5490_v7, %v2101_v38  ;;  %v5492_v50 = vld [vmem:[#allocation14_spill] sm:$0xff] }
 0x59c   :  { %v3502_v36 = vpop.eup %3501  ;;  %v1943_v28 = vadd.f32 %v4731_v10, %v1942_v48 }
 0x59d   :  { %v5162_v22 = vsel %vm4046_vm9, %v3502_v36, 0.0  ;;  %v2132_v23 = vadd.f32 %v2131_v46, %v2125_v11  ;;  %v2214_v36 = vpop.permute.xlu2 %2213 }
 0x59e   :  { %v2563_v2 = vsel %vm417_vm8, %v5162_v22, 0.0 }
 0x59f   :  { %v2564_v42 = vrot.slane %v2563_v2, 4  ;;  %v2133_v62 = vadd.f32 %v2132_v23, %v2126_v20 }
 0x5a0   :  { %v2115_v27 = vpop.permute.xlu1 %2114 }
 0x5a1   :  { %v1944_v33 = vpop.f32.mrf.mxu3  ;;  %v2565_v32 = vadd.f32 %v2564_v42, %v2563_v2  ;;  %v2134_v35 = vadd.f32 %v2133_v62, %v2127_v34  ;;  %2458 = vperm.xlu2 %3430, %v2453_v5   ;;  %v2129_v30 = vmul.f32 %v3992_v54, %v2115_v27  ;;  %v5493_v42 = vld [vmem:[#allocation18_spill] sm:$0xff]  ;;  %v1956_v62 = vadd.f32 %v1955_v17, %v1943_v28 }
 0x5a2   :  { %v2122_v52 = vpop.permute.xlu0 %2121  ;;  %2888 = vadd.xlane.f32.xlu0 %v2874_v43  ;;  %v2439_v27 = vperm.slane %v5147_v29, 1  ;;  %v2481_v17 = vperm.slane %v5147_v29, 7 }
 0x5a3   :  { %v2566_v26 = vrot.slane %v2565_v32, 2  ;;  %v2135_v18 = vadd.f32 %v2134_v35, %v2128_v8  ;;  %v2130_v38 = vmul.f32 %v5492_v50, %v2122_v52  ;;  %v2264_v35 = vmul.f32 %v4158_v47, %v2214_v36 }
 0x5a5   :  { %v2567_v11 = vadd.f32 %v2566_v26, %v2565_v32  ;;  %v2136_v46 = vadd.f32 %v2135_v18, %v2129_v30  ;;  %v2242_v30 = vpop.permute.xlu2 %2241 }
 0x5a7   :  { %v2568_v20 = vrot.slane %v2567_v11, 1  ;;  %v2137_v23 = vadd.f32 %v2136_v46, %v2130_v38 }
 0x5a8   :  { %v2228_v10 = vpop.permute.xlu1 %2227 }
 0x5a9   :  { %v2569_v2 = vadd.f32 %v2568_v20, %v2567_v11  ;;  %v3406_v34 = vpack.c.bf16 %v2137_v23, %v5493_v42  ;;  %2479 = vperm.xlu2 %3430, %v2474_v19   ;;  %v2266_v38 = vmul.f32 %v4173_v58, %v2228_v10  ;;  %v2467_v23 = vperm.slane %v5147_v29, 5 }
 0x5aa   :  { %v2221_v39 = vpop.permute.xlu0 %2220  ;;  %v2446_v42 = vperm.slane %v5147_v29, 2 }
 0x5ab   :  { %v1968_v5 = vpop.f32.mrf.mxu1  ;;  %v2570_v43 = vadd.f32 1e-20, %v2569_v2  ;;  %v2265_v8 = vmul.f32 %v4160_v24, %v2221_v39  ;;  %v2289_v32 = vunpack.c.l.b16 %v3406_v34  ;;  %v2290_v48 = vunpack.c.h.b16 %v3406_v34 }
 0x5ac   :  { %v1969_v33 = vadd.f32 %v1968_v5, %v1956_v62 }
 0x5ad   :  { %3503 = vrcp.f32 %v2570_v43  ;;  %v2292_v52 = vpack.c.b16 %v2289_v32, %v2289_v32  ;;  %v2293_v26 = vpack.c.b16 %v2290_v48, %v2290_v48  ;;  %v2272_v18 = vadd.f32 %v2265_v8, %v2264_v35  ;;  %v2263_v5 = vpop.permute.xlu2 %2262 }
 0x5ae   :  { %2444 = vperm.xlu1 %3432, %v2439_v27   ;;  %3505 = vtanh.f32 %v1969_v33  ;;  %v2460_v33 = vperm.slane %v5147_v29, 4  ;;  %v2271_v8 = vmul.f32 %v5442_v3, %v2263_v5 }
 0x5af   :  { %2306 = vmatmul.bf16.vlgmr.msra.gmra.mxu3 %v2292_v52  ;;  %2319 = vmatmul.bf16.vlgmr.msra.gmra.mxu0 %v2293_v26  ;;  %v2273_v20 = vadd.f32 %v2272_v18, %v2266_v38  ;;  %v5494_v52 = vld [vmem:[#allocation21_spill] sm:$0xff]  ;;  %v5496_v26 = vld [vmem:[#allocation20_spill] sm:$0xff] }
 0x5b0   :  { %3028 = vmatpush.bf16.msra.mxu3 %v4925_v9  ;;  %3041 = vmatpush.bf16.msra.mxu0 %v4932_v61  ;;  %v2268_v9 = vmul.f32 %v4183_v1, %v2242_v30  ;;  %v5498_v18 = vld [vmem:[#allocation25_spill] sm:$0xff] }
 0x5b1   :  { %2486 = vperm.xlu2 %3430, %v2481_v17   ;;  %v3577_v17 = vld [vmem:[%s5358_s11 + $0x90] sm:$0xff] }
 0x5b2   :  { %v2235_v46 = vpop.permute.xlu0 %2234 }
 0x5b3   :  { %v1970_v11 = vpop.f32.mrf.mxu1  ;;  %v3504_v28 = vpop.eup %3503  ;;  %v2267_v36 = vmul.f32 %v4176_v63, %v2235_v46  ;;  %v3579_v46 = vld [vmem:[%s5358_s11 + $0x80] sm:$0xff] }
 0x5b4   :  { %v3506_v19 = vpop.eup %3505  ;;  %v2572_v2 = vmul.f32 %v3504_v28, %v5162_v22  ;;  %3029 = vmatpush.bf16.msra.mxu3 %v4939_v37  ;;  %3042 = vmatpush.bf16.msra.mxu0 %v4946_v14  ;;  %v2249_v22 = vpop.permute.xlu1 %2248  ;;  %v3578_v11 = vld [vmem:[%s5358_s11 + $0x88] sm:$0xff] }
 0x5b5   :  { %3264 = vst [vmem:[%s5364_s13 + $0x18] sm:$0xff] %v3506_v19  ;;  %v2274_v61 = vadd.f32 %v2273_v20, %v2267_v36  ;;  %v2269_v37 = vmul.f32 %v5440_v44, %v2249_v22 }
 0x5b6   :  { %2472 = vperm.xlu1 %3432, %v2467_v23   ;;  %3272 = vst.msk [vmem:[%s5362_s15 + $0x28] sm:$0xff] %vm417_vm8, %v2572_v2  ;;  %2451 = vperm.xlu0 %3431, %v2446_v42   ;;  %v2601_v34 = vperm.slane %v2572_v2, 4  ;;  %v2580_v43 = vperm.slane %v2572_v2, 1  ;;  %v2608_v10 = vperm.slane %v2572_v2, 5  ;;  %v2594_v48 = vperm.slane %v2572_v2, 3 }
 0x5b7   :  { %v2275_v62 = vadd.f32 %v2274_v61, %v2268_v9  ;;  %v2573_v29 = vperm.slane %v2572_v2, 0  ;;  %v2587_v35 = vperm.slane %v2572_v2, 2 }
 0x5b8   :  { %3030 = vmatpush.bf16.msra.mxu3 %v4962_v16  ;;  %3043 = vmatpush.bf16.msra.mxu0 %v4970_v31 }
 0x5b9   :  { %2606 = vperm.xlu2 %3430, %v2601_v34   ;;  %v2276_v27 = vadd.f32 %v2275_v62, %v2269_v37 }
 0x5ba   :  { %v2256_v39 = vpop.permute.xlu0 %2255 }
 0x5bb   :  { %v2270_v14 = vmul.f32 %v5441_v25, %v2256_v39 }
 0x5bc   :  { %3031 = vmatpush.bf16.msra.mxu3 %v4976_v53  ;;  %3044 = vmatpush.bf16.msra.mxu0 %v4983_v59  ;;  %v2615_v59 = vperm.slane %v2572_v2, 6 }
 0x5bd   :  { %v2277_v32 = vadd.f32 %v2276_v27, %v2270_v14 }
 0x5be   :  { %2585 = vperm.xlu1 %3432, %v2580_v43   ;;  %2465 = vperm.xlu0 %3431, %v2460_v33  }
 0x5bf   :  { %v2278_v16 = vadd.f32 %v2277_v32, %v2271_v8 }
 0x5c0   :  { %3032 = vmatpush.bf16.msra.mxu3 %v4992_v13  ;;  %3045 = vmatpush.bf16.msra.mxu0 %v4998_v21 }
 0x5c1   :  { %v2283_v31 = vpack.c.bf16 %v2278_v16, %v2278_v16  ;;  %2613 = vperm.xlu2 %3430, %v2608_v10  }
 0x5c3   :  { %2284 = vst [vmem:[#allocation3 + $0x8] sm:$0xf] %v2283_v31 }
 0x5c4   :  { %3033 = vmatpush.bf16.msra.mxu3 %v5004_v40  ;;  %3046 = vmatpush.bf16.msra.mxu0 %v5010_v15  ;;  %v5495_v40 = vld [vmem:[#allocation19_spill] sm:$0xff]  ;;  %v2622_v15 = vperm.slane %v2572_v2, 7 }
 0x5c6   :  { %2599 = vperm.xlu1 %3432, %v2594_v48   ;;  %2578 = vperm.xlu0 %3431, %v2573_v29  }
 0x5c8   :  { %3034 = vmatpush.bf16.msra.mxu3 %v5028_v6  ;;  %3047 = vmatpush.bf16.msra.mxu0 %v5034_v49  ;;  %v5497_v6 = vld [vmem:[#allocation24_spill] sm:$0xff]  ;;  %v3576_v49 = vld [vmem:[%s5358_s11 + $0xa0] sm:$0xff] }
 0x5ca   :  { %v2286_v53 = vld [vmem:[#allocation3 + $0x8] sm:$0xf] }
 0x5cb   :  { %v2291_v13 = vunpack.c.l.b16 %v2286_v53 }
 0x5cc   :  { %3035 = vmatpush.bf16.msra.mxu3 %v5046_v4  ;;  %3048 = vmatpush.bf16.msra.mxu0 %v5494_v52 }
 0x5cd   :  { %v2294_v21 = vpack.c.b16 %v2291_v13, %v2291_v13 }
 0x5ce   :  { %2620 = vperm.xlu1 %3432, %v2615_v59   ;;  %2592 = vperm.xlu0 %3431, %v2587_v35  }
 0x5cf   :  { %2332 = vmatmul.bf16.vlgmr.msrb.gmra.mxu1 %v2294_v21 }
 0x5d0   :  { %3054 = vmatpush.bf16.msrb.mxu1 %v5495_v40 }
 0x5d4   :  { %3055 = vmatpush.bf16.msrb.mxu1 %v5496_v26 }
 0x5d6   :  { %2627 = vperm.xlu0 %3431, %v2622_v15  }
 0x5d8   :  { %3056 = vmatpush.bf16.msrb.mxu1 %v5497_v6 }
 0x5dc   :  { %3057 = vmatpush.bf16.msrb.mxu1 %v3576_v49 }
 0x5e0   :  { %v2738_v4 = vpop.xlane.xlu1 %2737  ;;  %3058 = vmatpush.bf16.msrb.mxu1 %v5498_v18  ;;  %v2879_v23 = vpop.xlane.xlu2 %2878 }
 0x5e1   :  { %v2760_v2 = vperm.slane %v2738_v4, %v3796_v51  ;;  %v2901_v40 = vperm.slane %v2879_v23, %v3796_v51 }
 0x5e4   :  { %3059 = vmatpush.bf16.msrb.mxu1 %v3577_v17 }
 0x5e5   :  { %v2736_v30 = vpop.xlane.xlu0 %2735 }
 0x5e6   :  { %v2759_v20 = vperm.slane %v2736_v30, %v3796_v51 }
 0x5e8   :  { %v2742_v38 = vpop.xlane.xlu1 %2741  ;;  %3060 = vmatpush.bf16.msrb.mxu1 %v3578_v11  ;;  %v2767_v9 = vsel %vm401_vm0, %v2760_v2, %v2759_v20  ;;  %v2885_v27 = vpop.xlane.xlu2 %2884 }
 0x5e9   :  { %v2762_v34 = vperm.slane %v2742_v38, %v3796_v51  ;;  %v2904_v11 = vperm.slane %v2885_v27, %v3796_v51 }
 0x5ec   :  { %3061 = vmatpush.bf16.msrb.mxu1 %v3579_v46 }
 0x5ed   :  { %v2740_v28 = vpop.xlane.xlu0 %2739 }
 0x5ee   :  { %v2761_v19 = vperm.slane %v2740_v28, %v3796_v51 }
 0x5f0   :  { %v2746_v36 = vpop.xlane.xlu1 %2745  ;;  %v2768_v61 = vsel %vm403_vm1, %v2761_v19, %v2767_v9  ;;  %v2891_v59 = vpop.xlane.xlu2 %2890 }
 0x5f1   :  { %v2769_v62 = vsel %vm405_vm2, %v2762_v34, %v2768_v61  ;;  %v2764_v39 = vperm.slane %v2746_v36, %v3796_v51 }
 0x5f5   :  { %v2744_v42 = vpop.xlane.xlu0 %2743 }
 0x5f6   :  { %v2763_v22 = vperm.slane %v2744_v42, %v3796_v51  ;;  %v2907_v42 = vperm.slane %v2891_v59, %v3796_v51 }
 0x5f8   :  { %v2770_v37 = vsel %vm407_vm3, %v2763_v22, %v2769_v62  ;;  %v2750_v5 = vpop.xlane.xlu1 %2749  ;;  %v2438_v46 = vpop.permute.xlu2 %2437 }
 0x5f9   :  { %v2766_v33 = vperm.slane %v2750_v5, %v3796_v51  ;;  %v2771_v8 = vsel %vm409_vm4, %v2764_v39, %v2770_v37 }
 0x5fd   :  { %v2748_v14 = vpop.xlane.xlu0 %2747 }
 0x5fe   :  { %v2765_v43 = vperm.slane %v2748_v14, %v3796_v51 }
 0x600   :  { %v2772_v32 = vsel %vm411_vm5, %v2765_v43, %v2771_v8  ;;  %v2881_v35 = vpop.xlane.xlu1 %2880  ;;  %v2459_v14 = vpop.permute.xlu2 %2458 }
 0x601   :  { %v2773_v16 = vsel %vm413_vm6, %v2766_v33, %v2772_v32  ;;  %v2902_v4 = vperm.slane %v2881_v35, %v3796_v51 }
 0x602   :  { %v2775_v10 = vsel %vm3814_vm7, %v2773_v16, -1e+30 }
 0x603   :  { %v2776_v31 = vsel %vm417_vm8, %v2775_v10, -inf }
 0x604   :  { %v2777_v48 = vrot.slane %v2776_v31, 4 }
 0x605   :  { %v2877_v29 = vpop.xlane.xlu0 %2876 }
 0x606   :  { %v2778_v53 = vmax.f32 %v2776_v31, %v2777_v48  ;;  %v2900_v21 = vperm.slane %v2877_v29, %v3796_v51 }
 0x608   :  { %v2779_v13 = vrot.slane %v2778_v53, 2  ;;  %v2908_v26 = vsel %vm401_vm0, %v2901_v40, %v2900_v21  ;;  %v2887_v36 = vpop.xlane.xlu1 %2886  ;;  %v2488_v40 = vmul.f32 %v3959_v56, %v2438_v46 }
 0x609   :  { %v2909_v30 = vsel %vm403_vm1, %v2902_v4, %v2908_v26  ;;  %v2905_v23 = vperm.slane %v2887_v36, %v3796_v51 }
 0x60a   :  { %v2780_v52 = vmax.f32 %v2778_v53, %v2779_v13  ;;  %v2480_v53 = vpop.permute.xlu2 %2479 }
 0x60c   :  { %v2781_v15 = vrot.slane %v2780_v52, 1 }
 0x60d   :  { %v2883_v6 = vpop.xlane.xlu0 %2882 }
 0x60e   :  { %v2782_v49 = vmax.f32 %v2780_v52, %v2781_v15  ;;  %v2903_v18 = vperm.slane %v2883_v6, %v3796_v51 }
 0x610   :  { %v2783_v17 = vsub.f32 %v2775_v10, %v2782_v49  ;;  %v2910_v38 = vsel %vm405_vm2, %v2903_v18, %v2909_v30 }
 0x611   :  { %v2911_v20 = vsel %vm407_vm3, %v2904_v11, %v2910_v38 }
 0x612   :  { %v2784_v28 = vmul.f32 1.442695, %v2783_v17  ;;  %v2912_v9 = vsel %vm409_vm4, %v2905_v23, %v2911_v20  ;;  %v2491_v17 = vmul.f32 %v5489_v60, %v2459_v14  ;;  %v2487_v30 = vpop.permute.xlu2 %2486 }
 0x613   :  { %v2495_v14 = vmul.f32 %v5492_v50, %v2487_v30 }
 0x614   :  { %3507 = vpow2.f32 %v2784_v28 }
 0x615   :  { %v2889_v19 = vpop.xlane.xlu0 %2888 }
 0x616   :  { %v2906_v2 = vperm.slane %v2889_v19, %v3796_v51 }
 0x618   :  { %v2913_v61 = vsel %vm411_vm5, %v2906_v2, %v2912_v9 }
 0x619   :  { %v2914_v22 = vsel %vm413_vm6, %v2907_v42, %v2913_v61 }
 0x61a   :  { %v3508_v34 = vpop.eup %3507  ;;  %v2916_v62 = vsel %vm4046_vm9, %v2914_v22, -1e+30 }
 0x61b   :  { %v2786_v37 = vsel %vm3814_vm7, %v3508_v34, 0.0  ;;  %v2917_v5 = vsel %vm417_vm8, %v2916_v62, -inf }
 0x61c   :  { %v2787_v39 = vsel %vm417_vm8, %v2786_v37, 0.0  ;;  %v2918_v27 = vrot.slane %v2917_v5, 4 }
 0x61d   :  { %v2788_v51 = vrot.slane %v2787_v39, 4 }
 0x61e   :  { %v2919_v43 = vmax.f32 %v2917_v5, %v2918_v27 }
 0x61f   :  { %v2789_v33 = vadd.f32 %v2788_v51, %v2787_v39 }
 0x620   :  { %v2445_v8 = vpop.permute.xlu1 %2444  ;;  %v2920_v32 = vrot.slane %v2919_v43, 2 }
 0x621   :  { %v2790_v16 = vrot.slane %v2789_v33, 2  ;;  %v2489_v13 = vmul.f32 %v3961_v57, %v2445_v8 }
 0x622   :  { %v2921_v10 = vmax.f32 %v2919_v43, %v2920_v32  ;;  %v2607_v32 = vpop.permute.xlu2 %2606 }
 0x623   :  { %v2791_v31 = vadd.f32 %v2790_v16, %v2789_v33  ;;  %v2496_v49 = vadd.f32 %v2489_v13, %v2488_v40 }
 0x624   :  { %v2922_v48 = vrot.slane %v2921_v10, 1 }
 0x625   :  { %v2792_v29 = vrot.slane %v2791_v31, 1 }
 0x626   :  { %v2923_v59 = vmax.f32 %v2921_v10, %v2922_v48 }
 0x627   :  { %v2793_v12 = vadd.f32 %v2792_v29, %v2791_v31  ;;  %v5499_v31 = vld [vmem:[#allocation22_spill] sm:$0xff] }
 0x628   :  { %v2924_v35 = vsub.f32 %v2916_v62, %v2923_v59  ;;  %v2473_v21 = vpop.permute.xlu1 %2472  ;;  %v2452_v52 = vpop.permute.xlu0 %2451  ;;  %v2494_v62 = vmul.f32 %v3992_v54, %v2480_v53 }
 0x629   :  { %v2794_v15 = vadd.f32 1e-20, %v2793_v12  ;;  %v2490_v26 = vmul.f32 %v5488_v0, %v2452_v52  ;;  %v2493_v42 = vmul.f32 %v5479_v55, %v2473_v21 }
 0x62a   :  { %v2925_v6 = vmul.f32 1.442695, %v2924_v35 }
 0x62b   :  { %3509 = vrcp.f32 %v2794_v15  ;;  %v2497_v4 = vadd.f32 %v2496_v49, %v2490_v26 }
 0x62c   :  { %3511 = vpow2.f32 %v2925_v6  ;;  %v5272_v18 = vpop.f32.mrf.mxu0 }
 0x62d   :  { %v2498_v28 = vadd.f32 %v2497_v4, %v2491_v17 }
 0x630   :  { %v2466_v38 = vpop.permute.xlu0 %2465  ;;  %v2586_v23 = vpop.permute.xlu1 %2585 }
 0x631   :  { %v3510_v11 = vpop.eup %3509  ;;  %v2492_v36 = vmul.f32 %v5490_v7, %v2466_v38  ;;  %v2630_v15 = vmul.f32 %v4160_v24, %v2586_v23 }
 0x632   :  { %v3512_v20 = vpop.eup %3511  ;;  %v5276_v46 = vmul.f32 %v3510_v11, %v2786_v37  ;;  %v2307_v19 = vpop.f32.mrf.mxu3 }
 0x633   :  { %v5280_v2 = vsel %vm4046_vm9, %v3512_v20, 0.0  ;;  %v2499_v9 = vadd.f32 %v2498_v28, %v2492_v36  ;;  %v2614_v28 = vpop.permute.xlu2 %2613  ;;  %v2633_v36 = vmul.f32 %v4183_v1, %v2607_v32 }
 0x634   :  { %3274 = vst.msk [vmem:[%s5356_s14 + $0x30] sm:$0xff] %vm417_vm8, %v5276_v46  ;;  %v2928_v61 = vsel %vm417_vm8, %v5280_v2, 0.0  ;;  %v2818_v22 = vperm.slane %v5276_v46, 3  ;;  %v2804_v34 = vperm.slane %v5276_v46, 1  ;;  %v2797_v45 = vperm.slane %v5276_v46, 0  ;;  %v2322_v39 = vpop.f32.mrf.mxu0 }
 0x635   :  { %v2929_v37 = vrot.slane %v2928_v61, 4  ;;  %v2500_v5 = vadd.f32 %v2499_v9, %v2493_v42  ;;  %v2832_v53 = vperm.slane %v5276_v46, 5  ;;  %v2825_v59 = vperm.slane %v5276_v46, 4 }
 0x636   :  { %2823 = vperm.xlu2 %3430, %v2818_v22   ;;  %2809 = vperm.xlu1 %3432, %v2804_v34   ;;  %v2811_v12 = vperm.slane %v5276_v46, 2  ;;  %v2839_v23 = vperm.slane %v5276_v46, 6  ;;  %v2634_v9 = vmul.f32 %v5440_v44, %v2614_v28 }
 0x637   :  { %v2930_v27 = vadd.f32 %v2929_v37, %v2928_v61  ;;  %v2501_v51 = vadd.f32 %v2500_v5, %v2494_v62  ;;  %2802 = vperm.xlu0 %3431, %v2797_v45   ;;  %v5309_v61 = vld [vmem:[%s5361_s12] ss:$0 sm:$0xff] }
 0x638   :  { %v2579_v43 = vpop.permute.xlu0 %2578  ;;  %v2600_v29 = vpop.permute.xlu1 %2599  ;;  %v2308_v22 = vadd.f32 %v5309_v61, %v2307_v19 }
 0x639   :  { %v2931_v33 = vrot.slane %v2930_v27, 2  ;;  %v2502_v8 = vadd.f32 %v2501_v51, %v2495_v14  ;;  %v2629_v35 = vmul.f32 %v4158_v47, %v2579_v43  ;;  %v2632_v38 = vmul.f32 %v4176_v63, %v2600_v29 }
 0x63a   :  { %v2309_v16 = vpop.f32.mrf.mxu3  ;;  %v2321_v51 = vadd.f32 %v5272_v18, %v2308_v22 }
 0x63b   :  { %v2932_v10 = vadd.f32 %v2931_v33, %v2930_v27  ;;  %v3411_v48 = vpack.c.bf16 %v2502_v8, %v5499_v31  ;;  %v2637_v17 = vadd.f32 %v2630_v15, %v2629_v35  ;;  %v2846_v16 = vperm.slane %v5276_v46, 7 }
 0x63d   :  { %v2933_v13 = vrot.slane %v2932_v10, 1  ;;  %v2654_v21 = vunpack.c.l.b16 %v3411_v48  ;;  %v2655_v52 = vunpack.c.h.b16 %v3411_v48 }
 0x63e   :  { %2837 = vperm.xlu2 %3430, %v2832_v53   ;;  %2830 = vperm.xlu1 %3432, %v2825_v59  }
 0x63f   :  { %v2934_v40 = vadd.f32 %v2933_v13, %v2932_v10  ;;  %2816 = vperm.xlu0 %3431, %v2811_v12   ;;  %v2657_v26 = vpack.c.b16 %v2654_v21, %v2654_v21  ;;  %v2658_v6 = vpack.c.b16 %v2655_v52, %v2655_v52 }
 0x640   :  { %v2593_v49 = vpop.permute.xlu0 %2592  ;;  %v2621_v42 = vpop.permute.xlu1 %2620 }
 0x641   :  { %v2935_v4 = vadd.f32 1e-20, %v2934_v40  ;;  %v2631_v30 = vmul.f32 %v4173_v58, %v2593_v49  ;;  %2671 = vmatmul.bf16.vlgmr.msrb.gmra.mxu3 %v2657_v26  ;;  %2684 = vmatmul.bf16.vlgmr.msrb.gmra.mxu0 %v2658_v6  ;;  %v2635_v37 = vmul.f32 %v5441_v25, %v2621_v42 }
 0x643   :  { %3513 = vrcp.f32 %v2935_v4  ;;  %v2638_v11 = vadd.f32 %v2637_v17, %v2631_v30 }
 0x645   :  { %v2639_v20 = vadd.f32 %v2638_v11, %v2632_v38 }
 0x647   :  { %v2640_v34 = vadd.f32 %v2639_v20, %v2633_v36  ;;  %2844 = vperm.xlu0 %3431, %v2839_v23  }
 0x648   :  { %v2628_v45 = vpop.permute.xlu0 %2627 }
 0x649   :  { %v3514_v62 = vpop.eup %3513  ;;  %v2641_v5 = vadd.f32 %v2640_v34, %v2634_v9  ;;  %v2636_v27 = vmul.f32 %v5442_v3, %v2628_v45 }
 0x64a   :  { %v2937_v39 = vmul.f32 %v3514_v62, %v5280_v2 }
 0x64b   :  { %v2642_v14 = vadd.f32 %v2641_v5, %v2635_v37 }
 0x64c   :  { %3275 = vst.msk [vmem:[%s5362_s15 + $0x30] sm:$0xff] %vm417_vm8, %v2937_v39  ;;  %v2333_v19 = vpop.f32.mrf.mxu1  ;;  %v2945_v43 = vperm.slane %v2937_v39, 1  ;;  %v2938_v33 = vperm.slane %v2937_v39, 0  ;;  %v2959_v18 = vperm.slane %v2937_v39, 3  ;;  %v2952_v31 = vperm.slane %v2937_v39, 2 }
 0x64d   :  { %v2643_v8 = vadd.f32 %v2642_v14, %v2636_v27  ;;  %v2334_v32 = vadd.f32 %v2333_v19, %v2321_v51  ;;  %v2966_v29 = vperm.slane %v2937_v39, 4  ;;  %v2980_v12 = vperm.slane %v2937_v39, 6 }
 0x64e   :  { %2950 = vperm.xlu2 %3430, %v2945_v43   ;;  %2943 = vperm.xlu1 %3432, %v2938_v33   ;;  %v2973_v13 = vperm.slane %v2937_v39, 5  ;;  %v2987_v35 = vperm.slane %v2937_v39, 7 }
 0x64f   :  { %v2648_v2 = vpack.c.bf16 %v2643_v8, %v2643_v8  ;;  %3515 = vtanh.f32 %v2334_v32  ;;  %2851 = vperm.xlu0 %3431, %v2846_v16  }
 0x651   :  { %2649 = vst [vmem:[#allocation3 + $0x8] sm:$0xf] %v2648_v2 }
 0x654   :  { %v2335_v10 = vpop.f32.mrf.mxu1 }
 0x655   :  { %v3516_v48 = vpop.eup %3515 }
 0x656   :  { %3267 = vst [vmem:[%s5364_s13 + $0x20] sm:$0xff] %v3516_v48  ;;  %2964 = vperm.xlu2 %3430, %v2959_v18   ;;  %2957 = vperm.xlu1 %3432, %v2952_v31  }
 0x657   :  { %2971 = vperm.xlu0 %3431, %v2966_v29  }
 0x658   :  { %v2651_v53 = vld [vmem:[#allocation3 + $0x8] sm:$0xf] }
 0x659   :  { %v2656_v46 = vunpack.c.l.b16 %v2651_v53 }
 0x65b   :  { %v2659_v59 = vpack.c.b16 %v2656_v46, %v2656_v46 }
 0x65d   :  { %2697 = vmatmul.bf16.vlgmr.msra.gmra.mxu1 %v2659_v59 }
 0x65e   :  { %2985 = vperm.xlu2 %3430, %v2980_v12   ;;  %2978 = vperm.xlu1 %3432, %v2973_v13  }
 0x65f   :  { %2992 = vperm.xlu0 %3431, %v2987_v35  }
 0x690   :  { %v2824_v52 = vpop.permute.xlu2 %2823 }
 0x691   :  { %v2856_v17 = vmul.f32 %v5489_v60, %v2824_v52 }
 0x698   :  { %v2838_v30 = vpop.permute.xlu2 %2837 }
 0x699   :  { %v2858_v42 = vmul.f32 %v5479_v55, %v2838_v30 }
 0x6a8   :  { %v2810_v40 = vpop.permute.xlu1 %2809  ;;  %v2951_v9 = vpop.permute.xlu2 %2950 }
 0x6a9   :  { %v2803_v21 = vpop.permute.xlu0 %2802  ;;  %v2854_v15 = vmul.f32 %v3961_v57, %v2810_v40  ;;  %v2995_v55 = vmul.f32 %v4160_v24, %v2951_v9 }
 0x6aa   :  { %v2853_v26 = vmul.f32 %v3959_v56, %v2803_v21 }
 0x6ac   :  { %v2861_v49 = vadd.f32 %v2854_v15, %v2853_v26 }
 0x6b0   :  { %v2831_v11 = vpop.permute.xlu1 %2830  ;;  %v2965_v39 = vpop.permute.xlu2 %2964 }
 0x6b1   :  { %v2817_v6 = vpop.permute.xlu0 %2816  ;;  %v2857_v36 = vmul.f32 %v5490_v7, %v2831_v11 }
 0x6b2   :  { %v2855_v4 = vmul.f32 %v5488_v0, %v2817_v6 }
 0x6b4   :  { %v2862_v38 = vadd.f32 %v2861_v49, %v2855_v4 }
 0x6b6   :  { %v2863_v28 = vadd.f32 %v2862_v38, %v2856_v17 }
 0x6b8   :  { %v2864_v23 = vadd.f32 %v2863_v28, %v2857_v36  ;;  %v2986_v10 = vpop.permute.xlu2 %2985 }
 0x6b9   :  { %v2845_v20 = vpop.permute.xlu0 %2844 }
 0x6ba   :  { %v2865_v57 = vadd.f32 %v2864_v23, %v2858_v42  ;;  %v2859_v56 = vmul.f32 %v3992_v54, %v2845_v20 }
 0x6bc   :  { %v2866_v0 = vadd.f32 %v2865_v57, %v2859_v56 }
 0x6be   :  { %v2685_v22 = vpop.f32.mrf.mxu0 }
 0x6c0   :  { %v2944_v34 = vpop.permute.xlu1 %2943 }
 0x6c1   :  { %v2852_v45 = vpop.permute.xlu0 %2851  ;;  %v2994_v5 = vmul.f32 %v4158_v47, %v2944_v34 }
 0x6c2   :  { %v2860_v60 = vmul.f32 %v5492_v50, %v2852_v45  ;;  %v2997_v50 = vmul.f32 %v4176_v63, %v2965_v39 }
 0x6c3   :  { %v3002_v54 = vadd.f32 %v2995_v55, %v2994_v5 }
 0x6c4   :  { %v2867_v62 = vadd.f32 %v2866_v0, %v2860_v60  ;;  %v2672_v37 = vpop.f32.mrf.mxu3 }
 0x6c5   :  { %v2673_v53 = vadd.f32 %v5309_v61, %v2672_v37 }
 0x6c6   :  { %v3416_v7 = vpack.c.bf16 %v2867_v62, %v5096_v41  ;;  %v2687_v14 = vpop.f32.mrf.mxu0 }
 0x6c7   :  { %v2686_v13 = vadd.f32 %v2685_v22, %v2673_v53 }
 0x6c8   :  { %v2958_v27 = vpop.permute.xlu1 %2957  ;;  %v3019_v51 = vunpack.c.l.b16 %v3416_v7  ;;  %v3020_v19 = vunpack.c.h.b16 %v3416_v7 }
 0x6c9   :  { %v2996_v43 = vmul.f32 %v4173_v58, %v2958_v27  ;;  %v2972_v33 = vpop.permute.xlu0 %2971  ;;  %v3000_v58 = vmul.f32 %v5441_v25, %v2986_v10 }
 0x6ca   :  { %v3022_v8 = vpack.c.b16 %v3019_v51, %v3019_v51  ;;  %v3023_v32 = vpack.c.b16 %v3020_v19, %v3020_v19  ;;  %v2998_v41 = vmul.f32 %v4183_v1, %v2972_v33 }
 0x6cb   :  { %v3003_v16 = vadd.f32 %v3002_v54, %v2996_v43 }
 0x6cc   :  { %3036 = vmatmul.bf16.vlgmr.msra.gmra.mxu3 %v3022_v8  ;;  %3049 = vmatmul.bf16.vlgmr.msra.gmra.mxu0 %v3023_v32  ;;  %v2674_v47 = vpop.f32.mrf.mxu3 }
 0x6cd   :  { %v3004_v2 = vadd.f32 %v3003_v16, %v2997_v50 }
 0x6cf   :  { %v3005_v18 = vadd.f32 %v3004_v2, %v2998_v41 }
 0x6d0   :  { %v2979_v24 = vpop.permute.xlu1 %2978 }
 0x6d1   :  { %v2999_v31 = vmul.f32 %v5440_v44, %v2979_v24  ;;  %v2993_v48 = vpop.permute.xlu0 %2992 }
 0x6d2   :  { %v3001_v63 = vmul.f32 %v5442_v3, %v2993_v48 }
 0x6d3   :  { %v3006_v29 = vadd.f32 %v3005_v18, %v2999_v31 }
 0x6d5   :  { %v3007_v46 = vadd.f32 %v3006_v29, %v3000_v58 }
 0x6d7   :  { %v3008_v59 = vadd.f32 %v3007_v46, %v3001_v63 }
 0x6d9   :  { %v3013_v12 = vpack.c.bf16 %v3008_v59, %v3008_v59 }
 0x6da   :  { %v2698_v35 = vpop.f32.mrf.mxu1 }
 0x6db   :  { %3014 = vst [vmem:[#allocation3 + $0x8] sm:$0xf] %v3013_v12  ;;  %v2699_v1 = vadd.f32 %v2698_v35, %v2686_v13 }
 0x6dd   :  { %3517 = vtanh.f32 %v2699_v1 }
 0x6e2   :  { %v2700_v21 = vpop.f32.mrf.mxu1  ;;  %v3016_v52 = vld [vmem:[#allocation3 + $0x8] sm:$0xf] }
 0x6e3   :  { %v3518_v40 = vpop.eup %3517  ;;  %v3021_v44 = vunpack.c.l.b16 %v3016_v52 }
 0x6e4   :  { %3270 = vst [vmem:[%s5364_s13 + $0x28] sm:$0xff] %v3518_v40 }
 0x6e5   :  { %v3024_v25 = vpack.c.b16 %v3021_v44, %v3021_v44 }
 0x6e7   :  { %3062 = vmatmul.bf16.vlgmr.msrb.gmra.mxu1 %v3024_v25 }
 0x749   :  { %v3050_v15 = vpop.f32.mrf.mxu0 }
 0x74f   :  { %v3037_v26 = vpop.f32.mrf.mxu3 }
 0x750   :  { %v3038_v49 = vadd.f32 %v5309_v61, %v3037_v26 }
 0x751   :  { %v3052_v3 = vpop.f32.mrf.mxu0 }
 0x752   :  { %v3051_v4 = vadd.f32 %v3050_v15, %v3038_v49 }
 0x757   :  { %v3039_v6 = vpop.f32.mrf.mxu3 }
 0x764   :  { %v3063_v17 = vpop.f32.mrf.mxu1 }
 0x765   :  { %v3064_v30 = vadd.f32 %v3063_v17, %v3051_v4 }
 0x767   :  { %3519 = vtanh.f32 %v3064_v30 }
 0x76c   :  { %v3065_v38 = vpop.f32.mrf.mxu1 }
 0x76d   :  { %v3520_v11 = vpop.eup %3519 }
 0x76e   :  { %3273 = vst [vmem:[%s5364_s13 + $0x30] sm:$0xff] %v3520_v11 }

</bundles_post_ra>
